<compile_context>
chip_gen: v5e
topology: v5e:2x2
jax: 0.10.0
libtpu: 0.0.40
codegen_flags: <defaults>
</compile_context>

<pallas_src>
import math

import jax
import jax.numpy as jnp
import numpy as np
from jax import lax
from jax.experimental import pallas as pl
from jax.experimental.pallas import tpu as pltpu


_LANE = 128
# Keep the double-buffered output block under this many bytes so we stay
# comfortably inside the *default* scoped VMEM limit on every generation
# (16 MiB on v5e, 32 MiB on v6e/v7x) without having to raise vmem_limit_bytes.
_OUT_BLOCK_BUDGET_BYTES = 8 * 1024 * 1024


def _two_tensorcores():
    """True on megacore parts (v7x has 2 TensorCores per chip)."""
    try:
        kind = jax.devices()[0].device_kind.lower()
    except Exception:
        return False
    return "v7" in kind


def _pick_lane_tile(hw_pad, rows, prefer_even_split):
    """Pick the lane tile for the (padded) flattened H*W axis.

    hw_pad is a multiple of 128.  `rows` = bs * C (non-lane extent of the
    output block).  Take the largest multiple-of-128 divisor of hw_pad whose
    double-buffered output block fits the budget; on 2-TC chips additionally
    prefer a tile giving an even number of grid steps (balanced cores).
    """
    cands = [t for t in range(_LANE, hw_pad + 1, _LANE) if hw_pad % t == 0]
    fits = [t for t in cands if 2 * rows * t * 4 <= _OUT_BLOCK_BUDGET_BYTES]
    if not fits:
        fits = [cands[0]]          # smallest legal tile; budget is best-effort
    best = max(fits)
    if prefer_even_split:
        even = [t for t in fits if (hw_pad // t) % 2 == 0]
        if even:
            best = max(even)
    return best


def _make_kernel(bs, npf, w, tile_hw, use_float_divmod):
    """Kernel writing a (bs, 2*npf, tile_hw) NCHW-flat output block."""
    w_f = np.float32(w)
    inv_w = np.float32(1.0) / w_f

    def kernel(c_ref, o_ref):
        # c_ref: (npf, 3) per-channel constants: [:,0]=coeff_y, [:,1]=coeff_x,
        #        [:,2]=phase (cos(x) == sin(x + pi/2)).
        # o_ref: (bs, 2*npf, tile_hw) output block for spatial tile i.
        off = pl.program_id(0) * tile_hw
        p = lax.broadcasted_iota(jnp.int32, (1, tile_hw), 1) + off

        if use_float_divmod:
            # floor((p + 0.5) * (1/w)) == p // w exactly while
            # (padded H*W + w) < 2**22; avoids the long int-div VPU sequence.
            pf = p.astype(jnp.float32)
            yf = jnp.floor((pf + np.float32(0.5)) * inv_w)
            xf = pf - yf * w_f
            y1 = yf + np.float32(1.0)    # cumsum over H == row + 1
            x1 = xf + np.float32(1.0)    # cumsum over W == col + 1
        else:
            y = p // w
            x = p - y * w
            y1 = (y + 1).astype(jnp.float32)
            x1 = (x + 1).astype(jnp.float32)

        cy = c_ref[:, 0:1]               # (npf, 1)
        cx = c_ref[:, 1:2]
        ph = c_ref[:, 2:3]

        # One mul + add + sin per element; batch-independent slab computed once
        # per spatial tile (no batch grid axis, no scratch round trip).
        emb_y = jnp.sin(y1 * cy + ph)    # (npf, tile_hw)
        emb_x = jnp.sin(x1 * cx + ph)

        # Two sublane-slice stores (no feature-axis concat), broadcast across
        # the batch dim of the block.  npf should be a multiple of 8 to keep
        # the split aligned to the (8,128) tiling (perf only, not correctness).
        o_ref[:, :npf, :] = jnp.broadcast_to(emb_y[None], (bs, npf, tile_hw))
        o_ref[:, npf:, :] = jnp.broadcast_to(emb_x[None], (bs, npf, tile_hw))

    return kernel


def position_embedding_sine(x, num_pos_feats=64, temperature=10000,
                            normalize=False, scale=None):
    """Pallas implementation of PositionEmbeddingSine.forward (x is NCHW)."""
    if scale is not None and not normalize:
        raise ValueError("normalize should be True if scale is passed")
    if scale is None:
        scale = 2 * math.pi

    bs, _, h, w = x.shape
    npf = int(num_pos_feats)
    C = 2 * npf
    hw = h * w
    eps = 1e-6

    # Host-precomputed per-channel constants (length npf on the sublane axis).
    j = np.arange(npf, dtype=np.float32)
    dim_t = np.float32(temperature) ** (2.0 * np.floor(j / 2.0) / np.float32(npf))
    inv_dim_t = (np.float32(1.0) / dim_t).astype(np.float32)
    phase = np.where(j % 2 == 0, 0.0, np.pi / 2.0).astype(np.float32)
    fy = np.float32(scale) / np.float32(h + eps) if normalize else np.float32(1.0)
    fx = np.float32(scale) / np.float32(w + eps) if normalize else np.float32(1.0)
    consts = np.stack([inv_dim_t * fy, inv_dim_t * fx, phase],
                      axis=1).astype(np.float32)          # (npf, 3)

    # Pad the flattened spatial axis to a multiple of 128 so output stores are
    # always lane-dense / unmasked; the pad (if any) is sliced off afterwards.
    hw_pad = ((hw + _LANE - 1) // _LANE) * _LANE
    tile_hw = _pick_lane_tile(hw_pad, bs * C, _two_tensorcores())
    num_tiles = hw_pad // tile_hw
    use_float_divmod = (hw_pad + w) < (1 << 22)

    kernel = _make_kernel(bs, npf, w, tile_hw, use_float_divmod)

    out = pl.pallas_call(
        kernel,
        out_shape=jax.ShapeDtypeStruct((bs, C, hw_pad), jnp.float32),
        grid=(num_tiles,),
        in_specs=[pl.BlockSpec((npf, 3), lambda i: (0, 0))],
        out_specs=pl.BlockSpec((bs, C, tile_hw), lambda i: (0, 0, i)),
        compiler_params=pltpu.CompilerParams(
            dimension_semantics=("parallel",)),
    )(jnp.asarray(consts))

    if hw_pad != hw:
        out = out[:, :, :hw]
    # NCHW view is a metadata-only reshape of the NCHW-flat layout.
    return out.reshape(bs, C, h, w)


def position_embedding_sine_ref(x, num_pos_feats=64, temperature=10000,
                                normalize=False, scale=None):
    """Pure-JAX reference mirroring the PyTorch code line by line."""
    if scale is None:
        scale = 2 * math.pi
    bs, _, h, w = x.shape
    not_mask = jnp.ones((bs, h, w), jnp.float32)
    y_embed = jnp.cumsum(not_mask, axis=1)
    x_embed = jnp.cumsum(not_mask, axis=2)
    if normalize:
        eps = 1e-6
        y_embed = y_embed / (y_embed[:, -1:, :] + eps) * scale
        x_embed = x_embed / (x_embed[:, :, -1:] + eps) * scale
    dim_t = jnp.arange(num_pos_feats, dtype=jnp.float32)
    dim_t = temperature ** (2 * jnp.floor(dim_t / 2) / num_pos_feats)
    pos_x = x_embed[:, :, :, None] / dim_t
    pos_y = y_embed[:, :, :, None] / dim_t
    pos_x = jnp.stack(
        [jnp.sin(pos_x[..., 0::2]), jnp.cos(pos_x[..., 1::2])], axis=4
    ).reshape(bs, h, w, -1)
    pos_y = jnp.stack(
        [jnp.sin(pos_y[..., 0::2]), jnp.cos(pos_y[..., 1::2])], axis=4
    ).reshape(bs, h, w, -1)
    pos = jnp.concatenate([pos_y, pos_x], axis=3).transpose(0, 3, 1, 2)
    return pos


if __name__ == "__main__":
    key = jax.random.PRNGKey(0)
    # NCHW input (only the shape is consumed by the forward pass).
    x = jax.random.normal(key, (2, 4, 16, 16), dtype=jnp.float32)
    num_pos_feats = 32  # output channels = 64

    # normalize=False (module defaults)
    out = position_embedding_sine(x, num_pos_feats=num_pos_feats)
    out = jax.block_until_ready(out)
    ref = position_embedding_sine_ref(x, num_pos_feats=num_pos_feats)
    assert out.shape == (2, 2 * num_pos_feats, 16, 16), out.shape
    np.testing.assert_allclose(np.asarray(out), np.asarray(ref),
                               rtol=1e-5, atol=5e-5)

    # normalize=True path (folded scale/(h+eps), scale/(w+eps) constants)
    out_n = position_embedding_sine(x, num_pos_feats=num_pos_feats,
                                    normalize=True)
    out_n = jax.block_until_ready(out_n)
    ref_n = position_embedding_sine_ref(x, num_pos_feats=num_pos_feats,
                                        normalize=True)
    np.testing.assert_allclose(np.asarray(out_n), np.asarray(ref_n),
                               rtol=1e-5, atol=5e-5)

    # Non-128-aligned spatial extent: exercises the H*W padding + slice path
    # and the float-reciprocal row/col decomposition with non-pow2 W.
    x2 = jax.random.normal(key, (1, 4, 5, 12), dtype=jnp.float32)
    out2 = jax.block_until_ready(
        position_embedding_sine(x2, num_pos_feats=num_pos_feats))
    ref2 = position_embedding_sine_ref(x2, num_pos_feats=num_pos_feats)
    assert out2.shape == (1, 2 * num_pos_feats, 5, 12), out2.shape
    np.testing.assert_allclose(np.asarray(out2), np.asarray(ref2),
                               rtol=1e-5, atol=5e-5)

    print("KERNEL_OK")
</pallas_src>

<mosaic_0001>
module attributes {stable_mosaic.version = 11 : i64} {
  func.func @kernel(%arg0: i32, %arg1: memref<32x3xf32, #tpu.memory_space<vmem>>, %arg2: memref<2x64x256xf32, #tpu.memory_space<vmem>>) attributes {dimension_semantics = [#tpu.dimension_semantics<parallel>], iteration_bounds = array<i64: 1>, scalar_prefetch = 0 : i64, scratch_operands = 0 : i64, tpu.core_type = #tpu.core_type<tc>, window_params = [{pipeline_mode = #tpu.pipeline_mode<synchronous>, transform_indices = @transform_0, window_bounds = array<i64: 32, 3>}, {transform_indices = @transform_1, window_bounds = array<i64: 2, 64, 256>}]} {
    %c256_i32 = arith.constant 256 : i32
    %0 = arith.muli %arg0, %c256_i32 : i32
    %1 = tpu.iota {dimensions = array<i32: 1>} : vector<1x256xi32>
    %2 = vector.broadcast %0 : i32 to vector<1x256xi32>
    %3 = arith.addi %1, %2 : vector<1x256xi32>
    %4 = arith.sitofp %3 : vector<1x256xi32> to vector<1x256xf32>
    %cst = arith.constant 5.000000e-01 : f32
    %5 = vector.broadcast %cst : f32 to vector<1x256xf32>
    %6 = arith.addf %4, %5 : vector<1x256xf32>
    %cst_0 = arith.constant 6.250000e-02 : f32
    %7 = vector.broadcast %cst_0 : f32 to vector<1x256xf32>
    %8 = arith.mulf %6, %7 : vector<1x256xf32>
    %9 = math.floor %8 : vector<1x256xf32>
    %cst_1 = arith.constant 1.600000e+01 : f32
    %10 = vector.broadcast %cst_1 : f32 to vector<1x256xf32>
    %11 = arith.mulf %9, %10 : vector<1x256xf32>
    %12 = arith.subf %4, %11 : vector<1x256xf32>
    %cst_2 = arith.constant 1.000000e+00 : f32
    %13 = vector.broadcast %cst_2 : f32 to vector<1x256xf32>
    %14 = arith.addf %9, %13 : vector<1x256xf32>
    %cst_3 = arith.constant 1.000000e+00 : f32
    %15 = vector.broadcast %cst_3 : f32 to vector<1x256xf32>
    %16 = arith.addf %12, %15 : vector<1x256xf32>
    %c0 = arith.constant 0 : index
    %c0_4 = arith.constant 0 : index
    %17 = vector.load %arg1[%c0, %c0_4] : memref<32x3xf32, #tpu.memory_space<vmem>>, vector<32x1xf32>
    %c0_5 = arith.constant 0 : index
    %c1 = arith.constant 1 : index
    %18 = vector.load %arg1[%c0_5, %c1] : memref<32x3xf32, #tpu.memory_space<vmem>>, vector<32x1xf32>
    %c0_6 = arith.constant 0 : index
    %c2 = arith.constant 2 : index
    %19 = vector.load %arg1[%c0_6, %c2] : memref<32x3xf32, #tpu.memory_space<vmem>>, vector<32x1xf32>
    %20 = vector.broadcast %14 : vector<1x256xf32> to vector<32x256xf32>
    %21 = vector.broadcast %17 : vector<32x1xf32> to vector<32x256xf32>
    %22 = arith.mulf %20, %21 : vector<32x256xf32>
    %23 = vector.broadcast %19 : vector<32x1xf32> to vector<32x256xf32>
    %24 = arith.addf %22, %23 : vector<32x256xf32>
    %25 = math.sin %24 : vector<32x256xf32>
    %26 = vector.broadcast %16 : vector<1x256xf32> to vector<32x256xf32>
    %27 = vector.broadcast %18 : vector<32x1xf32> to vector<32x256xf32>
    %28 = arith.mulf %26, %27 : vector<32x256xf32>
    %29 = vector.broadcast %19 : vector<32x1xf32> to vector<32x256xf32>
    %30 = arith.addf %28, %29 : vector<32x256xf32>
    %31 = math.sin %30 : vector<32x256xf32>
    %32 = vector.shape_cast %25 : vector<32x256xf32> to vector<1x32x256xf32>
    %33 = vector.shape_cast %32 : vector<1x32x256xf32> to vector<1x32x256xf32>
    %34 = vector.broadcast %33 : vector<1x32x256xf32> to vector<2x32x256xf32>
    %c0_7 = arith.constant 0 : index
    %c0_8 = arith.constant 0 : index
    %c0_9 = arith.constant 0 : index
    %35 = vector.load %arg2[%c0_7, %c0_8, %c0_9] : memref<2x64x256xf32, #tpu.memory_space<vmem>>, vector<2x32x256xf32>
    tpu.vector_store %arg2[%c0_7, %c0_8, %c0_9], %34 {strides = array<i32>} : memref<2x64x256xf32, #tpu.memory_space<vmem>>, vector<2x32x256xf32>,
    %36 = vector.shape_cast %31 : vector<32x256xf32> to vector<1x32x256xf32>
    %37 = vector.shape_cast %36 : vector<1x32x256xf32> to vector<1x32x256xf32>
    %38 = vector.broadcast %37 : vector<1x32x256xf32> to vector<2x32x256xf32>
    %c0_10 = arith.constant 0 : index
    %c32 = arith.constant 32 : index
    %c0_11 = arith.constant 0 : index
    %39 = vector.load %arg2[%c0_10, %c32, %c0_11] : memref<2x64x256xf32, #tpu.memory_space<vmem>>, vector<2x32x256xf32>
    tpu.vector_store %arg2[%c0_10, %c32, %c0_11], %38 {strides = array<i32>} : memref<2x64x256xf32, #tpu.memory_space<vmem>>, vector<2x32x256xf32>,
    return
  }
  func.func @transform_0(%arg0: i32) -> (i32, i32) {
    %c0_i32 = arith.constant 0 : i32
    %c0_i32_0 = arith.constant 0 : i32
    %c0_i32_1 = arith.constant 0 : i32
    return %c0_i32, %c0_i32_0 : i32, i32
  }
  func.func @transform_1(%arg0: i32) -> (i32, i32, i32) {
    %c0_i32 = arith.constant 0 : i32
    %c0_i32_0 = arith.constant 0 : i32
    %c0_i32_1 = arith.constant 0 : i32
    return %c0_i32, %c0_i32_0, %arg0 : i32, i32, i32
  }
}

</mosaic_0001>

<bundles_post_ra>
// kernel: tpu_custom_call.1
= control target key start
LH: loop header
LB: loop body
LE: loop exit
PB: predicated region body
PF: predicated region fallthrough
CT: control target
= control target key end

     0   :  { %v2745_v2 = vmov 1   ;;  %v2746_v3 = vmov 0   ;;  %s4628_s0 = inlined_call_operand.vmem [shape: f32[32,3], index: 0, kind: input, shape index: {}]   ;;  %s4629_s1 = inlined_call_operand.hbm [shape: f32[2,64,256], index: 1, kind: output, shape index: {}]  }
   0x1   :  { %v34_v0 = vld [vmem:[%s4628_s0 + $0x10] sm:$0xff]  ;;  %v32_v1 = vld [vmem:[%s4628_s0] sm:$0xff]  ;;  %2712 = vset.pattern.permute.xlu2 %v2745_v2  ;;  %2711 = vset.pattern.permute.xlu1 %v2746_v3 }
   0x2   :  { %6 = vsyncpa [#allocation3], 0  ;;  %2710 = vset.pattern.permute.xlu0 %v2746_v3  ;;  %48 = vperm.xlu1 %2711, %v34_v0   ;;  %v35_v4 = vld [vmem:[%s4628_s0 + $0x18] sm:$0xff]  ;;  %v33_v5 = vld [vmem:[%s4628_s0 + $0x8] sm:$0xff]  ;;  %v2747_v6 = vmov 2   ;;  %v10_v7 = vlaneseq  ;;  %s2754_s0 = smov [#allocation2]  }
   0x3   :  { %1329 = vperm.xlu2 %2712, %v32_v1   ;;  %38 = vperm.xlu0 %2710, %v32_v1   ;;  %v2748_v58 = vmov 683565275   ;;  %v2749_v60 = vmov 2475754826   ;;  %s2636_s14 = sshll.u32 %s2754_s0, 4  ;;  %s2638_s17 = sshll.u32 %s4629_s1, 4  ;;  %s2637_s14 = int_to_ptr.vmem [resolvable:$true] %s2636_s14  ;;  %s2639_s17 = int_to_ptr.hbm [resolvable:$true] %s2638_s17 }
   0x4   :  { %v11_v8 = vand.u32 127, %v10_v7  ;;  %v2752_v7 = vmov 920167782   ;;  %s2755_s18 = smov 256   ;;  %s2756_s19 = smov 16  }
   0x6   :  { %v12_v9 = vadd.s32 128, %v11_v8  ;;  %v16_v10 = vcvt.s32.f32 %v11_v8 }
   0x8   :  { %v17_v11 = vcvt.s32.f32 %v12_v9  ;;  %v18_v12 = vadd.f32 0.5, %v16_v10 }
   0xa   :  { %53 = vperm.xlu1 %2711, %v35_v4   ;;  %v19_v13 = vadd.f32 0.5, %v17_v11  ;;  %v20_v14 = vmul.f32 0.0625, %v18_v12 }
   0xb   :  { %1333 = vperm.xlu2 %2712, %v33_v5   ;;  %43 = vperm.xlu0 %2710, %v33_v5  }
   0xc   :  { %v21_v15 = vmul.f32 0.0625, %v19_v13  ;;  %v22_v16 = vfloor.f32 %v20_v14 }
   0xe   :  { %v23_v17 = vfloor.f32 %v21_v15  ;;  %v24_v18 = vmul.f32 16.0, %v22_v16  ;;  %v28_v24 = vadd.f32 1.0, %v22_v16 }
  0x10   :  { %v25_v19 = vmul.f32 16.0, %v23_v17  ;;  %v2781_v20 = vsub.f32 %v16_v10, %v24_v18  ;;  %v2789_v25 = vadd.f32 1.0, %v23_v17  ;;  %v2753_v10 = vmov 1326507024  }
  0x12   :  { %2714 = vset.pattern.permute.xlu1 %v2745_v2  ;;  %v2783_v21 = vsub.f32 %v17_v11, %v25_v19 }
  0x13   :  { %2715 = vset.pattern.permute.xlu2 %v2747_v6  ;;  %2713 = vset.pattern.permute.xlu0 %v2745_v2 }
  0x14   :  { %1341 = vperm.xlu1 %2714, %v35_v4   ;;  %65 = vperm.xlu2 %2715, %v32_v1  }
  0x15   :  { %1337 = vperm.xlu0 %2713, %v34_v0  }
  0x1c   :  { %2716 = vset.pattern.permute.xlu1 %v2747_v6  ;;  %73 = vperm.xlu2 %2715, %v34_v0   ;;  %v2750_v0 = vmov 2131351028  }
  0x1d   :  { %2717 = vset.pattern.permute.xlu0 %v2747_v6  ;;  %69 = vperm.xlu1 %2716, %v33_v5  }
  0x1e   :  { %77 = vperm.xlu0 %2717, %v35_v4   ;;  %v2751_v4 = vmov 2102212464  }
  0x26   :  { %2718 = vset.pattern.permute.xlu0 %v2745_v2 }
  0x5d   :  { %v2785_v22 = vpop.permute.xlu2 %1329 }
  0x65   :  { %v2787_v23 = vpop.permute.xlu2 %1333 }
  0x6e   :  { %v2797_v32 = vpop.permute.xlu2 %65 }
  0x74   :  { %v49_v26 = vpop.permute.xlu1 %48 }
  0x75   :  { %v39_v27 = vpop.permute.xlu0 %38  ;;  %v2791_v28 = vmul.f32 %v49_v26, %v28_v24  ;;  %v2794_v29 = vmul.f32 %v49_v26, %v2789_v25 }
  0x76   :  { %v56_v30 = vmul.f32 %v39_v27, %v28_v24  ;;  %v57_v31 = vmul.f32 %v39_v27, %v2789_v25 }
  0x78   :  { %v2800_v33 = vadd.f32 %v2797_v32, %v56_v30  ;;  %v2803_v34 = vadd.f32 %v2797_v32, %v57_v31 }
  0x7a   :  { %v88_v35 = vand.u32 2147483647, %v2800_v33  ;;  %v91_v36 = vand.u32 2139095040, %v2800_v33  ;;  %v246_v37 = vand.u32 2139095040, %v2803_v34  ;;  %v243_v49 = vand.u32 2147483647, %v2803_v34 }
  0x7b   :  { %vm90_vm15 = vcmp.lt.s32.totalorder %v2800_v33, 0 }
  0x7c   :  { %v54_v38 = vpop.permute.xlu1 %53  ;;  %v92_v39 = vshrl.u32 %v91_v36, 23  ;;  %v247_v42 = vshrl.u32 %v246_v37, 23  ;;  %v95_v44 = vand.u32 8388607, %v88_v35  ;;  %v250_v56 = vand.u32 8388607, %v243_v49 }
  0x7d   :  { %v2808_v40 = vmul.f32 %v54_v38, %v28_v24  ;;  %v2811_v41 = vmul.f32 %v54_v38, %v2789_v25  ;;  %v2816_v50 = vpop.permute.xlu0 %43 }
  0x7e   :  { %v2650_v43 = vadd.s32 4294967169, %v92_v39  ;;  %v2653_v45 = vadd.s32 4294967169, %v247_v42  ;;  %v96_v48 = vor.u32 8388608, %v95_v44  ;;  %v2819_v53 = vmul.f32 %v2816_v50, %v28_v24 }
  0x7f   :  { %v251_v15 = vor.u32 8388608, %v250_v56 }
  0x80   :  { %v98_v46 = vadd.s32 1, %v2650_v43  ;;  %v253_v47 = vadd.s32 1, %v2653_v45  ;;  %v2821_v55 = vshll.u32 %v96_v48, 8 }
  0x81   :  { %v2853_v38 = vshll.u32 %v251_v15, 8 }
  0x82   :  { %vm99_vm0 = vcmp.gt.s32.totalorder %v98_v46, 0  ;;  %vm254_vm1 = vcmp.gt.s32.totalorder %v253_v47, 0  ;;  %v137_v26 = vand.u32 65535, %v2821_v55  ;;  %v138_v31 = vshrl.u32 %v2821_v55, 16 }
  0x83   :  { %v100_v51 = vsel %vm99_vm0, %v98_v46, 0  ;;  %v255_v62 = vsel %vm254_vm1, %v253_v47, 0 }
  0x84   :  { %v102_v52 = vand.u32 31, %v100_v51  ;;  %v2825_v57 = vshrl.u32 %v100_v51, 5  ;;  %v2838_v18 = vand.u32 31, %v255_v62  ;;  %v2863_v48 = vshrl.u32 %v255_v62, 5 }
  0x86   :  { %v103_v54 = vsub.s32 32, %v102_v52  ;;  %v105_v59 = vshll.u32 %v2748_v58, %v102_v52  ;;  %v108_v61 = vshll.u32 %v2749_v60, %v102_v52  ;;  %v111_v2 = vshll.u32 %v2750_v0, %v102_v52 }
  0x87   :  { %v114_v6 = vshll.u32 %v2751_v4, %v102_v52  ;;  %v117_v9 = vshll.u32 %v2752_v7, %v102_v52  ;;  %vm120_vm2 = vcmp.lt.s32.totalorder %v2825_v57, 1  ;;  %vm123_vm3 = vcmp.lt.s32.totalorder %v2825_v57, 4 }
  0x88   :  { %v106_v63 = vshrl.u32 %v2749_v60, %v103_v54  ;;  %v109_v1 = vshrl.u32 %v2750_v0, %v103_v54  ;;  %v112_v5 = vshrl.u32 %v2751_v4, %v103_v54  ;;  %v115_v8 = vshrl.u32 %v2752_v7, %v103_v54 }
  0x89   :  { %v118_v11 = vshrl.u32 %v2753_v10, %v103_v54  ;;  %vm122_vm4 = vcmp.lt.s32.totalorder %v2825_v57, 3  ;;  %vm121_vm5 = vcmp.lt.s32.totalorder %v2825_v57, 2  ;;  %v2860_v44 = vsub.s32 32, %v2838_v18 }
  0x8a   :  { %v107_v12 = vor.u32 %v106_v63, %v105_v59  ;;  %v110_v13 = vor.u32 %v109_v1, %v108_v61  ;;  %v113_v14 = vor.u32 %v112_v5, %v111_v2  ;;  %v116_v16 = vor.u32 %v115_v8, %v114_v6 }
  0x8b   :  { %v119_v17 = vor.u32 %v118_v11, %v117_v9  ;;  %v104_v45 = vshrl.u32 %v2748_v58, %v103_v54  ;;  %v260_v56 = vshll.u32 %v2748_v58, %v2838_v18  ;;  %v263_v59 = vshll.u32 %v2749_v60, %v2838_v18 }
  0x8c   :  { %v128_v19 = vsel %vm120_vm2, %v107_v12, %v110_v13  ;;  %v132_v24 = vsel %vm120_vm2, %v110_v13, %v113_v14  ;;  %v129_v27 = vsel %vm123_vm3, %v116_v16, 920167782  ;;  %v125_v39 = vsel %vm123_vm3, %v113_v14, 2102212464 }
  0x8d   :  { %v133_v30 = vsel %vm123_vm3, %v119_v17, 1326507024  ;;  %v130_v36 = vsel %vm122_vm4, %v113_v14, %v129_v27  ;;  %v124_v61 = vsel %vm120_vm2, %v104_v45, %v107_v12  ;;  %v126_v63 = vsel %vm122_vm4, %v110_v13, %v125_v39 }
  0x8e   :  { %v134_v37 = vsel %vm122_vm4, %v116_v16, %v133_v30  ;;  %v131_v42 = vsel %vm121_vm5, %v128_v19, %v130_v36  ;;  %v261_v62 = vshrl.u32 %v2749_v60, %v2860_v44  ;;  %v264_v6 = vshrl.u32 %v2750_v0, %v2860_v44  ;;  %v2877_v19 = vpop.permute.xlu1 %1341 }
  0x8f   :  { %v135_v43 = vsel %vm121_vm5, %v132_v24, %v134_v37  ;;  %v161_v51 = vand.u32 65535, %v131_v42  ;;  %v162_v52 = vshrl.u32 %v131_v42, 16  ;;  %vm275_vm10 = vcmp.lt.s32.totalorder %v2863_v48, 1 }
  0x90   :  { %v139_v46 = vand.u32 65535, %v135_v43  ;;  %v140_v47 = vshrl.u32 %v135_v43, 16  ;;  %v262_v37 = vor.u32 %v261_v62, %v260_v56  ;;  %v2884_v45 = vor.u32 %v264_v6, %v263_v59 }
  0x91   :  { %v164_v2 = vmul.u32 %v162_v52, %v137_v26  ;;  %v165_v5 = vmul.u32 %v161_v51, %v138_v31  ;;  %v163_v14 = vmul.u32 %v161_v51, %v137_v26  ;;  %v166_v12 = vmul.u32 %v162_v52, %v138_v31 }
  0x92   :  { %v142_v1 = vmul.u32 %v140_v47, %v137_v26  ;;  %v143_v54 = vmul.u32 %v139_v46, %v138_v31  ;;  %v141_v8 = vmul.u32 %v139_v46, %v137_v26  ;;  %v144_v9 = vmul.u32 %v140_v47, %v138_v31 }
  0x93   :  { %v167_v17 = vshll.u32 %v164_v2, 16  ;;  %v168_v24 = vshrl.u32 %v164_v2, 16  ;;  %v169_v27 = vshll.u32 %v165_v5, 16  ;;  %v267_v26 = vshrl.u32 %v2751_v4, %v2860_v44 }
  0x94   :  { %v145_v11 = vshll.u32 %v142_v1, 16  ;;  %v146_v15 = vshrl.u32 %v142_v1, 16  ;;  %v147_v16 = vshll.u32 %v143_v54, 16  ;;  %v266_v51 = vshll.u32 %v2750_v0, %v2838_v18 }
  0x95   :  { %vm171_vm7 = vc.u32 %v163_v14, %v167_v17  ;;  %v173_v36 = vadd.s32 %v167_v17, %v163_v14  ;;  %v269_v52 = vshll.u32 %v2751_v4, %v2838_v18  ;;  %v270_v1 = vshrl.u32 %v2752_v7, %v2860_v44 }
  0x96   :  { %vm149_vm6 = vc.u32 %v141_v8, %v145_v11  ;;  %v151_v13 = vadd.s32 %v145_v11, %v141_v8  ;;  %v172_v42 = vsel %vm171_vm7, 1, %v2746_v3  ;;  %v272_v2 = vshll.u32 %v2752_v7, %v2838_v18 }
  0x97   :  { %v150_v30 = vsel %vm149_vm6, 1, %v2746_v3  ;;  %v174_v43 = vadd.s32 %v172_v42, %v166_v12  ;;  %vm175_vm9 = vc.u32 %v173_v36, %v169_v27  ;;  %v273_v59 = vshrl.u32 %v2753_v10, %v2860_v44 }
  0x98   :  { %v152_v39 = vadd.s32 %v150_v30, %v144_v9  ;;  %vm153_vm8 = vc.u32 %v151_v13, %v147_v16  ;;  %v176_v47 = vsel %vm175_vm9, 1, %v2746_v3  ;;  %v148_v62 = vshrl.u32 %v143_v54, 16  ;;  %v2911_v13 = vpop.permute.xlu1 %69 }
  0x99   :  { %v154_v31 = vsel %vm153_vm8, 1, %v2746_v3  ;;  %v178_v56 = vadd.s32 %v176_v47, %v174_v43  ;;  %v170_v8 = vshrl.u32 %v165_v5, 16  ;;  %v268_v9 = vor.u32 %v267_v26, %v266_v51 }
  0x9a   :  { %v156_v46 = vadd.s32 %v154_v31, %v152_v39  ;;  %v271_v14 = vor.u32 %v270_v1, %v269_v52  ;;  %v274_v16 = vor.u32 %v273_v59, %v272_v2  ;;  %v2900_v17 = vadd.s32 %v173_v36, %v169_v27 }
  0x9b   :  { %v179_v11 = vadd.s32 %v178_v56, %v168_v24  ;;  %vm278_vm11 = vcmp.lt.s32.totalorder %v2863_v48, 4  ;;  %v283_v18 = vsel %vm275_vm10, %v262_v37, %v2884_v45  ;;  %v127_v54 = vsel %vm121_vm5, %v124_v61, %v126_v63 }
  0x9c   :  { %v157_v6 = vadd.s32 %v156_v46, %v146_v15  ;;  %vm277_vm12 = vcmp.lt.s32.totalorder %v2863_v48, 3  ;;  %v284_v15 = vsel %vm278_vm11, %v271_v14, 920167782  ;;  %vm276_vm14 = vcmp.lt.s32.totalorder %v2863_v48, 2 }
  0x9d   :  { %v180_v5 = vadd.s32 %v179_v11, %v170_v8  ;;  %v285_v24 = vsel %vm277_vm12, %v268_v9, %v284_v15  ;;  %v287_v57 = vsel %vm275_vm10, %v2884_v45, %v268_v9  ;;  %v288_v27 = vsel %vm278_vm11, %v274_v16, 1326507024 }
  0x9e   :  { %v2898_v12 = vadd.s32 %v157_v6, %v148_v62  ;;  %v286_v63 = vsel %vm276_vm14, %v283_v18, %v285_v24  ;;  %v292_v30 = vand.u32 65535, %v2853_v38  ;;  %v181_v36 = vmul.u32 %v2821_v55, %v127_v54 }
  0x9f   :  { %v184_v61 = vadd.s32 1, %v180_v5  ;;  %v289_v39 = vsel %vm277_vm12, %v271_v14, %v288_v27  ;;  %v316_v42 = vand.u32 65535, %v286_v63  ;;  %v317_v26 = vshrl.u32 %v286_v63, 16 }
  0xa0   :  { %vm183_vm13 = vc.u32 %v2898_v12, %v2900_v17  ;;  %v2931_v31 = vadd.f32 %v2911_v13, %v2819_v53  ;;  %v290_v46 = vsel %vm276_vm14, %v287_v57, %v289_v39  ;;  %v293_v47 = vshrl.u32 %v2853_v38, 16 }
  0xa1   :  { %v185_v43 = vsel %vm183_vm13, %v184_v61, %v180_v5  ;;  %v259_v52 = vshrl.u32 %v2748_v58, %v2860_v44  ;;  %v294_v55 = vand.u32 65535, %v290_v46  ;;  %v295_v56 = vshrl.u32 %v290_v46, 16 }
  0xa2   :  { %v186_v51 = vadd.s32 %v185_v43, %v181_v36  ;;  %v319_v1 = vmul.u32 %v317_v26, %v292_v30  ;;  %v320_v2 = vmul.u32 %v316_v42, %v293_v47  ;;  %v280_v8 = vsel %vm278_vm11, %v268_v9, 2102212464 }
  0xa3   :  { %v279_v53 = vsel %vm275_vm10, %v259_v52, %v262_v37  ;;  %v297_v62 = vmul.u32 %v295_v56, %v292_v30  ;;  %v298_v6 = vmul.u32 %v294_v55, %v293_v47  ;;  %v318_v11 = vmul.u32 %v316_v42, %v292_v30 }
  0xa4   :  { %v187_v59 = vadd.s32 536870912, %v186_v51  ;;  %v322_v14 = vshll.u32 %v319_v1, 16  ;;  %v401_v16 = vand.u32 2139095040, %v2931_v31  ;;  %v296_v18 = vmul.u32 %v294_v55, %v292_v30 }
  0xa5   :  { %v300_v54 = vshll.u32 %v297_v62, 16  ;;  %v321_v5 = vmul.u32 %v317_v26, %v293_v47  ;;  %v299_v15 = vmul.u32 %v295_v56, %v293_v47  ;;  %v324_v24 = vshll.u32 %v320_v2, 16 }
  0xa6   :  { %v188_v44 = vshrl.u32 %v187_v59, 30  ;;  %vm326_vm0 = vc.u32 %v318_v11, %v322_v14  ;;  %v328_v57 = vadd.s32 %v322_v14, %v318_v11  ;;  %v302_v63 = vshll.u32 %v298_v6, 16 }
  0xa7   :  { %vm304_vm1 = vc.u32 %v296_v18, %v300_v54  ;;  %v306_v37 = vadd.s32 %v300_v54, %v296_v18  ;;  %v327_v9 = vsel %vm326_vm0, 1, %v2746_v3  ;;  %v281_v30 = vsel %vm277_vm12, %v2884_v45, %v280_v8 }
  0xa8   :  { %v189_v61 = vshll.u32 %v188_v44, 30  ;;  %v212_v27 = vsub.s32 4, %v188_v44  ;;  %v305_v36 = vsel %vm304_vm1, 1, %v2746_v3  ;;  %vm330_vm2 = vc.u32 %v328_v57, %v324_v24 }
  0xa9   :  { %v307_v42 = vadd.s32 %v305_v36, %v299_v15  ;;  %vm308_vm3 = vc.u32 %v306_v37, %v302_v63  ;;  %v329_v43 = vadd.s32 %v327_v9, %v321_v5  ;;  %v331_v46 = vsel %vm330_vm2, 1, %v2746_v3 }
  0xaa   :  { %v190_v39 = vsub.s32 %v186_v51, %v189_v61  ;;  %v309_v26 = vsel %vm308_vm3, 1, %v2746_v3  ;;  %v398_v47 = vand.u32 2147483647, %v2931_v31  ;;  %v301_v55 = vshrl.u32 %v297_v62, 16 }
  0xab   :  { %v311_v56 = vadd.s32 %v309_v26, %v307_v42  ;;  %v213_v51 = vsel %vm90_vm15, %v212_v27, %v188_v44  ;;  %v323_v59 = vshrl.u32 %v319_v1, 16  ;;  %v333_v11 = vadd.s32 %v331_v46, %v329_v43 }
  0xac   :  { %vm191_vm4 = vcmp.lt.s32.totalorder %v190_v39, 0  ;;  %v192_v52 = vsub.s32 0, %v190_v39  ;;  %v402_v14 = vshrl.u32 %v401_v16, 23  ;;  %vm2956_vm5 = vcmp.le.f32.partialorder %v88_v35, 0.7853982 }
  0xad   :  { %v303_v18 = vshrl.u32 %v298_v6, 16  ;;  %v312_v54 = vadd.s32 %v311_v56, %v301_v55  ;;  %v325_v15 = vshrl.u32 %v320_v2, 16  ;;  %v334_v61 = vadd.s32 %v333_v11, %v323_v59 }
  0xae   :  { %v193_v8 = vsel %vm191_vm4, %v192_v52, %v190_v39  ;;  %v2656_v62 = vadd.s32 4294967169, %v402_v14  ;;  %v215_v63 = vsel %vm2956_vm5, 0, %v213_v51  ;;  %v282_v1 = vsel %vm276_vm14, %v279_v53, %v281_v30 }
  0xaf   :  { %v194_v5 = vclz %v193_v8  ;;  %v313_v16 = vadd.s32 %v312_v54, %v303_v18  ;;  %v332_v44 = vadd.s32 %v328_v57, %v324_v24  ;;  %v335_v35 = vadd.s32 %v334_v61, %v325_v15 }
  0xb0   :  { %v405_v27 = vand.u32 8388607, %v398_v47  ;;  %v408_v36 = vadd.s32 1, %v2656_v62  ;;  %v182_v2 = vadd.s32 %v2900_v17, %v2898_v12  ;;  %v232_v42 = vadd.s32 3, %v215_v63 }
  0xb1   :  { %v2651_v37 = vadd.s32 4294967294, %v194_v5  ;;  %vm338_vm6 = vc.u32 %v313_v16, %v332_v44  ;;  %v339_v6 = vadd.s32 1, %v335_v35  ;;  %v336_v48 = vmul.u32 %v2853_v38, %v282_v1 }
  0xb2   :  { %vm409_vm8 = vcmp.gt.s32.totalorder %v408_v36, 0  ;;  %v406_v26 = vor.u32 8388608, %v405_v27  ;;  %v59_v43 = vmul.f32 %v2816_v50, %v2789_v25  ;;  %v2974_v14 = vand.u32 3, %v232_v42 }
  0xb3   :  { %vm2652_vm7 = vcmp.lt.s32.totalorder %v2651_v37, 0  ;;  %v410_v53 = vsel %vm409_vm8, %v408_v36, 0  ;;  %v340_v57 = vsel %vm338_vm6, %v339_v6, %v335_v35  ;;  %v2978_v18 = vadd.s32 %v332_v44, %v313_v16 }
  0xb4   :  { %v197_v9 = vsel %vm2652_vm7, 0, %v2651_v37  ;;  %v341_v46 = vadd.s32 %v340_v57, %v336_v48  ;;  %v412_v52 = vand.u32 31, %v410_v53  ;;  %v2972_v17 = vadd.f32 %v2911_v13, %v59_v43 }
  0xb5   :  { %v198_v30 = vsub.s32 32, %v197_v9  ;;  %v202_v24 = vsub.s32 4294967266, %v197_v9  ;;  %v199_v55 = vshll.u32 %v190_v39, %v197_v9  ;;  %v2976_v8 = vshll.u32 %v406_v26, 8 }
  0xb6   :  { %v342_v51 = vadd.s32 536870912, %v341_v46  ;;  %v413_v59 = vsub.s32 32, %v412_v52  ;;  %v415_v5 = vshll.u32 %v2748_v58, %v412_v52  ;;  %vm245_vm9 = vcmp.lt.s32.totalorder %v2803_v34, 0 }
  0xb7   :  { %v200_v56 = vshrl.u32 %v182_v2, %v198_v30  ;;  %v203_v12 = vadd.s32 127, %v202_v24  ;;  %v2986_v63 = vshrl.u32 %v410_v53, 5  ;;  %v418_v1 = vshll.u32 %v2749_v60, %v412_v52 }
  0xb8   :  { %v343_v54 = vshrl.u32 %v342_v51, 30  ;;  %v416_v25 = vshrl.u32 %v2749_v60, %v413_v59  ;;  %v419_v50 = vshrl.u32 %v2750_v0, %v413_v59  ;;  %v422_v15 = vshrl.u32 %v2751_v4, %v413_v59 }
  0xb9   :  { %v201_v11 = vor.u32 %v200_v56, %v199_v55  ;;  %v204_v38 = vshll.u32 %v203_v12, 23  ;;  %v425_v61 = vshrl.u32 %v2752_v7, %v413_v59  ;;  %v424_v16 = vshll.u32 %v2751_v4, %v412_v52 }
  0xba   :  { %v344_v62 = vshll.u32 %v343_v54, 30  ;;  %v417_v35 = vor.u32 %v416_v25, %v415_v5  ;;  %v421_v27 = vshll.u32 %v2750_v0, %v412_v52  ;;  %v2993_v2 = vor.u32 %v419_v50, %v418_v1 }
  0xbb   :  { %v205_v39 = vor.u32 4788187, %v204_v38  ;;  %v208_v37 = vcvt.s32.f32 %v201_v11  ;;  %v426_v6 = vor.u32 %v425_v61, %v424_v16  ;;  %v428_v9 = vshrl.u32 %v2753_v10, %v413_v59 }
  0xbc   :  { %v2991_v36 = vsub.s32 %v341_v46, %v344_v62  ;;  %vm2998_vm10 = vcmp.le.f32.partialorder %v243_v49, 0.7853982  ;;  %v423_v53 = vor.u32 %v422_v15, %v421_v27  ;;  %v447_v30 = vand.u32 65535, %v2976_v8 }
  0xbd   :  { %v206_v44 = vand.u32 2147483647, %v205_v39  ;;  %v556_v24 = vand.u32 2139095040, %v2972_v17  ;;  %v367_v26 = vsub.s32 4, %v343_v54  ;;  %v427_v43 = vshll.u32 %v2752_v7, %v412_v52 }
  0xbe   :  { %vm346_vm11 = vcmp.lt.s32.totalorder %v2991_v36, 0  ;;  %v347_v57 = vsub.s32 0, %v2991_v36  ;;  %vm430_vm12 = vcmp.lt.s32.totalorder %v2986_v63, 1  ;;  %vm432_vm13 = vcmp.lt.s32.totalorder %v2986_v63, 3 }
  0xbf   :  { %v209_v42 = vmul.f32 %v208_v37, %v206_v44  ;;  %vm433_vm14 = vcmp.lt.s32.totalorder %v2986_v63, 4  ;;  %v429_v55 = vor.u32 %v428_v9, %v427_v43  ;;  %v438_v56 = vsel %vm430_vm12, %v417_v35, %v2993_v2 }
  0xc0   :  { %v348_v49 = vsel %vm346_vm11, %v347_v57, %v2991_v36  ;;  %v439_v12 = vsel %vm433_vm14, %v426_v6, 920167782  ;;  %v448_v38 = vshrl.u32 %v2976_v8, 16  ;;  %v414_v50 = vshrl.u32 %v2748_v58, %v413_v59 }
  0xc1   :  { %v210_v46 = vxor.u32 2147483648, %v209_v42  ;;  %v349_v51 = vclz %v348_v49  ;;  %v440_v11 = vsel %vm432_vm13, %v423_v53, %v439_v12  ;;  %vm431_vm0 = vcmp.lt.s32.totalorder %v2986_v63, 2 }
  0xc2   :  { %v3028_v39 = vshrl.u32 %v556_v24, 23  ;;  %v3034_v61 = vsel %vm245_vm9, %v367_v26, %v343_v54  ;;  %v441_v62 = vsel %vm431_vm0, %v438_v56, %v440_v11  ;;  %v442_v45 = vsel %vm430_vm12, %v2993_v2, %v423_v53 }
  0xc3   :  { %v211_v52 = vsel %vm90_vm15, %v210_v46, %v209_v42  ;;  %v2654_v15 = vadd.s32 4294967294, %v349_v51  ;;  %v443_v59 = vsel %vm433_vm14, %v429_v55, 1326507024  ;;  %v471_v1 = vand.u32 65535, %v441_v62 }
  0xc4   :  { %v3024_v25 = vsel %vm2956_vm5, %v2800_v33, %v211_v52  ;;  %v472_v16 = vshrl.u32 %v441_v62, 16  ;;  %v444_v27 = vsel %vm432_vm13, %v426_v6, %v443_v59  ;;  %v370_v9 = vsel %vm2998_vm10, 0, %v3034_v61 }
  0xc5   :  { %v216_v5 = vmul.f32 %v3024_v25, %v3024_v25  ;;  %vm2655_vm15 = vcmp.lt.s32.totalorder %v2654_v15, 0  ;;  %v435_v42 = vsel %vm433_vm14, %v423_v53, 2102212464  ;;  %v445_v24 = vsel %vm431_vm0, %v442_v45, %v444_v27 }
  0xc6   :  { %v352_v54 = vsel %vm2655_vm15, 0, %v2654_v15  ;;  %v3054_v46 = vsel %vm430_vm12, %v414_v50, %v417_v35  ;;  %v449_v6 = vand.u32 65535, %v445_v24  ;;  %v450_v55 = vshrl.u32 %v445_v24, 16 }
  0xc7   :  { %v217_v44 = vmul.f32 -0.001358992, %v216_v5  ;;  %v224_v37 = vmul.f32 -0.00019511016, %v216_v5  ;;  %v353_v43 = vsub.s32 32, %v352_v54  ;;  %v357_v49 = vsub.s32 4294967266, %v352_v54 }
  0xc8   :  { %v473_v56 = vmul.u32 %v471_v1, %v447_v30  ;;  %v3057_v11 = vmul.u32 %v472_v16, %v447_v30  ;;  %v354_v53 = vshll.u32 %v2991_v36, %v352_v54  ;;  %v452_v62 = vmul.u32 %v450_v55, %v447_v30 }
  0xc9   :  { %v218_v57 = vadd.f32 0.041655596, %v217_v44  ;;  %v225_v26 = vadd.f32 0.008332121, %v224_v37  ;;  %v355_v51 = vshrl.u32 %v2978_v18, %v353_v43  ;;  %v358_v15 = vadd.s32 127, %v357_v49 }
  0xca   :  { %v453_v45 = vmul.u32 %v449_v6, %v448_v38  ;;  %v3060_v37 = vmul.u32 %v471_v1, %v448_v38  ;;  %v476_v35 = vmul.u32 %v472_v16, %v448_v38  ;;  %vm235_vm1 = vcmp.eq.s32.totalorder %v2974_v14, 0 }
  0xcb   :  { %v219_v12 = vmul.f32 %v218_v57, %v216_v5  ;;  %v226_v52 = vmul.f32 %v225_v26, %v216_v5  ;;  %vm238_vm2 = vcmp.eq.s32.totalorder %v2974_v14, 2  ;;  %v356_v50 = vor.u32 %v355_v51, %v354_v53 }
  0xcc   :  { %v359_v27 = vshll.u32 %v358_v15, 23  ;;  %v451_v24 = vmul.u32 %v449_v6, %v447_v30  ;;  %v455_v18 = vshll.u32 %v452_v62, 16  ;;  %vm234_vm3 = vcmp.lt.s32.totalorder %v2974_v14, 2 }
  0xcd   :  { %v220_v59 = vadd.f32 -0.4999988, %v219_v12  ;;  %v227_v44 = vadd.f32 -0.16666654, %v226_v52  ;;  %v454_v36 = vmul.u32 %v450_v55, %v448_v38  ;;  %v457_v54 = vshll.u32 %v453_v45, 16 }
  0xce   :  { %vm231_vm4 = vweird.f32 %v2800_v33  ;;  %v360_v43 = vor.u32 4788187, %v359_v27  ;;  %vm459_vm5 = vc.u32 %v451_v24, %v455_v18  ;;  %v461_v1 = vadd.s32 %v455_v18, %v451_v24 }
  0xcf   :  { %v221_v57 = vmul.f32 %v220_v59, %v216_v5  ;;  %v228_v26 = vmul.f32 %v227_v44, %v216_v5  ;;  %v477_v16 = vshll.u32 %v3057_v11, 16  ;;  %v456_v52 = vshrl.u32 %v452_v62, 16 }
  0xd0   :  { %v460_v51 = vsel %vm459_vm5, 1, %v2746_v3  ;;  %v361_v30 = vand.u32 2147483647, %v360_v43  ;;  %v363_v6 = vcvt.s32.f32 %v356_v50  ;;  %vm463_vm6 = vc.u32 %v461_v1, %v457_v54 }
  0xd1   :  { %v222_v49 = vadd.f32 1.0, %v221_v57  ;;  %v229_v12 = vadd.f32 1.0, %v228_v26  ;;  %v462_v53 = vadd.s32 %v460_v51, %v454_v36  ;;  %v464_v55 = vsel %vm463_vm6, 1, %v2746_v3 }
  0xd2   :  { %v479_v15 = vshll.u32 %v3060_v37, 16  ;;  %v364_v59 = vmul.f32 %v363_v6, %v361_v30  ;;  %vm481_vm7 = vc.u32 %v473_v56, %v477_v16  ;;  %v483_v27 = vadd.s32 %v477_v16, %v473_v56  ;;  %v3095_v30 = vpop.permute.xlu2 %73 }
  0xd3   :  { %v230_v5 = vmul.f32 %v229_v12, %v3024_v25  ;;  %v239_v38 = vxor.u32 2147483648, %v222_v49  ;;  %v466_v44 = vadd.s32 %v464_v55, %v462_v53  ;;  %v436_v62 = vsel %vm432_vm13, %v2993_v2, %v435_v42 }
  0xd4   :  { %v458_v18 = vshrl.u32 %v453_v45, 16  ;;  %v482_v50 = vsel %vm481_vm7, 1, %v2746_v3  ;;  %v365_v57 = vxor.u32 2147483648, %v364_v59  ;;  %vm485_vm8 = vc.u32 %v483_v27, %v479_v15 }
  0xd5   :  { %v236_v24 = vxor.u32 2147483648, %v230_v5  ;;  %v467_v26 = vadd.s32 %v466_v44, %v456_v52  ;;  %v484_v25 = vadd.s32 %v482_v50, %v476_v35  ;;  %v240_v54 = vsel %vm238_vm2, %v239_v38, %v230_v5 }
  0xd6   :  { %v486_v56 = vsel %vm485_vm8, 1, %v2746_v3  ;;  %v2659_v43 = vadd.s32 4294967169, %v3028_v39  ;;  %v366_v42 = vsel %vm245_vm9, %v365_v57, %v364_v59  ;;  %v478_v45 = vshrl.u32 %v3057_v11, 16 }
  0xd7   :  { %v237_v36 = vsel %vm235_vm1, %v222_v49, %v236_v24  ;;  %v488_v35 = vadd.s32 %v486_v56, %v484_v25  ;;  %v369_v16 = vsel %vm2998_vm10, %v2803_v34, %v366_v42  ;;  %v3091_v49 = vadd.s32 %v467_v26, %v458_v18 }
  0xd8   :  { %v241_v2 = vsel %vm234_vm3, %v237_v36, %v240_v54  ;;  %v563_v12 = vadd.s32 1, %v2659_v43  ;;  %v371_v39 = vmul.f32 %v369_v16, %v369_v16  ;;  %v480_v14 = vshrl.u32 %v3060_v37, 16 }
  0xd9   :  { %v242_v1 = vsel %vm231_vm4, nan, %v241_v2  ;;  %v489_v52 = vadd.s32 %v488_v35, %v478_v45  ;;  %v553_v51 = vand.u32 2147483647, %v2972_v17  ;;  %v387_v33 = vadd.s32 3, %v370_v9 }
  0xda   :  { %2600 = vst [vmem:[#allocation2] sm:$0xff] %v242_v1  ;;  %v437_v11 = vsel %vm431_vm0, %v3054_v46, %v436_v62  ;;  %v3104_v6 = vadd.s32 %v483_v27, %v479_v15  ;;  %vm564_vm9 = vcmp.gt.s32.totalorder %v563_v12, 0  ;;  %v372_v37 = vmul.f32 -0.001358992, %v371_v39 }
  0xdb   :  { %2608 = vst [vmem:[#allocation2 + $0x80] sm:$0xff] %v242_v1  ;;  %v379_v53 = vmul.f32 -0.00019511016, %v371_v39  ;;  %v490_v5 = vadd.s32 %v489_v52, %v480_v14  ;;  %v565_v38 = vsel %vm564_vm9, %v563_v12, 0  ;;  %v3110_v48 = vadd.f32 %v3095_v30, %v2791_v28 }
  0xdc   :  { %vm493_vm11 = vc.u32 %v3091_v49, %v3104_v6  ;;  %v567_v55 = vand.u32 31, %v565_v38  ;;  %v373_v61 = vadd.f32 0.041655596, %v372_v37  ;;  %v3114_v46 = vadd.f32 %v3095_v30, %v2794_v29 }
  0xdd   :  { %v380_v9 = vadd.f32 0.008332121, %v379_v53  ;;  %v494_v63 = vadd.s32 1, %v490_v5  ;;  %v491_v15 = vmul.u32 %v2976_v8, %v437_v11  ;;  %v560_v59 = vand.u32 8388607, %v553_v51 }
  0xde   :  { %v568_v44 = vsub.s32 32, %v567_v55  ;;  %v374_v27 = vmul.f32 %v373_v61, %v371_v39  ;;  %v388_v62 = vand.u32 3, %v387_v33  ;;  %v3119_v28 = vshrl.u32 %v565_v38, 5 }
  0xdf   :  { %v381_v24 = vmul.f32 %v380_v9, %v371_v39  ;;  %v495_v18 = vsel %vm493_vm11, %v494_v63, %v490_v5  ;;  %v570_v36 = vshll.u32 %v2748_v58, %v567_v55  ;;  %v573_v56 = vshll.u32 %v2749_v60, %v567_v55 }
  0xe0   :  { %v496_v50 = vadd.s32 %v495_v18, %v491_v15  ;;  %v571_v57 = vshrl.u32 %v2749_v60, %v568_v44  ;;  %v574_v26 = vshrl.u32 %v2750_v0, %v568_v44  ;;  %v375_v25 = vadd.f32 -0.4999988, %v374_v27 }
  0xe1   :  { %v382_v29 = vadd.f32 -0.16666654, %v381_v24  ;;  %v580_v8 = vshrl.u32 %v2752_v7, %v568_v44  ;;  %v577_v43 = vshrl.u32 %v2751_v4, %v568_v44  ;;  %v579_v2 = vshll.u32 %v2751_v4, %v567_v55 }
  0xe2   :  { %v497_v54 = vadd.s32 536870912, %v496_v50  ;;  %v376_v42 = vmul.f32 %v375_v25, %v371_v39  ;;  %vm389_vm10 = vcmp.lt.s32.totalorder %v388_v62, 2  ;;  %v572_v35 = vor.u32 %v571_v57, %v570_v36 }
  0xe3   :  { %v383_v45 = vmul.f32 %v382_v29, %v371_v39  ;;  %v576_v1 = vshll.u32 %v2750_v0, %v567_v55  ;;  %v3131_v14 = vor.u32 %v574_v26, %v573_v56  ;;  %v581_v52 = vor.u32 %v580_v8, %v579_v2 }
  0xe4   :  { %v3129_v12 = vshrl.u32 %v497_v54, 30  ;;  %v583_v33 = vshrl.u32 %v2753_v10, %v568_v44  ;;  %v377_v11 = vadd.f32 1.0, %v376_v42  ;;  %v561_v53 = vor.u32 8388608, %v560_v59 }
  0xe5   :  { %v384_v37 = vadd.f32 1.0, %v383_v45  ;;  %v582_v5 = vshll.u32 %v2752_v7, %v567_v55  ;;  %vm390_vm12 = vcmp.eq.s32.totalorder %v388_v62, 0  ;;  %v578_v39 = vor.u32 %v577_v43, %v576_v1 }
  0xe6   :  { %v499_v38 = vshll.u32 %v3129_v12, 30  ;;  %vm585_vm13 = vcmp.lt.s32.totalorder %v3119_v28, 1  ;;  %v394_v9 = vxor.u32 2147483648, %v377_v11  ;;  %vm588_vm14 = vcmp.lt.s32.totalorder %v3119_v28, 4 }
  0xe7   :  { %v385_v61 = vmul.f32 %v384_v37, %v369_v16  ;;  %v584_v63 = vor.u32 %v583_v33, %v582_v5  ;;  %vm393_vm0 = vcmp.eq.s32.totalorder %v388_v62, 2  ;;  %v593_v59 = vsel %vm585_vm13, %v572_v35, %v3131_v14 }
  0xe8   :  { %v3138_v15 = vsub.s32 %v496_v50, %v499_v38  ;;  %v594_v55 = vsel %vm588_vm14, %v581_v52, 920167782  ;;  %vm586_vm15 = vcmp.lt.s32.totalorder %v3119_v28, 2  ;;  %vm587_vm1 = vcmp.lt.s32.totalorder %v3119_v28, 3 }
  0xe9   :  { %v391_v27 = vxor.u32 2147483648, %v385_v61  ;;  %v3147_v16 = vshll.u32 %v561_v53, 8  ;;  %v395_v24 = vsel %vm393_vm0, %v394_v9, %v385_v61  ;;  %v595_v50 = vsel %vm587_vm1, %v578_v39, %v594_v55 }
  0xea   :  { %vm501_vm2 = vcmp.lt.s32.totalorder %v3138_v15, 0  ;;  %v502_v18 = vsub.s32 0, %v3138_v15  ;;  %v596_v26 = vsel %vm586_vm15, %v593_v59, %v595_v50  ;;  %v597_v25 = vsel %vm585_vm13, %v3131_v14, %v578_v39 }
  0xeb   :  { %v392_v57 = vsel %vm390_vm12, %v377_v11, %v391_v27  ;;  %v598_v29 = vsel %vm588_vm14, %v584_v63, 1326507024  ;;  %vm386_vm3 = vweird.f32 %v2803_v34  ;;  %v708_v42 = vand.u32 2147483647, %v3110_v48 }
  0xec   :  { %v396_v36 = vsel %vm389_vm10, %v392_v57, %v395_v24  ;;  %v503_v8 = vsel %vm501_vm2, %v502_v18, %v3138_v15  ;;  %v599_v54 = vsel %vm587_vm1, %v581_v52, %v598_v29  ;;  %v569_v45 = vshrl.u32 %v2748_v58, %v568_v44 }
  0xed   :  { %v397_v56 = vsel %vm386_vm3, nan, %v396_v36  ;;  %v504_v43 = vclz %v503_v8  ;;  %v600_v2 = vsel %vm586_vm15, %v597_v25, %v599_v54  ;;  %v603_v1 = vshrl.u32 %v3147_v16, 16 }
  0xee   :  { %v604_v33 = vand.u32 65535, %v600_v2  ;;  %v626_v34 = vand.u32 65535, %v596_v26  ;;  %2601 = vst [vmem:[#allocation2 + $0x8] sm:$0xff] %v397_v56  ;;  %vm400_vm4 = vcmp.lt.s32.totalorder %v2931_v31, 0  ;;  %v602_v11 = vand.u32 65535, %v3147_v16 }
  0xef   :  { %v2657_v62 = vadd.s32 4294967294, %v504_v43  ;;  %v605_v52 = vshrl.u32 %v600_v2, 16  ;;  %v627_v37 = vshrl.u32 %v596_v26, 16  ;;  %2609 = vst [vmem:[#allocation2 + $0x88] sm:$0xff] %v397_v56  ;;  %v492_v53 = vadd.s32 %v3104_v6, %v3091_v49 }
  0xf0   :  { %v522_v5 = vsub.s32 4, %v3129_v12  ;;  %v589_v44 = vsel %vm585_vm13, %v569_v45, %v572_v35  ;;  %v608_v38 = vmul.u32 %v604_v33, %v603_v1  ;;  %v590_v61 = vsel %vm588_vm14, %v578_v39, 2102212464 }
  0xf1   :  { %vm2658_vm5 = vcmp.lt.s32.totalorder %v2657_v62, 0  ;;  %v607_v9 = vmul.u32 %v605_v52, %v602_v11  ;;  %v629_v63 = vmul.u32 %v627_v37, %v602_v11  ;;  %v606_v55 = vmul.u32 %v604_v33, %v602_v11 }
  0xf2   :  { %v507_v59 = vsel %vm2658_vm5, 0, %v2657_v62  ;;  %v628_v27 = vmul.u32 %v626_v34, %v602_v11  ;;  %v630_v24 = vmul.u32 %v626_v34, %v603_v1  ;;  %v609_v57 = vmul.u32 %v605_v52, %v603_v1 }
  0xf3   :  { %v508_v18 = vsub.s32 32, %v507_v59  ;;  %v512_v50 = vsub.s32 4294967266, %v507_v59  ;;  %v610_v49 = vshll.u32 %v607_v9, 16  ;;  %v509_v6 = vshll.u32 %v3138_v15, %v507_v59 }
  0xf4   :  { %v612_v26 = vshll.u32 %v608_v38, 16  ;;  %v631_v25 = vmul.u32 %v627_v37, %v603_v1  ;;  %v632_v35 = vshll.u32 %v629_v63, 16  ;;  %v634_v54 = vshll.u32 %v630_v24, 16 }
  0xf5   :  { %v510_v29 = vshrl.u32 %v492_v53, %v508_v18  ;;  %v513_v36 = vadd.s32 127, %v512_v50  ;;  %vm614_vm6 = vc.u32 %v606_v55, %v610_v49  ;;  %v616_v8 = vadd.s32 %v610_v49, %v606_v55 }
  0xf6   :  { %v615_v39 = vsel %vm614_vm6, 1, %v2746_v3  ;;  %vm636_vm7 = vc.u32 %v628_v27, %v632_v35  ;;  %v638_v56 = vadd.s32 %v632_v35, %v628_v27  ;;  %v523_v15 = vsel %vm400_vm4, %v522_v5, %v3129_v12 }
  0xf7   :  { %v511_v43 = vor.u32 %v510_v29, %v509_v6  ;;  %v514_v2 = vshll.u32 %v513_v36, 23  ;;  %v617_v45 = vadd.s32 %v615_v39, %v609_v57  ;;  %vm618_vm8 = vc.u32 %v616_v8, %v612_v26 }
  0xf8   :  { %v619_v1 = vsel %vm618_vm8, 1, %v2746_v3  ;;  %v637_v33 = vsel %vm636_vm7, 1, %v2746_v3  ;;  %vm640_vm9 = vc.u32 %v638_v56, %v634_v54  ;;  %v611_v62 = vshrl.u32 %v607_v9, 16 }
  0xf9   :  { %v515_v34 = vor.u32 4788187, %v514_v2  ;;  %v621_v11 = vadd.s32 %v619_v1, %v617_v45  ;;  %v639_v52 = vadd.s32 %v637_v33, %v631_v25  ;;  %v613_v37 = vshrl.u32 %v608_v38, 16 }
  0xfa   :  { %v633_v53 = vshrl.u32 %v629_v63, 16  ;;  %v641_v59 = vsel %vm640_vm9, 1, %v2746_v3  ;;  %v711_v55 = vand.u32 2139095040, %v3110_v48  ;;  %v518_v18 = vcvt.s32.f32 %v511_v43 }
  0xfb   :  { %v516_v27 = vand.u32 2147483647, %v515_v34  ;;  %v622_v50 = vadd.s32 %v621_v11, %v611_v62  ;;  %v643_v57 = vadd.s32 %v641_v59, %v639_v52  ;;  %v591_v12 = vsel %vm587_vm1, %v3131_v14, %v590_v61 }
  0xfc   :  { %v712_v5 = vshrl.u32 %v711_v55, 23  ;;  %v715_v9 = vand.u32 8388607, %v708_v42  ;;  %v866_v49 = vand.u32 2139095040, %v3114_v46  ;;  %v635_v6 = vshrl.u32 %v630_v24, 16 }
  0xfd   :  { %v519_v38 = vmul.f32 %v518_v18, %v516_v27  ;;  %v623_v63 = vadd.s32 %v622_v50, %v613_v37  ;;  %v644_v26 = vadd.s32 %v643_v57, %v633_v53  ;;  %vm399_vm11 = vcmp.le.f32.partialorder %v398_v47, 0.7853982 }
  0xfe   :  { %v642_v25 = vadd.s32 %v638_v56, %v634_v54  ;;  %v2662_v35 = vadd.s32 4294967169, %v712_v5  ;;  %v525_v36 = vsel %vm399_vm11, 0, %v523_v15  ;;  %v592_v14 = vsel %vm586_vm15, %v589_v44, %v591_v12 }
  0xff   :  { %v520_v29 = vxor.u32 2147483648, %v519_v38  ;;  %v645_v61 = vadd.s32 %v644_v26, %v635_v6  ;;  %v716_v8 = vor.u32 8388608, %v715_v9  ;;  %v867_v43 = vshrl.u32 %v866_v49, 23 }
 0x100   :  { %vm648_vm10 = vc.u32 %v623_v63, %v642_v25  ;;  %v718_v39 = vadd.s32 1, %v2662_v35  ;;  %v542_v47 = vadd.s32 3, %v525_v36  ;;  %v646_v54 = vmul.u32 %v3147_v16, %v592_v14 }
 0x101   :  { %v521_v2 = vsel %vm400_vm4, %v520_v29, %v519_v38  ;;  %v649_v24 = vadd.s32 1, %v645_v61  ;;  %v3207_v33 = vshll.u32 %v716_v8, 8  ;;  %v2665_v34 = vadd.s32 4294967169, %v867_v43 }
 0x102   :  { %v3202_v45 = vsel %vm399_vm11, %v2931_v31, %v521_v2  ;;  %vm719_vm12 = vcmp.gt.s32.totalorder %v718_v39, 0  ;;  %v3209_v52 = vand.u32 3, %v542_v47  ;;  %vm555_vm13 = vcmp.lt.s32.totalorder %v2972_v17, 0 }
 0x103   :  { %v526_v28 = vmul.f32 %v3202_v45, %v3202_v45  ;;  %v650_v44 = vsel %vm648_vm10, %v649_v24, %v645_v61  ;;  %v720_v56 = vsel %vm719_vm12, %v718_v39, 0  ;;  %v863_v16 = vand.u32 2147483647, %v3114_v46 }
 0x104   :  { %v651_v15 = vadd.s32 %v650_v44, %v646_v54  ;;  %v722_v1 = vand.u32 31, %v720_v56  ;;  %v3213_v55 = vadd.s32 %v642_v25, %v623_v63  ;;  %vm3217_vm14 = vcmp.le.f32.partialorder %v553_v51, 0.7853982 }
 0x105   :  { %v527_v62 = vmul.f32 -0.001358992, %v526_v28  ;;  %v534_v11 = vmul.f32 -0.00019511016, %v526_v28  ;;  %v3222_v57 = vand.u32 65535, %v3207_v33  ;;  %v3225_v12 = vshrl.u32 %v3207_v33, 16 }
 0x106   :  { %v652_v37 = vadd.s32 536870912, %v651_v15  ;;  %v723_v27 = vsub.s32 32, %v722_v1  ;;  %v3227_v5 = vadd.s32 1, %v2665_v34  ;;  %v3229_v38 = vshrl.u32 %v720_v56, 5 }
 0x107   :  { %v528_v53 = vadd.f32 0.041655596, %v527_v62  ;;  %v535_v59 = vadd.f32 0.008332121, %v534_v11  ;;  %v725_v63 = vshll.u32 %v2748_v58, %v722_v1  ;;  %vm548_vm0 = vcmp.eq.s32.totalorder %v3209_v52, 2 }
 0x108   :  { %v653_v50 = vshrl.u32 %v652_v37, 30  ;;  %v728_v26 = vshll.u32 %v2749_v60, %v722_v1  ;;  %v731_v25 = vshll.u32 %v2750_v0, %v722_v1  ;;  %v726_v36 = vshrl.u32 %v2749_v60, %v723_v27 }
 0x109   :  { %v529_v9 = vmul.f32 %v528_v53, %v526_v28  ;;  %v536_v49 = vmul.f32 %v535_v59, %v526_v28  ;;  %v732_v14 = vshrl.u32 %v2751_v4, %v723_v27  ;;  %vm545_vm15 = vcmp.eq.s32.totalorder %v3209_v52, 0 }
 0x10a   :  { %v654_v51 = vshll.u32 %v653_v50, 30  ;;  %v677_v6 = vsub.s32 4, %v653_v50  ;;  %v729_v8 = vshrl.u32 %v2750_v0, %v723_v27  ;;  %v735_v39 = vshrl.u32 %v2752_v7, %v723_v27 }
 0x10b   :  { %v530_v35 = vadd.f32 -0.4999988, %v529_v9  ;;  %v537_v29 = vadd.f32 -0.16666654, %v536_v49  ;;  %v738_v43 = vshrl.u32 %v2753_v10, %v723_v27  ;;  %vm544_vm1 = vcmp.lt.s32.totalorder %v3209_v52, 2 }
 0x10c   :  { %v3238_v61 = vsub.s32 %v651_v15, %v654_v51  ;;  %v724_v47 = vshrl.u32 %v2748_v58, %v723_v27  ;;  %v734_v54 = vshll.u32 %v2751_v4, %v722_v1  ;;  %vm541_vm2 = vweird.f32 %v2931_v31 }
 0x10d   :  { %v531_v2 = vmul.f32 %v530_v35, %v526_v28  ;;  %v538_v24 = vmul.f32 %v537_v29, %v526_v28  ;;  %v678_v56 = vsel %vm555_vm13, %v677_v6, %v653_v50  ;;  %v737_v15 = vshll.u32 %v2752_v7, %v722_v1 }
 0x10e   :  { %vm656_vm3 = vcmp.lt.s32.totalorder %v3238_v61, 0  ;;  %v657_v44 = vsub.s32 0, %v3238_v61  ;;  %v727_v28 = vor.u32 %v726_v36, %v725_v63  ;;  %v733_v11 = vor.u32 %v732_v14, %v731_v25 }
 0x10f   :  { %v532_v34 = vadd.f32 1.0, %v531_v2  ;;  %v539_v62 = vadd.f32 1.0, %v538_v24  ;;  %vm874_vm4 = vcmp.gt.s32.totalorder %v3227_v5, 0  ;;  %v730_v53 = vor.u32 %v729_v8, %v728_v26 }
 0x110   :  { %v658_v37 = vsel %vm656_vm3, %v657_v44, %v3238_v61  ;;  %v736_v59 = vor.u32 %v735_v39, %v734_v54  ;;  %v739_v27 = vor.u32 %v738_v43, %v737_v15  ;;  %v680_v50 = vsel %vm3217_vm14, 0, %v678_v56 }
 0x111   :  { %v540_v9 = vmul.f32 %v539_v62, %v3202_v45  ;;  %v549_v49 = vxor.u32 2147483648, %v532_v34  ;;  %v659_v51 = vclz %v658_v37  ;;  %vm740_vm5 = vcmp.lt.s32.totalorder %v3229_v38, 1 }
 0x112   :  { %vm741_vm6 = vcmp.lt.s32.totalorder %v3229_v38, 2  ;;  %vm742_vm7 = vcmp.lt.s32.totalorder %v3229_v38, 3  ;;  %vm743_vm8 = vcmp.lt.s32.totalorder %v3229_v38, 4  ;;  %v748_v45 = vsel %vm740_vm5, %v727_v28, %v730_v53 }
 0x113   :  { %v546_v1 = vxor.u32 2147483648, %v540_v9  ;;  %v550_v63 = vsel %vm548_vm0, %v549_v49, %v540_v9  ;;  %v2660_v6 = vadd.s32 4294967294, %v659_v51  ;;  %v745_v26 = vsel %vm743_vm8, %v733_v11, 2102212464 }
 0x114   :  { %v749_v25 = vsel %vm743_vm8, %v736_v59, 920167782  ;;  %v752_v35 = vsel %vm740_vm5, %v730_v53, %v733_v11  ;;  %v753_v29 = vsel %vm743_vm8, %v739_v27, 1326507024  ;;  %v744_v15 = vsel %vm740_vm5, %v724_v47, %v727_v28 }
 0x115   :  { %v547_v36 = vsel %vm545_vm15, %v532_v34, %v546_v1  ;;  %vm2661_vm9 = vcmp.lt.s32.totalorder %v2660_v6, 0  ;;  %v750_v14 = vsel %vm742_vm7, %v733_v11, %v749_v25  ;;  %v754_v8 = vsel %vm742_vm7, %v736_v59, %v753_v29 }
 0x116   :  { %v551_v39 = vsel %vm544_vm1, %v547_v36, %v550_v63  ;;  %v662_v43 = vsel %vm2661_vm9, 0, %v2660_v6  ;;  %v751_v2 = vsel %vm741_vm6, %v748_v45, %v750_v14  ;;  %v755_v24 = vsel %vm741_vm6, %v752_v35, %v754_v8 }
 0x117   :  { %v552_v54 = vsel %vm541_vm2, nan, %v551_v39  ;;  %v663_v44 = vsub.s32 32, %v662_v43  ;;  %v667_v56 = vsub.s32 4294967266, %v662_v43  ;;  %v746_v34 = vsel %vm742_vm7, %v730_v53, %v745_v26 }
 0x118   :  { %v759_v52 = vand.u32 65535, %v755_v24  ;;  %v760_v62 = vshrl.u32 %v755_v24, 16  ;;  %v782_v11 = vshrl.u32 %v751_v2, 16  ;;  %2602 = vst [vmem:[#allocation2 + $0x10] sm:$0xff] %v552_v54  ;;  %v664_v37 = vshll.u32 %v3238_v61, %v662_v43 }
 0x119   :  { %v665_v59 = vshrl.u32 %v3213_v55, %v663_v44  ;;  %v668_v27 = vadd.s32 127, %v667_v56  ;;  %v781_v9 = vand.u32 65535, %v751_v2  ;;  %2610 = vst [vmem:[#allocation2 + $0x90] sm:$0xff] %v552_v54  ;;  %v3291_v47 = vand.u32 8388607, %v863_v16 }
 0x11a   :  { %v762_v31 = vmul.u32 %v760_v62, %v3222_v57  ;;  %v763_v49 = vmul.u32 %v759_v52, %v3225_v12  ;;  %v875_v28 = vsel %vm874_vm4, %v3227_v5, 0  ;;  %v3296_v61 = vadd.s32 3, %v680_v50 }
 0x11b   :  { %v666_v53 = vor.u32 %v665_v59, %v664_v37  ;;  %v669_v51 = vshll.u32 %v668_v27, 23  ;;  %v784_v55 = vmul.u32 %v782_v11, %v3222_v57  ;;  %v3301_v1 = vsel %vm741_vm6, %v744_v15, %v746_v34 }
 0x11c   :  { %v761_v63 = vmul.u32 %v759_v52, %v3222_v57  ;;  %v764_v6 = vmul.u32 %v760_v62, %v3225_v12  ;;  %v765_v26 = vshll.u32 %v762_v31, 16  ;;  %v767_v25 = vshll.u32 %v763_v49, 16 }
 0x11d   :  { %v670_v45 = vor.u32 4788187, %v669_v51  ;;  %v783_v35 = vmul.u32 %v781_v9, %v3222_v57  ;;  %v785_v5 = vmul.u32 %v781_v9, %v3225_v12  ;;  %v673_v29 = vcvt.s32.f32 %v666_v53 }
 0x11e   :  { %vm769_vm11 = vc.u32 %v761_v63, %v765_v26  ;;  %v771_v50 = vadd.s32 %v765_v26, %v761_v63  ;;  %v787_v36 = vshll.u32 %v784_v55, 16  ;;  %v786_v8 = vmul.u32 %v782_v11, %v3225_v12 }
 0x11f   :  { %v671_v14 = vand.u32 2147483647, %v670_v45  ;;  %v770_v38 = vsel %vm769_vm11, 1, %v2746_v3  ;;  %v789_v39 = vshll.u32 %v785_v5, 16  ;;  %v877_v44 = vand.u32 31, %v875_v28 }
 0x120   :  { %v772_v43 = vadd.s32 %v770_v38, %v764_v6  ;;  %vm773_vm10 = vc.u32 %v771_v50, %v767_v25  ;;  %vm791_vm12 = vc.u32 %v783_v35, %v787_v36  ;;  %v793_v2 = vadd.s32 %v787_v36, %v783_v35 }
 0x121   :  { %v674_v24 = vmul.f32 %v673_v29, %v671_v14  ;;  %v774_v54 = vsel %vm773_vm10, 1, %v2746_v3  ;;  %v792_v57 = vsel %vm791_vm12, 1, %v2746_v3  ;;  %v766_v56 = vshrl.u32 %v762_v31, 16 }
 0x122   :  { %v776_v15 = vadd.s32 %v774_v54, %v772_v43  ;;  %v794_v34 = vadd.s32 %v792_v57, %v786_v8  ;;  %vm795_vm0 = vc.u32 %v793_v2, %v789_v39  ;;  %v3312_v37 = vshrl.u32 %v875_v28, 5 }
 0x123   :  { %v675_v52 = vxor.u32 2147483648, %v674_v24  ;;  %v796_v62 = vsel %vm795_vm0, 1, %v2746_v3  ;;  %v3314_v12 = vsub.s32 32, %v877_v44  ;;  %v768_v11 = vshrl.u32 %v763_v49, 16 }
 0x124   :  { %v777_v59 = vadd.s32 %v776_v15, %v766_v56  ;;  %v788_v27 = vshrl.u32 %v784_v55, 16  ;;  %v798_v9 = vadd.s32 %v796_v62, %v794_v34  ;;  %v790_v51 = vshrl.u32 %v785_v5, 16  ;;  %v3328_v55 = vpop.permute.xlu0 %1337 }
 0x125   :  { %v676_v53 = vsel %vm555_vm13, %v675_v52, %v674_v24  ;;  %v880_v31 = vshll.u32 %v2748_v58, %v877_v44  ;;  %v881_v63 = vshrl.u32 %v2749_v60, %v3314_v12  ;;  %v884_v49 = vshrl.u32 %v2750_v0, %v3314_v12 }
 0x126   :  { %v679_v28 = vsel %vm3217_vm14, %v2972_v17, %v676_v53  ;;  %v3324_v6 = vadd.s32 %v777_v59, %v768_v11  ;;  %v799_v26 = vadd.s32 %v798_v9, %v788_v27  ;;  %v3330_v25 = vadd.s32 %v793_v2, %v789_v39 }
 0x127   :  { %v681_v45 = vmul.f32 %v679_v28, %v679_v28  ;;  %v883_v35 = vshll.u32 %v2749_v60, %v877_v44  ;;  %v886_v5 = vshll.u32 %v2750_v0, %v877_v44  ;;  %v3334_v50 = vor.u32 %v881_v63, %v880_v31 }
 0x128   :  { %v800_v29 = vadd.s32 %v799_v26, %v790_v51  ;;  %v887_v18 = vshrl.u32 %v2751_v4, %v3314_v12  ;;  %v889_v36 = vshll.u32 %v2751_v4, %v877_v44  ;;  %vm803_vm13 = vc.u32 %v3324_v6, %v3330_v25 }
 0x129   :  { %v682_v14 = vmul.f32 -0.001358992, %v681_v45  ;;  %v689_v38 = vmul.f32 -0.00019511016, %v681_v45  ;;  %v890_v8 = vshrl.u32 %v2752_v7, %v3314_v12  ;;  %v3343_v43 = vor.u32 %v884_v49, %v883_v35 }
 0x12a   :  { %v804_v39 = vadd.s32 1, %v800_v29  ;;  %v892_v2 = vshll.u32 %v2752_v7, %v877_v44  ;;  %v893_v24 = vshrl.u32 %v2753_v10, %v3314_v12  ;;  %v801_v56 = vmul.u32 %v3207_v33, %v3301_v1 }
 0x12b   :  { %v683_v54 = vadd.f32 0.041655596, %v682_v14  ;;  %v690_v57 = vadd.f32 0.008332121, %v689_v38  ;;  %v891_v15 = vor.u32 %v890_v8, %v889_v36  ;;  %v3350_v52 = vor.u32 %v887_v18, %v886_v5 }
 0x12c   :  { %v805_v34 = vsel %vm803_vm13, %v804_v39, %v800_v29  ;;  %v894_v62 = vor.u32 %v893_v24, %v892_v2  ;;  %vm895_vm14 = vcmp.lt.s32.totalorder %v3312_v37, 1  ;;  %vm898_vm15 = vcmp.lt.s32.totalorder %v3312_v37, 4  ;;  %v3373_v26 = vpop.permute.xlu0 %77 }
 0x12d   :  { %v684_v11 = vmul.f32 %v683_v54, %v681_v45  ;;  %v691_v59 = vmul.f32 %v690_v57, %v681_v45  ;;  %v806_v27 = vadd.s32 %v805_v34, %v801_v56  ;;  %v698_v44 = vand.u32 3, %v3296_v61 }
 0x12e   :  { %v871_v9 = vor.u32 8388608, %v3291_v47  ;;  %v903_v33 = vsel %vm895_vm14, %v3334_v50, %v3343_v43  ;;  %v904_v1 = vsel %vm898_vm15, %v891_v15, 920167782  ;;  %vm897_vm1 = vcmp.lt.s32.totalorder %v3312_v37, 3 }
 0x12f   :  { %v685_v53 = vadd.f32 -0.4999988, %v684_v11  ;;  %v692_v51 = vadd.f32 -0.16666654, %v691_v59  ;;  %v807_v31 = vadd.s32 536870912, %v806_v27  ;;  %vm896_vm2 = vcmp.lt.s32.totalorder %v3312_v37, 2 }
 0x130   :  { %v905_v61 = vsel %vm897_vm1, %v3350_v52, %v904_v1  ;;  %v907_v47 = vsel %vm895_vm14, %v3343_v43, %v3350_v52  ;;  %v908_v63 = vsel %vm898_vm15, %v894_v62, 1326507024  ;;  %v3381_v36 = vshll.u32 %v871_v9, 8 }
 0x131   :  { %v686_v49 = vmul.f32 %v685_v53, %v681_v45  ;;  %v693_v35 = vmul.f32 %v692_v51, %v681_v45  ;;  %v3375_v5 = vshrl.u32 %v807_v31, 30  ;;  %v906_v29 = vsel %vm896_vm2, %v903_v33, %v905_v61 }
 0x132   :  { %v909_v18 = vsel %vm897_vm1, %v891_v15, %v908_v63  ;;  %v3386_v39 = vadd.f32 %v3373_v26, %v2808_v40  ;;  %v3390_v45 = vadd.f32 %v3373_v26, %v2811_v41  ;;  %v937_v24 = vshrl.u32 %v906_v29, 16 }
 0x133   :  { %v687_v14 = vadd.f32 1.0, %v686_v49  ;;  %v694_v38 = vadd.f32 1.0, %v693_v35  ;;  %v809_v8 = vshll.u32 %v3375_v5, 30  ;;  %v910_v2 = vsel %vm896_vm2, %v907_v47, %v909_v18 }
 0x134   :  { %vm699_vm3 = vcmp.lt.s32.totalorder %v698_v44, 2  ;;  %vm700_vm4 = vcmp.eq.s32.totalorder %v698_v44, 0  ;;  %v912_v15 = vand.u32 65535, %v3381_v36  ;;  %v914_v34 = vand.u32 65535, %v910_v2 }
 0x135   :  { %v695_v54 = vmul.f32 %v694_v38, %v679_v28  ;;  %v704_v57 = vxor.u32 2147483648, %v687_v14  ;;  %v810_v56 = vsub.s32 %v806_v27, %v809_v8  ;;  %v915_v62 = vshrl.u32 %v910_v2, 16 }
 0x136   :  { %v913_v59 = vshrl.u32 %v3381_v36, 16  ;;  %vm703_vm6 = vcmp.eq.s32.totalorder %v698_v44, 2  ;;  %v936_v9 = vand.u32 65535, %v906_v29  ;;  %v939_v33 = vmul.u32 %v937_v24, %v912_v15 }
 0x137   :  { %v701_v11 = vxor.u32 2147483648, %v695_v54  ;;  %vm811_vm5 = vcmp.lt.s32.totalorder %v810_v56, 0  ;;  %v812_v40 = vsub.s32 0, %v810_v56  ;;  %v917_v41 = vmul.u32 %v915_v62, %v912_v15 }
 0x138   :  { %v705_v53 = vsel %vm703_vm6, %v704_v57, %v695_v54  ;;  %v918_v51 = vmul.u32 %v914_v34, %v913_v59  ;;  %vm696_vm7 = vweird.f32 %v2972_v17  ;;  %v802_v63 = vadd.s32 %v3330_v25, %v3324_v6 }
 0x139   :  { %v702_v1 = vsel %vm700_vm4, %v687_v14, %v701_v11  ;;  %v813_v28 = vsel %vm811_vm5, %v812_v40, %v810_v56  ;;  %v920_v61 = vshll.u32 %v917_v41, 16  ;;  %v879_v49 = vshrl.u32 %v2748_v58, %v3314_v12 }
 0x13a   :  { %v706_v27 = vsel %vm699_vm3, %v702_v1, %v705_v53  ;;  %v814_v31 = vclz %v813_v28  ;;  %v916_v35 = vmul.u32 %v914_v34, %v912_v15  ;;  %v919_v18 = vmul.u32 %v915_v62, %v913_v59 }
 0x13b   :  { %v707_v47 = vsel %vm696_vm7, nan, %v706_v27  ;;  %v938_v14 = vmul.u32 %v936_v9, %v912_v15  ;;  %v940_v38 = vmul.u32 %v936_v9, %v913_v59  ;;  %vm710_vm8 = vcmp.lt.s32.totalorder %v3110_v48, 0 }
 0x13c   :  { %v2663_v29 = vadd.s32 4294967294, %v814_v31  ;;  %2603 = vst [vmem:[#allocation2 + $0x18] sm:$0xff] %v707_v47  ;;  %v922_v17 = vshll.u32 %v918_v51, 16  ;;  %vm924_vm9 = vc.u32 %v916_v35, %v920_v61  ;;  %v926_v44 = vadd.s32 %v920_v61, %v916_v35 }
 0x13d   :  { %v942_v8 = vshll.u32 %v939_v33, 16  ;;  %2611 = vst [vmem:[#allocation2 + $0x98] sm:$0xff] %v707_v47  ;;  %v832_v2 = vsub.s32 4, %v3375_v5  ;;  %v925_v6 = vsel %vm924_vm9, 1, %v2746_v3  ;;  %v941_v25 = vmul.u32 %v937_v24, %v913_v59 }
 0x13e   :  { %vm2664_vm11 = vcmp.lt.s32.totalorder %v2663_v29, 0  ;;  %v927_v54 = vadd.s32 %v925_v6, %v919_v18  ;;  %vm928_vm10 = vc.u32 %v926_v44, %v922_v17  ;;  %v921_v34 = vshrl.u32 %v917_v41, 16 }
 0x13f   :  { %v817_v12 = vsel %vm2664_vm11, 0, %v2663_v29  ;;  %vm946_vm12 = vc.u32 %v938_v14, %v942_v8  ;;  %v929_v62 = vsel %vm928_vm10, 1, %v2746_v3  ;;  %v944_v40 = vshll.u32 %v940_v38, 16 }
 0x140   :  { %v818_v57 = vsub.s32 32, %v817_v12  ;;  %v822_v15 = vsub.s32 4294967266, %v817_v12  ;;  %v931_v11 = vadd.s32 %v929_v62, %v927_v54  ;;  %v947_v9 = vsel %vm946_vm12, 1, %v2746_v3 }
 0x141   :  { %v948_v1 = vadd.s32 %v942_v8, %v938_v14  ;;  %v819_v53 = vshll.u32 %v810_v56, %v817_v12  ;;  %v949_v31 = vadd.s32 %v947_v9, %v941_v25  ;;  %v900_v24 = vsel %vm898_vm15, %v3350_v52, 2102212464 }
 0x142   :  { %v820_v28 = vshrl.u32 %v802_v63, %v818_v57  ;;  %v823_v27 = vadd.s32 127, %v822_v15  ;;  %v932_v59 = vadd.s32 %v931_v11, %v921_v34  ;;  %v1018_v61 = vand.u32 2147483647, %v3386_v39 }
 0x143   :  { %vm950_vm0 = vc.u32 %v948_v1, %v944_v40  ;;  %v923_v35 = vshrl.u32 %v918_v51, 16  ;;  %v899_v56 = vsel %vm895_vm14, %v879_v49, %v3334_v50  ;;  %v943_v63 = vshrl.u32 %v939_v33, 16 }
 0x144   :  { %v821_v41 = vor.u32 %v820_v28, %v819_v53  ;;  %v824_v47 = vshll.u32 %v823_v27, 23  ;;  %v951_v29 = vsel %vm950_vm0, 1, %v2746_v3  ;;  %v1021_v14 = vand.u32 2139095040, %v3386_v39 }
 0x145   :  { %v953_v18 = vadd.s32 %v951_v29, %v949_v31  ;;  %v833_v52 = vsel %vm710_vm8, %v832_v2, %v3375_v5  ;;  %v901_v44 = vsel %vm897_vm1, %v3343_v43, %v900_v24  ;;  %v933_v51 = vadd.s32 %v932_v59, %v923_v35 }
 0x146   :  { %v825_v17 = vor.u32 4788187, %v824_v47  ;;  %v945_v8 = vshrl.u32 %v940_v38, 16  ;;  %v1022_v25 = vshrl.u32 %v1021_v14, 23  ;;  %v1025_v50 = vand.u32 8388607, %v1018_v61 }
 0x147   :  { %v954_v6 = vadd.s32 %v953_v18, %v943_v63  ;;  %v828_v49 = vcvt.s32.f32 %v821_v41  ;;  %v952_v12 = vadd.s32 %v948_v1, %v944_v40  ;;  %vm3426_vm13 = vcmp.le.f32.partialorder %v708_v42, 0.7853982 }
 0x148   :  { %v826_v33 = vand.u32 2147483647, %v825_v17  ;;  %v902_v5 = vsel %vm896_vm2, %v899_v56, %v901_v44  ;;  %v2668_v2 = vadd.s32 4294967169, %v1022_v25  ;;  %v835_v57 = vsel %vm3426_vm13, 0, %v833_v52 }
 0x149   :  { %v955_v43 = vadd.s32 %v954_v6, %v945_v8  ;;  %vm958_vm14 = vc.u32 %v933_v51, %v952_v12  ;;  %v1026_v34 = vor.u32 8388608, %v1025_v50  ;;  %v1173_v11 = vand.u32 2147483647, %v3390_v45 }
 0x14a   :  { %v829_v38 = vmul.f32 %v828_v49, %v826_v33  ;;  %v1028_v62 = vadd.s32 1, %v2668_v2  ;;  %v956_v42 = vmul.u32 %v3381_v36, %v902_v5  ;;  %v1176_v9 = vand.u32 2139095040, %v3390_v45 }
 0x14b   :  { %v959_v15 = vadd.s32 1, %v955_v43  ;;  %v852_v53 = vadd.s32 3, %v835_v57  ;;  %v3444_v59 = vshll.u32 %v1026_v34, 8  ;;  %v3448_v36 = vand.u32 8388607, %v1173_v11 }
 0x14c   :  { %v830_v40 = vxor.u32 2147483648, %v829_v38  ;;  %vm1029_vm15 = vcmp.gt.s32.totalorder %v1028_v62, 0  ;;  %v1177_v35 = vshrl.u32 %v1176_v9, 23  ;;  %vm865_vm1 = vcmp.lt.s32.totalorder %v3114_v46, 0 }
 0x14d   :  { %v960_v1 = vsel %vm958_vm14, %v959_v15, %v955_v43  ;;  %v1030_v27 = vsel %vm1029_vm15, %v1028_v62, 0  ;;  %v3454_v18 = vand.u32 3, %v852_v53  ;;  %v3457_v17 = vadd.s32 %v952_v12, %v933_v51 }
 0x14e   :  { %v831_v37 = vsel %vm710_vm8, %v830_v40, %v829_v38  ;;  %v961_v28 = vadd.s32 %v960_v1, %v956_v42  ;;  %v1032_v24 = vand.u32 31, %v1030_v27  ;;  %v3460_v52 = vand.u32 65535, %v3444_v59 }
 0x14f   :  { %v3442_v31 = vsel %vm3426_vm13, %v3110_v48, %v831_v37  ;;  %v3463_v44 = vshrl.u32 %v3444_v59, 16  ;;  %v1181_v8 = vor.u32 8388608, %v3448_v36  ;;  %v2671_v33 = vadd.s32 4294967169, %v1177_v35 }
 0x150   :  { %v836_v41 = vmul.f32 %v3442_v31, %v3442_v31  ;;  %v962_v47 = vadd.s32 536870912, %v961_v28  ;;  %v3452_v29 = vsub.s32 32, %v1032_v24  ;;  %v3466_v49 = vshrl.u32 %v1030_v27, 5 }
 0x151   :  { %v1035_v54 = vshll.u32 %v2748_v58, %v1032_v24  ;;  %vm858_vm2 = vcmp.eq.s32.totalorder %v3454_v18, 2  ;;  %v1038_v15 = vshll.u32 %v2749_v60, %v1032_v24  ;;  %v1044_v62 = vshll.u32 %v2751_v4, %v1032_v24 }
 0x152   :  { %v837_v56 = vmul.f32 -0.001358992, %v836_v41  ;;  %v844_v63 = vmul.f32 -0.00019511016, %v836_v41  ;;  %v963_v14 = vshrl.u32 %v962_v47, 30  ;;  %v1036_v51 = vshrl.u32 %v2749_v60, %v3452_v29 }
 0x153   :  { %v1039_v12 = vshrl.u32 %v2750_v0, %v3452_v29  ;;  %v1045_v38 = vshrl.u32 %v2752_v7, %v3452_v29  ;;  %v1042_v34 = vshrl.u32 %v2751_v4, %v3452_v29  ;;  %vm855_vm4 = vcmp.eq.s32.totalorder %v3454_v18, 0 }
 0x154   :  { %v838_v6 = vadd.f32 0.041655596, %v837_v56  ;;  %v845_v25 = vadd.f32 0.008332121, %v844_v63  ;;  %v964_v50 = vshll.u32 %v963_v14, 30  ;;  %v987_v57 = vsub.s32 4, %v963_v14 }
 0x155   :  { %v1037_v1 = vor.u32 %v1036_v51, %v1035_v54  ;;  %v3485_v37 = vor.u32 %v1039_v12, %v1038_v15  ;;  %v1041_v53 = vshll.u32 %v2750_v0, %v1032_v24  ;;  %vm854_vm5 = vcmp.lt.s32.totalorder %v3454_v18, 2 }
 0x156   :  { %v839_v5 = vmul.f32 %v838_v6, %v836_v41  ;;  %v846_v43 = vmul.f32 %v845_v25, %v836_v41  ;;  %v3473_v2 = vsub.s32 %v961_v28, %v964_v50  ;;  %v1048_v28 = vshrl.u32 %v2753_v10, %v3452_v29 }
 0x157   :  { %v1046_v56 = vor.u32 %v1045_v38, %v1044_v62  ;;  %vm851_vm6 = vweird.f32 %v3110_v48  ;;  %v1043_v6 = vor.u32 %v1042_v34, %v1041_v53  ;;  %v1047_v25 = vshll.u32 %v2752_v7, %v1032_v24 }
 0x158   :  { %v840_v40 = vadd.f32 -0.4999988, %v839_v5  ;;  %v847_v42 = vadd.f32 -0.16666654, %v846_v43  ;;  %vm966_vm3 = vcmp.lt.s32.totalorder %v3473_v2, 0  ;;  %v967_v9 = vsub.s32 0, %v3473_v2 }
 0x159   :  { %v3494_v50 = vadd.s32 1, %v2671_v33  ;;  %v3498_v12 = vsel %vm865_vm1, %v987_v57, %v963_v14  ;;  %vm1050_vm7 = vcmp.lt.s32.totalorder %v3466_v49, 1  ;;  %vm3503_vm8 = vcmp.le.f32.partialorder %v863_v16, 0.7853982 }
 0x15a   :  { %v841_v27 = vmul.f32 %v840_v40, %v836_v41  ;;  %v848_v47 = vmul.f32 %v847_v42, %v836_v41  ;;  %v968_v35 = vsel %vm966_vm3, %v967_v9, %v3473_v2  ;;  %v1049_v43 = vor.u32 %v1048_v28, %v1047_v25 }
 0x15b   :  { %v969_v63 = vclz %v968_v35  ;;  %vm1053_vm9 = vcmp.lt.s32.totalorder %v3466_v49, 4  ;;  %v1058_v24 = vsel %vm1050_vm7, %v1037_v1, %v3485_v37  ;;  %vm1052_vm11 = vcmp.lt.s32.totalorder %v3466_v49, 3 }
 0x15c   :  { %v842_v54 = vadd.f32 1.0, %v841_v27  ;;  %v849_v51 = vadd.f32 1.0, %v848_v47  ;;  %v1059_v38 = vsel %vm1053_vm9, %v1046_v56, 920167782  ;;  %vm1051_vm12 = vcmp.lt.s32.totalorder %v3466_v49, 2 }
 0x15d   :  { %v2666_v5 = vadd.s32 4294967294, %v969_v63  ;;  %v1060_v16 = vsel %vm1052_vm11, %v1043_v6, %v1059_v38  ;;  %v1062_v57 = vsel %vm1050_vm7, %v3485_v37, %v1043_v6  ;;  %v1063_v53 = vsel %vm1053_vm9, %v1049_v43, 1326507024 }
 0x15e   :  { %v850_v33 = vmul.f32 %v849_v51, %v3442_v31  ;;  %v859_v14 = vxor.u32 2147483648, %v842_v54  ;;  %v1061_v62 = vsel %vm1051_vm12, %v1058_v24, %v1060_v16  ;;  %v1064_v27 = vsel %vm1052_vm11, %v1046_v56, %v1063_v53 }
 0x15f   :  { %vm2667_vm10 = vcmp.lt.s32.totalorder %v2666_v5, 0  ;;  %v1091_v47 = vand.u32 65535, %v1061_v62  ;;  %v1092_v35 = vshrl.u32 %v1061_v62, 16 }
 0x160   :  { %v856_v15 = vxor.u32 2147483648, %v850_v33  ;;  %v860_v31 = vsel %vm858_vm2, %v859_v14, %v850_v33  ;;  %v972_v34 = vsel %vm2667_vm10, 0, %v2666_v5  ;;  %vm1184_vm2 = vcmp.gt.s32.totalorder %v3494_v50, 0 }
 0x161   :  { %v973_v40 = vsub.s32 32, %v972_v34  ;;  %v974_v42 = vshll.u32 %v3473_v2, %v972_v34  ;;  %v977_v9 = vsub.s32 4294967266, %v972_v34  ;;  %v1065_v2 = vsel %vm1051_vm12, %v1062_v57, %v1064_v27 }
 0x162   :  { %v857_v28 = vsel %vm855_vm4, %v842_v54, %v856_v15  ;;  %v1034_v54 = vshrl.u32 %v2748_v58, %v3452_v29  ;;  %v1069_v43 = vand.u32 65535, %v1065_v2  ;;  %v1070_v24 = vshrl.u32 %v1065_v2, 16 }
 0x163   :  { %v861_v63 = vsel %vm854_vm5, %v857_v28, %v860_v31  ;;  %v975_v25 = vshrl.u32 %v3457_v17, %v973_v40  ;;  %v978_v51 = vadd.s32 127, %v977_v9  ;;  %v1094_v14 = vmul.u32 %v1092_v35, %v3460_v52 }
 0x164   :  { %v862_v5 = vsel %vm851_vm6, nan, %v861_v63  ;;  %v1095_v18 = vmul.u32 %v1091_v47, %v3463_v44  ;;  %v990_v17 = vsel %vm3503_vm8, 0, %v3498_v12  ;;  %v1054_v48 = vsel %vm1050_vm7, %v1034_v54, %v1037_v1 }
 0x165   :  { %v976_v56 = vor.u32 %v975_v25, %v974_v42  ;;  %v979_v33 = vshll.u32 %v978_v51, 23  ;;  %2604 = vst [vmem:[#allocation2 + $0x20] sm:$0xff] %v862_v5  ;;  %v1072_v38 = vmul.u32 %v1070_v24, %v3460_v52  ;;  %v1073_v29 = vmul.u32 %v1069_v43, %v3463_v44 }
 0x166   :  { %2612 = vst [vmem:[#allocation2 + $0xa0] sm:$0xff] %v862_v5  ;;  %v1055_v57 = vsel %vm1053_vm9, %v1043_v6, 2102212464  ;;  %v1093_v15 = vmul.u32 %v1091_v47, %v3460_v52  ;;  %v1097_v31 = vshll.u32 %v1094_v14, 16  ;;  %v1071_v62 = vmul.u32 %v1069_v43, %v3460_v52 }
 0x167   :  { %v980_v16 = vor.u32 4788187, %v979_v33  ;;  %v983_v34 = vcvt.s32.f32 %v976_v56  ;;  %v1074_v12 = vmul.u32 %v1070_v24, %v3463_v44  ;;  %v1075_v40 = vshll.u32 %v1072_v38, 16 }
 0x168   :  { %v1077_v1 = vshll.u32 %v1073_v29, 16  ;;  %v1096_v9 = vmul.u32 %v1092_v35, %v3463_v44  ;;  %v1099_v53 = vshll.u32 %v1095_v18, 16  ;;  %vm1101_vm13 = vc.u32 %v1093_v15, %v1097_v31 }
 0x169   :  { %v981_v42 = vand.u32 2147483647, %v980_v16  ;;  %vm1079_vm0 = vc.u32 %v1071_v62, %v1075_v40  ;;  %v1081_v28 = vadd.s32 %v1075_v40, %v1071_v62  ;;  %v1103_v27 = vadd.s32 %v1097_v31, %v1093_v15 }
 0x16a   :  { %v1056_v6 = vsel %vm1052_vm11, %v3485_v37, %v1055_v57  ;;  %v1080_v47 = vsel %vm1079_vm0, 1, %v2746_v3  ;;  %v1102_v52 = vsel %vm1101_vm13, 1, %v2746_v3  ;;  %v1076_v44 = vshrl.u32 %v1072_v38, 16 }
 0x16b   :  { %v984_v63 = vmul.f32 %v983_v34, %v981_v42  ;;  %v1082_v25 = vadd.s32 %v1080_v47, %v1074_v12  ;;  %vm1083_vm14 = vc.u32 %v1081_v28, %v1077_v1  ;;  %v1104_v51 = vadd.s32 %v1102_v52, %v1096_v9 }
 0x16c   :  { %vm1105_vm15 = vc.u32 %v1103_v27, %v1099_v53  ;;  %v1084_v35 = vsel %vm1083_vm14, 1, %v2746_v3  ;;  %v1098_v43 = vshrl.u32 %v1094_v14, 16  ;;  %v1007_v56 = vadd.s32 3, %v990_v17 }
 0x16d   :  { %v985_v2 = vxor.u32 2147483648, %v984_v63  ;;  %v1106_v5 = vsel %vm1105_vm15, 1, %v2746_v3  ;;  %v1086_v54 = vadd.s32 %v1084_v35, %v1082_v25  ;;  %v1078_v33 = vshrl.u32 %v1073_v29, 16 }
 0x16e   :  { %v1108_v24 = vadd.s32 %v1106_v5, %v1104_v51  ;;  %v1185_v16 = vsel %vm1184_vm2, %v3494_v50, 0  ;;  %v1100_v15 = vshrl.u32 %v1095_v18, 16  ;;  %v3571_v34 = vadd.f32 1.0, %v2781_v20 }
 0x16f   :  { %v986_v37 = vsel %vm865_vm1, %v985_v2, %v984_v63  ;;  %v1087_v57 = vadd.s32 %v1086_v54, %v1076_v44  ;;  %v1057_v62 = vsel %vm1051_vm12, %v1054_v48, %v1056_v6  ;;  %v1187_v12 = vand.u32 31, %v1185_v16 }
 0x170   :  { %v989_v38 = vsel %vm3503_vm8, %v3114_v46, %v986_v37  ;;  %v1109_v31 = vadd.s32 %v1108_v24, %v1098_v43  ;;  %v3576_v17 = vadd.f32 1.0, %v2783_v21  ;;  %v3580_v50 = vadd.s32 %v1103_v27, %v1099_v53 }
 0x171   :  { %v991_v14 = vmul.f32 %v989_v38, %v989_v38  ;;  %v3578_v29 = vadd.s32 %v1087_v57, %v1078_v33  ;;  %v3582_v18 = vand.u32 3, %v1007_v56  ;;  %v3584_v1 = vsub.s32 32, %v1187_v12 }
 0x172   :  { %v1110_v41 = vadd.s32 %v1109_v31, %v1100_v15  ;;  %v1111_v20 = vmul.u32 %v3444_v59, %v1057_v62  ;;  %v3591_v21 = vshll.u32 %v1181_v8, 8  ;;  %v3593_v53 = vshrl.u32 %v1185_v16, 5 }
 0x173   :  { %v992_v40 = vmul.f32 -0.001358992, %v991_v14  ;;  %v999_v42 = vmul.f32 -0.00019511016, %v991_v14  ;;  %vm1113_vm1 = vc.u32 %v3578_v29, %v3580_v50  ;;  %v1191_v28 = vshrl.u32 %v2749_v60, %v3584_v1 }
 0x174   :  { %v1114_v49 = vadd.s32 1, %v1110_v41  ;;  %v1190_v63 = vshll.u32 %v2748_v58, %v1187_v12  ;;  %v1194_v59 = vshrl.u32 %v2750_v0, %v3584_v1  ;;  %v1197_v6 = vshrl.u32 %v2751_v4, %v3584_v1 }
 0x175   :  { %v993_v48 = vadd.f32 0.041655596, %v992_v40  ;;  %v1000_v9 = vadd.f32 0.008332121, %v999_v42  ;;  %v1193_v52 = vshll.u32 %v2749_v60, %v1187_v12  ;;  %v1196_v51 = vshll.u32 %v2750_v0, %v1187_v12 }
 0x176   :  { %v1115_v27 = vsel %vm1113_vm1, %v1114_v49, %v1110_v41  ;;  %v3603_v25 = vor.u32 %v1191_v28, %v1190_v63  ;;  %v1199_v2 = vshll.u32 %v2751_v4, %v1187_v12  ;;  %v1200_v44 = vshrl.u32 %v2752_v7, %v3584_v1 }
 0x177   :  { %v994_v47 = vmul.f32 %v993_v48, %v991_v14  ;;  %v1001_v36 = vmul.f32 %v1000_v9, %v991_v14  ;;  %v1116_v8 = vadd.s32 %v1115_v27, %v1111_v20  ;;  %v3609_v43 = vor.u32 %v1194_v59, %v1193_v52 }
 0x178   :  { %v3611_v24 = vor.u32 %v1197_v6, %v1196_v51  ;;  %v1201_v37 = vor.u32 %v1200_v44, %v1199_v2  ;;  %v1202_v56 = vshll.u32 %v2752_v7, %v1187_v12  ;;  %v1203_v33 = vshrl.u32 %v2753_v10, %v3584_v1 }
 0x179   :  { %v995_v35 = vadd.f32 -0.4999988, %v994_v47  ;;  %v1002_v5 = vadd.f32 -0.16666654, %v1001_v36  ;;  %v1117_v54 = vadd.s32 536870912, %v1116_v8  ;;  %vm1208_vm3 = vcmp.lt.s32.totalorder %v3593_v53, 4 }
 0x17a   :  { %v1204_v31 = vor.u32 %v1203_v33, %v1202_v56  ;;  %vm1205_vm4 = vcmp.lt.s32.totalorder %v3593_v53, 1  ;;  %vm1207_vm5 = vcmp.lt.s32.totalorder %v3593_v53, 3  ;;  %v1214_v62 = vsel %vm1208_vm3, %v1201_v37, 920167782 }
 0x17b   :  { %v996_v16 = vmul.f32 %v995_v35, %v991_v14  ;;  %v1003_v57 = vmul.f32 %v1002_v5, %v991_v14  ;;  %v3616_v15 = vshrl.u32 %v1117_v54, 30  ;;  %v1213_v14 = vsel %vm1205_vm4, %v3603_v25, %v3609_v43 }
 0x17c   :  { %vm1009_vm6 = vcmp.lt.s32.totalorder %v3582_v18, 2  ;;  %vm1206_vm7 = vcmp.lt.s32.totalorder %v3593_v53, 2  ;;  %v1215_v42 = vsel %vm1207_vm5, %v3611_v24, %v1214_v62  ;;  %v1218_v20 = vsel %vm1208_vm3, %v1204_v31, 1326507024 }
 0x17d   :  { %v997_v41 = vadd.f32 1.0, %v996_v16  ;;  %v1004_v40 = vadd.f32 1.0, %v1003_v57  ;;  %v1119_v12 = vshll.u32 %v3616_v15, 30  ;;  %v1217_v28 = vsel %vm1205_vm4, %v3609_v43, %v3611_v24 }
 0x17e   :  { %vm1010_vm8 = vcmp.eq.s32.totalorder %v3582_v18, 0  ;;  %vm1013_vm9 = vcmp.eq.s32.totalorder %v3582_v18, 2  ;;  %v1216_v27 = vsel %vm1206_vm7, %v1213_v14, %v1215_v42  ;;  %v1219_v63 = vsel %vm1207_vm5, %v1201_v37, %v1218_v20 }
 0x17f   :  { %v1005_v49 = vmul.f32 %v1004_v40, %v989_v38  ;;  %v1014_v48 = vxor.u32 2147483648, %v997_v41  ;;  %v1120_v9 = vsub.s32 %v1116_v8, %v1119_v12  ;;  %v1222_v6 = vand.u32 65535, %v3591_v21 }
 0x180   :  { %v1220_v36 = vsel %vm1206_vm7, %v1217_v28, %v1219_v63  ;;  %v1223_v8 = vshrl.u32 %v3591_v21, 16  ;;  %v1246_v52 = vand.u32 65535, %v1216_v27  ;;  %vm1006_vm10 = vweird.f32 %v3114_v46 }
 0x181   :  { %v1011_v59 = vxor.u32 2147483648, %v1005_v49  ;;  %vm1121_vm11 = vcmp.lt.s32.totalorder %v1120_v9, 0  ;;  %v1122_v38 = vsub.s32 0, %v1120_v9  ;;  %v1015_v47 = vsel %vm1013_vm9, %v1014_v48, %v1005_v49 }
 0x182   :  { %v1224_v44 = vand.u32 65535, %v1220_v36  ;;  %v1225_v35 = vshrl.u32 %v1220_v36, 16  ;;  %v1247_v37 = vshrl.u32 %v1216_v27, 16  ;;  %v1112_v57 = vadd.s32 %v3580_v50, %v3578_v29 }
 0x183   :  { %v1012_v51 = vsel %vm1010_vm8, %v997_v41, %v1011_v59  ;;  %v1123_v2 = vsel %vm1121_vm11, %v1122_v38, %v1120_v9  ;;  %v1344_v62 = vmul.f32 %v2785_v22, %v3571_v34  ;;  %v3658_v41 = vmul.f32 %v2785_v22, %v3576_v17 }
 0x184   :  { %v1016_v5 = vsel %vm1009_vm6, %v1012_v51, %v1015_v47  ;;  %v1124_v54 = vclz %v1123_v2  ;;  %v1227_v33 = vmul.u32 %v1225_v35, %v1222_v6  ;;  %v1228_v16 = vmul.u32 %v1224_v44, %v1223_v8 }
 0x185   :  { %v1017_v56 = vsel %vm1006_vm10, nan, %v1016_v5  ;;  %v1142_v46 = vsub.s32 4, %v3616_v15  ;;  %v1226_v18 = vmul.u32 %v1224_v44, %v1222_v6  ;;  %v1248_v12 = vmul.u32 %v1246_v52, %v1222_v6 }
 0x186   :  { %v2669_v31 = vadd.s32 4294967294, %v1124_v54  ;;  %2605 = vst [vmem:[#allocation2 + $0x28] sm:$0xff] %v1017_v56  ;;  %v1230_v40 = vshll.u32 %v1227_v33, 16  ;;  %vm1020_vm12 = vcmp.lt.s32.totalorder %v3386_v39, 0  ;;  %v1229_v14 = vmul.u32 %v1225_v35, %v1223_v8 }
 0x187   :  { %2613 = vst [vmem:[#allocation2 + $0xa8] sm:$0xff] %v1017_v56  ;;  %v1232_v29 = vshll.u32 %v1228_v16, 16  ;;  %v1249_v50 = vmul.u32 %v1247_v37, %v1222_v6  ;;  %v1250_v49 = vmul.u32 %v1246_v52, %v1223_v8  ;;  %v1231_v28 = vshrl.u32 %v1227_v33, 16 }
 0x188   :  { %vm2670_vm0 = vcmp.lt.s32.totalorder %v2669_v31, 0  ;;  %vm1234_vm13 = vc.u32 %v1226_v18, %v1230_v40  ;;  %v1236_v20 = vadd.s32 %v1230_v40, %v1226_v18  ;;  %v1251_v59 = vmul.u32 %v1247_v37, %v1223_v8 }
 0x189   :  { %v1127_v42 = vsel %vm2670_vm0, 0, %v2669_v31  ;;  %v1235_v27 = vsel %vm1234_vm13, 1, %v2746_v3  ;;  %v1252_v38 = vshll.u32 %v1249_v50, 16  ;;  %v1254_v6 = vshll.u32 %v1250_v49, 16 }
 0x18a   :  { %v1128_v48 = vsub.s32 32, %v1127_v42  ;;  %v1132_v22 = vsub.s32 4294967266, %v1127_v42  ;;  %v1237_v63 = vadd.s32 %v1235_v27, %v1229_v14  ;;  %vm1238_vm14 = vc.u32 %v1236_v20, %v1232_v29 }
 0x18b   :  { %v1129_v47 = vshll.u32 %v1120_v9, %v1127_v42  ;;  %v1239_v2 = vsel %vm1238_vm14, 1, %v2746_v3  ;;  %vm1256_vm15 = vc.u32 %v1248_v12, %v1252_v38  ;;  %v1258_v35 = vadd.s32 %v1252_v38, %v1248_v12 }
 0x18c   :  { %v1130_v36 = vshrl.u32 %v1112_v57, %v1128_v48  ;;  %v1133_v51 = vadd.s32 127, %v1132_v22  ;;  %v1241_v44 = vadd.s32 %v1239_v2, %v1237_v63  ;;  %v1189_v54 = vshrl.u32 %v2748_v58, %v3584_v1 }
 0x18d   :  { %v1257_v56 = vsel %vm1256_vm15, 1, %v2746_v3  ;;  %v1210_v8 = vsel %vm1208_vm3, %v3611_v24, 2102212464  ;;  %vm1260_vm2 = vc.u32 %v1258_v35, %v1254_v6  ;;  %v1233_v31 = vshrl.u32 %v1228_v16, 16 }
 0x18e   :  { %v1131_v5 = vor.u32 %v1130_v36, %v1129_v47  ;;  %v1134_v52 = vshll.u32 %v1133_v51, 23  ;;  %v1242_v9 = vadd.s32 %v1241_v44, %v1231_v28  ;;  %v1259_v37 = vadd.s32 %v1257_v56, %v1251_v59 }
 0x18f   :  { %v1209_v57 = vsel %vm1205_vm4, %v1189_v54, %v3603_v25  ;;  %v1261_v18 = vsel %vm1260_vm2, 1, %v2746_v3  ;;  %v1143_v1 = vsel %vm1020_vm12, %v1142_v46, %v3616_v15  ;;  %v1253_v40 = vshrl.u32 %v1249_v50, 16 }
 0x190   :  { %v1135_v33 = vor.u32 4788187, %v1134_v52  ;;  %v1263_v12 = vadd.s32 %v1261_v18, %v1259_v37  ;;  %v3678_v14 = vadd.f32 %v1344_v62, %v2797_v32  ;;  %v1138_v29 = vcvt.s32.f32 %v1131_v5 }
 0x191   :  { %v1211_v42 = vsel %vm1207_vm5, %v3609_v43, %v1210_v8  ;;  %v1243_v20 = vadd.s32 %v1242_v9, %v1233_v31  ;;  %vm3685_vm1 = vcmp.le.f32.partialorder %v1018_v61, 0.7853982  ;;  %v1255_v16 = vshrl.u32 %v1250_v49, 16 }
 0x192   :  { %v1136_v24 = vand.u32 2147483647, %v1135_v33  ;;  %v1264_v15 = vadd.s32 %v1263_v12, %v1253_v40  ;;  %v1145_v62 = vsel %vm3685_vm1, 0, %v1143_v1  ;;  %v1262_v50 = vadd.s32 %v1258_v35, %v1254_v6 }
 0x193   :  { %v1212_v48 = vsel %vm1206_vm7, %v1209_v57, %v1211_v42  ;;  %v1360_v43 = vand.u32 2147483647, %v3678_v14  ;;  %v1363_v28 = vand.u32 2139095040, %v3678_v14  ;;  %v3697_v61 = vadd.f32 %v3658_v41, %v2797_v32 }
 0x194   :  { %v1139_v46 = vmul.f32 %v1138_v29, %v1136_v24  ;;  %v1265_v22 = vadd.s32 %v1264_v15, %v1255_v16  ;;  %vm1268_vm3 = vc.u32 %v1243_v20, %v1262_v50  ;;  %v1162_v38 = vadd.s32 3, %v1145_v62 }
 0x195   :  { %v1364_v63 = vshrl.u32 %v1363_v28, 23  ;;  %v1266_v53 = vmul.u32 %v3591_v21, %v1212_v48  ;;  %v1515_v47 = vand.u32 2147483647, %v3697_v61  ;;  %v1367_v32 = vand.u32 8388607, %v1360_v43 }
 0x196   :  { %v1140_v27 = vxor.u32 2147483648, %v1139_v46  ;;  %v1269_v49 = vadd.s32 1, %v1265_v22  ;;  %v1518_v35 = vand.u32 2139095040, %v3697_v61  ;;  %v3709_v21 = vand.u32 3, %v1162_v38 }
 0x197   :  { %v2674_v2 = vadd.s32 4294967169, %v1364_v63  ;;  %v1368_v56 = vor.u32 8388608, %v1367_v32  ;;  %v3713_v8 = vand.u32 8388607, %v1515_v47  ;;  %vm3717_vm5 = vcmp.le.f32.partialorder %v1173_v11, 0.7853982 }
 0x198   :  { %v1141_v59 = vsel %vm1020_vm12, %v1140_v27, %v1139_v46  ;;  %v1270_v51 = vsel %vm1268_vm3, %v1269_v49, %v1265_v22  ;;  %v1519_v18 = vshrl.u32 %v1518_v35, 23  ;;  %vm1175_vm6 = vcmp.lt.s32.totalorder %v3390_v45, 0 }
 0x199   :  { %v1144_v36 = vsel %vm3685_vm1, %v3386_v39, %v1141_v59  ;;  %v1271_v44 = vadd.s32 %v1270_v51, %v1266_v53  ;;  %v1370_v6 = vadd.s32 1, %v2674_v2  ;;  %v1267_v29 = vadd.s32 %v1262_v50, %v1243_v20 }
 0x19a   :  { %v1146_v41 = vmul.f32 %v1144_v36, %v1144_v36  ;;  %v3722_v16 = vshll.u32 %v1368_v56, 8  ;;  %vm1168_vm7 = vcmp.eq.s32.totalorder %v3709_v21, 2  ;;  %v1523_v48 = vor.u32 8388608, %v3713_v8 }
 0x19b   :  { %v1272_v54 = vadd.s32 536870912, %v1271_v44  ;;  %vm1371_vm4 = vcmp.gt.s32.totalorder %v1370_v6, 0  ;;  %vm1165_vm8 = vcmp.eq.s32.totalorder %v3709_v21, 0  ;;  %v2677_v50 = vadd.s32 4294967169, %v1519_v18 }
 0x19c   :  { %v1147_v5 = vmul.f32 -0.001358992, %v1146_v41  ;;  %v1154_v52 = vmul.f32 -0.00019511016, %v1146_v41  ;;  %v1372_v57 = vsel %vm1371_vm4, %v1370_v6, 0  ;;  %vm1164_vm9 = vcmp.lt.s32.totalorder %v3709_v21, 2 }
 0x19d   :  { %v1273_v33 = vshrl.u32 %v1272_v54, 30  ;;  %v1374_v31 = vand.u32 31, %v1372_v57  ;;  %vm1161_vm10 = vweird.f32 %v3386_v39  ;;  %v3743_v6 = vshrl.u32 %v1372_v57, 5 }
 0x19e   :  { %v1148_v9 = vadd.f32 0.041655596, %v1147_v5  ;;  %v1155_v37 = vadd.f32 0.008332121, %v1154_v52  ;;  %v3747_v5 = vand.u32 65535, %v3722_v16 }
 0x19f   :  { %v1274_v24 = vshll.u32 %v1273_v33, 30  ;;  %v1297_v42 = vsub.s32 4, %v1273_v33  ;;  %v1375_v25 = vsub.s32 32, %v1374_v31  ;;  %v1377_v11 = vshll.u32 %v2748_v58, %v1374_v31 }
 0x1a0   :  { %v1149_v1 = vmul.f32 %v1148_v9, %v1146_v41  ;;  %v1156_v40 = vmul.f32 %v1155_v37, %v1146_v41  ;;  %v1380_v22 = vshll.u32 %v2749_v60, %v1374_v31  ;;  %v1383_v20 = vshll.u32 %v2750_v0, %v1374_v31 }
 0x1a1   :  { %v3725_v62 = vsub.s32 %v1271_v44, %v1274_v24  ;;  %v1298_v63 = vsel %vm1175_vm6, %v1297_v42, %v1273_v33  ;;  %v1378_v59 = vshrl.u32 %v2749_v60, %v1375_v25  ;;  %v1381_v38 = vshrl.u32 %v2750_v0, %v1375_v25 }
 0x1a2   :  { %v1150_v15 = vadd.f32 -0.4999988, %v1149_v1  ;;  %v1157_v46 = vadd.f32 -0.16666654, %v1156_v40  ;;  %v1384_v53 = vshrl.u32 %v2751_v4, %v1375_v25  ;;  %v1387_v35 = vshrl.u32 %v2752_v7, %v1375_v25 }
 0x1a3   :  { %vm1276_vm11 = vcmp.lt.s32.totalorder %v3725_v62, 0  ;;  %v1277_v49 = vsub.s32 0, %v3725_v62  ;;  %v1389_v56 = vshll.u32 %v2752_v7, %v1374_v31  ;;  %v1390_v9 = vshrl.u32 %v2753_v10, %v1375_v25 }
 0x1a4   :  { %v1151_v28 = vmul.f32 %v1150_v15, %v1146_v41  ;;  %v1158_v27 = vmul.f32 %v1157_v46, %v1146_v41  ;;  %v1386_v41 = vshll.u32 %v2751_v4, %v1374_v31  ;;  %v1300_v33 = vsel %vm3717_vm5, 0, %v1298_v63 }
 0x1a5   :  { %v1278_v32 = vsel %vm1276_vm11, %v1277_v49, %v3725_v62  ;;  %v1379_v18 = vor.u32 %v1378_v59, %v1377_v11  ;;  %v3753_v1 = vadd.s32 1, %v2677_v50  ;;  %v1382_v40 = vor.u32 %v1381_v38, %v1380_v22 }
 0x1a6   :  { %v1152_v51 = vadd.f32 1.0, %v1151_v28  ;;  %v1159_v2 = vadd.f32 1.0, %v1158_v27  ;;  %v1279_v44 = vclz %v1278_v32  ;;  %v1385_v24 = vor.u32 %v1384_v53, %v1383_v20 }
 0x1a7   :  { %v1388_v42 = vor.u32 %v1387_v35, %v1386_v41  ;;  %vm1392_vm0 = vcmp.lt.s32.totalorder %v3743_v6, 1  ;;  %vm1394_vm13 = vcmp.lt.s32.totalorder %v3743_v6, 3  ;;  %vm1395_vm14 = vcmp.lt.s32.totalorder %v3743_v6, 4 }
 0x1a8   :  { %v1160_v52 = vmul.f32 %v1159_v2, %v1144_v36  ;;  %v1169_v54 = vxor.u32 2147483648, %v1152_v51  ;;  %v2672_v37 = vadd.s32 4294967294, %v1279_v44  ;;  %v1391_v36 = vor.u32 %v1390_v9, %v1389_v56 }
 0x1a9   :  { %vm1393_vm15 = vcmp.lt.s32.totalorder %v3743_v6, 2  ;;  %v1376_v28 = vshrl.u32 %v2748_v58, %v1375_v25  ;;  %v1400_v27 = vsel %vm1392_vm0, %v1379_v18, %v1382_v40  ;;  %v1401_v49 = vsel %vm1395_vm14, %v1388_v42, 920167782 }
 0x1aa   :  { %v1166_v57 = vxor.u32 2147483648, %v1160_v52  ;;  %v1170_v15 = vsel %vm1168_vm7, %v1169_v54, %v1160_v52  ;;  %vm2673_vm12 = vcmp.lt.s32.totalorder %v2672_v37, 0  ;;  %v1402_v38 = vsel %vm1394_vm13, %v1385_v24, %v1401_v49 }
 0x1ab   :  { %v1282_v46 = vsel %vm2673_vm12, 0, %v2672_v37  ;;  %v1397_v39 = vsel %vm1395_vm14, %v1385_v24, 2102212464  ;;  %v1403_v25 = vsel %vm1393_vm15, %v1400_v27, %v1402_v38  ;;  %v1404_v53 = vsel %vm1392_vm0, %v1382_v40, %v1385_v24 }
 0x1ac   :  { %v1167_v31 = vsel %vm1165_vm8, %v1152_v51, %v1166_v57  ;;  %v1283_v22 = vsub.s32 32, %v1282_v46  ;;  %v1287_v20 = vsub.s32 4294967266, %v1282_v46  ;;  %v1284_v63 = vshll.u32 %v3725_v62, %v1282_v46 }
 0x1ad   :  { %v1171_v11 = vsel %vm1164_vm9, %v1167_v31, %v1170_v15  ;;  %v1405_v51 = vsel %vm1395_vm14, %v1391_v36, 1326507024  ;;  %v1433_v32 = vand.u32 65535, %v1403_v25  ;;  %v1396_v41 = vsel %vm1392_vm0, %v1376_v28, %v1379_v18 }
 0x1ae   :  { %v1172_v50 = vsel %vm1161_vm10, nan, %v1171_v11  ;;  %v1285_v59 = vshrl.u32 %v1267_v29, %v1283_v22  ;;  %v1288_v21 = vadd.s32 127, %v1287_v20  ;;  %v1406_v2 = vsel %vm1394_vm13, %v1388_v42, %v1405_v51 }
 0x1af   :  { %2606 = vst [vmem:[#allocation2 + $0x30] sm:$0xff] %v1172_v50  ;;  %v1407_v44 = vsel %vm1393_vm15, %v1404_v53, %v1406_v2  ;;  %v1410_v35 = vshrl.u32 %v3722_v16, 16  ;;  %v1434_v52 = vshrl.u32 %v1403_v25, 16  ;;  %v1398_v56 = vsel %vm1394_vm13, %v1382_v40, %v1397_v39 }
 0x1b0   :  { %2614 = vst [vmem:[#allocation2 + $0xb0] sm:$0xff] %v1172_v50  ;;  %v1286_v62 = vor.u32 %v1285_v59, %v1284_v63  ;;  %v1289_v29 = vshll.u32 %v1288_v21, 23  ;;  %v1411_v9 = vand.u32 65535, %v1407_v44  ;;  %v1412_v37 = vshrl.u32 %v1407_v44, 16 }
 0x1b1   :  { %v3792_v57 = vadd.s32 3, %v1300_v33  ;;  %v1436_v24 = vmul.u32 %v1434_v52, %v3747_v5  ;;  %v1437_v42 = vmul.u32 %v1433_v32, %v1410_v35  ;;  %vm1526_vm2 = vcmp.gt.s32.totalorder %v3753_v1, 0 }
 0x1b2   :  { %v1290_v54 = vor.u32 4788187, %v1289_v29  ;;  %v1293_v15 = vcvt.s32.f32 %v1286_v62  ;;  %v1414_v36 = vmul.u32 %v1412_v37, %v3747_v5  ;;  %v1415_v31 = vmul.u32 %v1411_v9, %v1410_v35 }
 0x1b3   :  { %v3799_v46 = vsel %vm1393_vm15, %v1396_v41, %v1398_v56  ;;  %v1435_v40 = vmul.u32 %v1433_v32, %v3747_v5  ;;  %v1438_v11 = vmul.u32 %v1434_v52, %v1410_v35  ;;  %v1439_v22 = vshll.u32 %v1436_v24, 16 }
 0x1b4   :  { %v1291_v18 = vand.u32 2147483647, %v1290_v54  ;;  %v1413_v20 = vmul.u32 %v1411_v9, %v3747_v5  ;;  %v1416_v50 = vmul.u32 %v1412_v37, %v1410_v35  ;;  %v1417_v28 = vshll.u32 %v1414_v36, 16 }
 0x1b5   :  { %v1419_v27 = vshll.u32 %v1415_v31, 16  ;;  %v1441_v49 = vshll.u32 %v1437_v42, 16  ;;  %vm1443_vm1 = vc.u32 %v1435_v40, %v1439_v22  ;;  %v1445_v63 = vadd.s32 %v1439_v22, %v1435_v40 }
 0x1b6   :  { %v1294_v33 = vmul.f32 %v1293_v15, %v1291_v18  ;;  %vm1421_vm3 = vc.u32 %v1413_v20, %v1417_v28  ;;  %v1423_v21 = vadd.s32 %v1417_v28, %v1413_v20  ;;  %v1444_v6 = vsel %vm1443_vm1, 1, %v2746_v3 }
 0x1b7   :  { %v1422_v38 = vsel %vm1421_vm3, 1, %v2746_v3  ;;  %v1446_v39 = vadd.s32 %v1444_v6, %v1438_v11  ;;  %vm1447_vm4 = vc.u32 %v1445_v63, %v1441_v49  ;;  %v1527_v25 = vsel %vm1526_vm2, %v3753_v1, 0 }
 0x1b8   :  { %v1295_v59 = vxor.u32 2147483648, %v1294_v33  ;;  %v1424_v53 = vadd.s32 %v1422_v38, %v1416_v50  ;;  %vm1425_vm7 = vc.u32 %v1423_v21, %v1419_v27  ;;  %v1448_v51 = vsel %vm1447_vm4, 1, %v2746_v3 }
 0x1b9   :  { %v1426_v29 = vsel %vm1425_vm7, 1, %v2746_v3  ;;  %v1440_v2 = vshrl.u32 %v1436_v24, 16  ;;  %v1450_v32 = vadd.s32 %v1448_v51, %v1446_v39  ;;  %v1418_v44 = vshrl.u32 %v1414_v36, 16 }
 0x1ba   :  { %v1296_v5 = vsel %vm1175_vm6, %v1295_v59, %v1294_v33  ;;  %v1428_v35 = vadd.s32 %v1426_v29, %v1424_v53  ;;  %v1529_v52 = vand.u32 31, %v1527_v25  ;;  %v1420_v1 = vshrl.u32 %v1415_v31, 16 }
 0x1bb   :  { %v1299_v62 = vsel %vm3717_vm5, %v3390_v45, %v1296_v5  ;;  %v1442_v54 = vshrl.u32 %v1437_v42, 16  ;;  %v3815_v56 = vadd.s32 %v1445_v63, %v1441_v49  ;;  %v1451_v9 = vadd.s32 %v1450_v32, %v1440_v2 }
 0x1bc   :  { %v1301_v41 = vmul.f32 %v1299_v62, %v1299_v62  ;;  %v1429_v15 = vadd.s32 %v1428_v35, %v1418_v44  ;;  %v3817_v40 = vsub.s32 32, %v1529_v52  ;;  %v3819_v11 = vshrl.u32 %v1527_v25, 5 }
 0x1bd   :  { %v1452_v12 = vadd.s32 %v1451_v9, %v1442_v54  ;;  %v1532_v24 = vshll.u32 %v2748_v58, %v1529_v52  ;;  %v1535_v22 = vshll.u32 %v2749_v60, %v1529_v52  ;;  %v1538_v42 = vshll.u32 %v2750_v0, %v1529_v52 }
 0x1be   :  { %v1302_v37 = vmul.f32 -0.001358992, %v1301_v41  ;;  %v1309_v18 = vmul.f32 -0.00019511016, %v1301_v41  ;;  %v3823_v20 = vadd.s32 %v1429_v15, %v1420_v1  ;;  %v1533_v50 = vshrl.u32 %v2749_v60, %v3817_v40 }
 0x1bf   :  { %v1456_v31 = vadd.s32 1, %v1452_v12  ;;  %v1536_v28 = vshrl.u32 %v2750_v0, %v3817_v40  ;;  %v1539_v27 = vshrl.u32 %v2751_v4, %v3817_v40  ;;  %v1453_v59 = vmul.u32 %v3722_v16, %v3799_v46 }
 0x1c0   :  { %v1303_v36 = vadd.f32 0.041655596, %v1302_v37  ;;  %v1310_v33 = vadd.f32 0.008332121, %v1309_v18  ;;  %vm1455_vm5 = vc.u32 %v3823_v20, %v3815_v56  ;;  %v3836_v6 = vor.u32 %v1533_v50, %v1532_v24 }
 0x1c1   :  { %v1457_v21 = vsel %vm1455_vm5, %v1456_v31, %v1452_v12  ;;  %v3838_v38 = vor.u32 %v1536_v28, %v1535_v22  ;;  %vm1547_vm6 = vcmp.lt.s32.totalorder %v3819_v11, 1  ;;  %v1541_v53 = vshll.u32 %v2751_v4, %v1529_v52 }
 0x1c2   :  { %v1304_v49 = vmul.f32 %v1303_v36, %v1301_v41  ;;  %v1311_v63 = vmul.f32 %v1310_v33, %v1301_v41  ;;  %v1458_v5 = vadd.s32 %v1457_v21, %v1453_v59  ;;  %v1540_v51 = vor.u32 %v1539_v27, %v1538_v42 }
 0x1c3   :  { %v1542_v29 = vshrl.u32 %v2752_v7, %v3817_v40  ;;  %v1544_v16 = vshll.u32 %v2752_v7, %v1529_v52  ;;  %v1545_v46 = vshrl.u32 %v2753_v10, %v3817_v40  ;;  %vm1550_vm8 = vcmp.lt.s32.totalorder %v3819_v11, 4 }
 0x1c4   :  { %v1305_v39 = vadd.f32 -0.4999988, %v1304_v49  ;;  %v1312_v25 = vadd.f32 -0.16666654, %v1311_v63  ;;  %v1459_v44 = vadd.s32 536870912, %v1458_v5  ;;  %v1318_v35 = vand.u32 3, %v3792_v57 }
 0x1c5   :  { %v1543_v1 = vor.u32 %v1542_v29, %v1541_v53  ;;  %v1546_v54 = vor.u32 %v1545_v46, %v1544_v16  ;;  %v3851_v9 = vshll.u32 %v1523_v48, 8  ;;  %vm1549_vm9 = vcmp.lt.s32.totalorder %v3819_v11, 3 }
 0x1c6   :  { %v1306_v2 = vmul.f32 %v1305_v39, %v1301_v41  ;;  %v1313_v32 = vmul.f32 %v1312_v25, %v1301_v41  ;;  %v3853_v15 = vshrl.u32 %v1459_v44, 30  ;;  %vm1548_vm11 = vcmp.lt.s32.totalorder %v3819_v11, 2 }
 0x1c7   :  { %v1555_v41 = vsel %vm1547_vm6, %v3836_v6, %v3838_v38  ;;  %v1556_v57 = vsel %vm1550_vm8, %v1543_v1, 920167782  ;;  %v1560_v8 = vsel %vm1550_vm8, %v1546_v54, 1326507024  ;;  %v1559_v24 = vsel %vm1547_vm6, %v3838_v38, %v1540_v51 }
 0x1c8   :  { %v1307_v37 = vadd.f32 1.0, %v1306_v2  ;;  %v1314_v18 = vadd.f32 1.0, %v1313_v32  ;;  %v1461_v12 = vshll.u32 %v3853_v15, 30  ;;  %vm1316_vm10 = vweird.f32 %v3390_v45 }
 0x1c9   :  { %v1557_v22 = vsel %vm1549_vm9, %v1540_v51, %v1556_v57  ;;  %v1561_v36 = vsel %vm1549_vm9, %v1543_v1, %v1560_v8  ;;  %vm1319_vm12 = vcmp.lt.s32.totalorder %v1318_v35, 2  ;;  %vm1320_vm0 = vcmp.eq.s32.totalorder %v1318_v35, 0 }
 0x1ca   :  { %v1315_v48 = vmul.f32 %v1314_v18, %v1299_v62  ;;  %v1324_v52 = vxor.u32 2147483648, %v1307_v37  ;;  %v1462_v42 = vsub.s32 %v1458_v5, %v1461_v12  ;;  %vm1323_vm13 = vcmp.eq.s32.totalorder %v1318_v35, 2 }
 0x1cb   :  { %v1558_v62 = vsel %vm1548_vm11, %v1555_v41, %v1557_v22  ;;  %v1562_v31 = vsel %vm1548_vm11, %v1559_v24, %v1561_v36  ;;  %v1564_v50 = vand.u32 65535, %v3851_v9  ;;  %v1565_v59 = vshrl.u32 %v3851_v9, 16 }
 0x1cc   :  { %v1321_v33 = vxor.u32 2147483648, %v1315_v48  ;;  %v1325_v27 = vsel %vm1323_vm13, %v1324_v52, %v1315_v48  ;;  %vm1463_vm14 = vcmp.lt.s32.totalorder %v1462_v42, 0  ;;  %v1464_v49 = vsub.s32 0, %v1462_v42 }
 0x1cd   :  { %v1566_v21 = vand.u32 65535, %v1562_v31  ;;  %v1567_v39 = vshrl.u32 %v1562_v31, 16  ;;  %v1346_v5 = vmul.f32 %v2787_v23, %v3571_v34  ;;  %v1589_v29 = vshrl.u32 %v1558_v62, 16 }
 0x1ce   :  { %v1322_v28 = vsel %vm1320_vm0, %v1307_v37, %v1321_v33  ;;  %v1465_v53 = vsel %vm1463_vm14, %v1464_v49, %v1462_v42  ;;  %v1588_v32 = vand.u32 65535, %v1558_v62  ;;  %v1347_v44 = vmul.f32 %v2787_v23, %v3576_v17 }
 0x1cf   :  { %v1326_v63 = vsel %vm1319_vm12, %v1322_v28, %v1325_v27  ;;  %v1466_v16 = vclz %v1465_v53  ;;  %v1569_v46 = vmul.u32 %v1567_v39, %v1564_v50  ;;  %v1570_v2 = vmul.u32 %v1566_v21, %v1565_v59 }
 0x1d0   :  { %v1327_v25 = vsel %vm1316_vm10, nan, %v1326_v63  ;;  %v3887_v35 = vadd.f32 %v1346_v5, %v2911_v13  ;;  %v1531_v45 = vshrl.u32 %v2748_v58, %v3817_v40  ;;  %v1454_v1 = vadd.s32 %v3815_v56, %v3823_v20 }
 0x1d1   :  { %2607 = vst [vmem:[#allocation2 + $0x38] sm:$0xff] %v1327_v25  ;;  %v2675_v54 = vadd.s32 4294967294, %v1466_v16  ;;  %v1568_v37 = vmul.u32 %v1566_v21, %v1564_v50  ;;  %v1572_v18 = vshll.u32 %v1569_v46, 16  ;;  %v1552_v41 = vsel %vm1550_vm8, %v1540_v51, 2102212464 }
 0x1d2   :  { %2615 = vst [vmem:[#allocation2 + $0xb8] sm:$0xff] %v1327_v25  ;;  %v1571_v57 = vmul.u32 %v1567_v39, %v1565_v59  ;;  %v1574_v8 = vshll.u32 %v1570_v2, 16  ;;  %v1591_v48 = vmul.u32 %v1589_v29, %v1564_v50  ;;  %v1590_v52 = vmul.u32 %v1588_v32, %v1564_v50 }
 0x1d3   :  { %vm2676_vm15 = vcmp.lt.s32.totalorder %v2675_v54, 0  ;;  %vm1576_vm2 = vc.u32 %v1568_v37, %v1572_v18  ;;  %v1578_v23 = vadd.s32 %v1572_v18, %v1568_v37  ;;  %v1592_v24 = vmul.u32 %v1588_v32, %v1565_v59 }
 0x1d4   :  { %v1469_v12 = vsel %vm2676_vm15, 0, %v2675_v54  ;;  %v1577_v40 = vsel %vm1576_vm2, 1, %v2746_v3  ;;  %v1594_v22 = vshll.u32 %v1591_v48, 16  ;;  %v1573_v20 = vshrl.u32 %v1569_v46, 16 }
 0x1d5   :  { %v1470_v36 = vsub.s32 32, %v1469_v12  ;;  %v1474_v56 = vsub.s32 4294967266, %v1469_v12  ;;  %v1579_v33 = vadd.s32 %v1577_v40, %v1571_v57  ;;  %v1471_v62 = vshll.u32 %v1462_v42, %v1469_v12 }
 0x1d6   :  { %vm1580_vm1 = vc.u32 %v1578_v23, %v1574_v8  ;;  %v1593_v31 = vmul.u32 %v1589_v29, %v1565_v59  ;;  %vm1598_vm3 = vc.u32 %v1590_v52, %v1594_v22  ;;  %v1596_v63 = vshll.u32 %v1592_v24, 16 }
 0x1d7   :  { %v1472_v51 = vshrl.u32 %v1454_v1, %v1470_v36  ;;  %v1475_v28 = vadd.s32 127, %v1474_v56  ;;  %v1581_v27 = vsel %vm1580_vm1, 1, %v2746_v3  ;;  %v1599_v49 = vsel %vm1598_vm3, 1, %v2746_v3 }
 0x1d8   :  { %v1583_v50 = vadd.s32 %v1581_v27, %v1579_v33  ;;  %v1600_v21 = vadd.s32 %v1594_v22, %v1590_v52  ;;  %v1601_v39 = vadd.s32 %v1599_v49, %v1593_v31  ;;  %vm1362_vm4 = vcmp.lt.s32.totalorder %v3678_v14, 0 }
 0x1d9   :  { %v1473_v25 = vor.u32 %v1472_v51, %v1471_v62  ;;  %v1476_v5 = vshll.u32 %v1475_v28, 23  ;;  %v1484_v53 = vsub.s32 4, %v3853_v15  ;;  %v1551_v42 = vsel %vm1547_vm6, %v1531_v45, %v3836_v6 }
 0x1da   :  { %v1584_v59 = vadd.s32 %v1583_v50, %v1573_v20  ;;  %vm1602_vm7 = vc.u32 %v1600_v21, %v1596_v63  ;;  %v1673_v29 = vand.u32 2139095040, %v3887_v35  ;;  %v1553_v46 = vsel %vm1549_vm9, %v3838_v38, %v1552_v41 }
 0x1db   :  { %v1477_v16 = vor.u32 4788187, %v1476_v5  ;;  %v1575_v32 = vshrl.u32 %v1570_v2, 16  ;;  %v1603_v1 = vsel %vm1602_vm7, 1, %v2746_v3  ;;  %v1595_v54 = vshrl.u32 %v1591_v48, 16 }
 0x1dc   :  { %v1605_v37 = vadd.s32 %v1603_v1, %v1601_v39  ;;  %v1670_v18 = vand.u32 2147483647, %v3887_v35  ;;  %v1674_v57 = vshrl.u32 %v1673_v29, 23  ;;  %v1480_v23 = vcvt.s32.f32 %v1473_v25 }
 0x1dd   :  { %v1478_v8 = vand.u32 2147483647, %v1477_v16  ;;  %v1485_v6 = vsel %vm1362_vm4, %v1484_v53, %v3853_v15  ;;  %v1585_v45 = vadd.s32 %v1584_v59, %v1575_v32  ;;  %v3913_v52 = vadd.f32 %v1347_v44, %v2911_v13 }
 0x1de   :  { %v1597_v12 = vshrl.u32 %v1592_v24, 16  ;;  %v1606_v38 = vadd.s32 %v1605_v37, %v1595_v54  ;;  %v2680_v2 = vadd.s32 4294967169, %v1674_v57  ;;  %vm3917_vm5 = vcmp.le.f32.partialorder %v1360_v43, 0.7853982 }
 0x1df   :  { %v1481_v48 = vmul.f32 %v1480_v23, %v1478_v8  ;;  %v1554_v40 = vsel %vm1548_vm11, %v1551_v42, %v1553_v46  ;;  %v1604_v22 = vadd.s32 %v1600_v21, %v1596_v63  ;;  %v1487_v15 = vsel %vm3917_vm5, 0, %v1485_v6 }
 0x1e0   :  { %v1607_v36 = vadd.s32 %v1606_v38, %v1597_v12  ;;  %v1677_v13 = vand.u32 8388607, %v1670_v18  ;;  %v1680_v44 = vadd.s32 1, %v2680_v2  ;;  %v1608_v43 = vmul.u32 %v3851_v9, %v1554_v40 }
 0x1e1   :  { %v1482_v24 = vxor.u32 2147483648, %v1481_v48  ;;  %vm1610_vm6 = vc.u32 %v1585_v45, %v1604_v22  ;;  %v1504_v11 = vadd.s32 3, %v1487_v15  ;;  %v1825_v62 = vand.u32 2147483647, %v3913_v52 }
 0x1e2   :  { %v1611_v56 = vadd.s32 1, %v1607_v36  ;;  %vm1681_vm8 = vcmp.gt.s32.totalorder %v1680_v44, 0  ;;  %v1678_v28 = vor.u32 8388608, %v1677_v13  ;;  %v3936_v9 = vmul.f32 %v3328_v55, %v3571_v34 }
 0x1e3   :  { %v1483_v20 = vsel %vm1362_vm4, %v1482_v24, %v1481_v48  ;;  %v1682_v33 = vsel %vm1681_vm8, %v1680_v44, 0  ;;  %v3940_v25 = vand.u32 3, %v1504_v11  ;;  %v3942_v53 = vadd.s32 %v1604_v22, %v1585_v45 }
 0x1e4   :  { %v1486_v31 = vsel %vm3917_vm5, %v3678_v14, %v1483_v20  ;;  %v1612_v51 = vsel %vm1610_vm6, %v1611_v56, %v1607_v36  ;;  %v1684_v27 = vand.u32 31, %v1682_v33  ;;  %v3944_v42 = vshll.u32 %v1678_v28, 8 }
 0x1e5   :  { %v1488_v49 = vmul.f32 %v1486_v31, %v1486_v31  ;;  %v1613_v50 = vadd.s32 %v1612_v51, %v1608_v43  ;;  %v1828_v59 = vand.u32 2139095040, %v3913_v52  ;;  %v3949_v29 = vand.u32 8388607, %v1825_v62 }
 0x1e6   :  { %v3938_v63 = vsub.s32 32, %v1684_v27  ;;  %v3955_v54 = vshrl.u32 %v1682_v33, 5  ;;  %v1687_v12 = vshll.u32 %v2748_v58, %v1684_v27  ;;  %v1690_v38 = vshll.u32 %v2749_v60, %v1684_v27 }
 0x1e7   :  { %v1489_v21 = vmul.f32 -0.001358992, %v1488_v49  ;;  %v1496_v39 = vmul.f32 -0.00019511016, %v1488_v49  ;;  %v1614_v5 = vadd.s32 536870912, %v1613_v50  ;;  %v1693_v2 = vshll.u32 %v2750_v0, %v1684_v27 }
 0x1e8   :  { %v1688_v1 = vshrl.u32 %v2749_v60, %v3938_v63  ;;  %v1691_v37 = vshrl.u32 %v2750_v0, %v3938_v63  ;;  %v1694_v57 = vshrl.u32 %v2751_v4, %v3938_v63  ;;  %v1697_v8 = vshrl.u32 %v2752_v7, %v3938_v63 }
 0x1e9   :  { %v1490_v16 = vadd.f32 0.041655596, %v1489_v21  ;;  %v1497_v46 = vadd.f32 0.008332121, %v1496_v39  ;;  %v3951_v32 = vshrl.u32 %v1614_v5, 30  ;;  %v1696_v41 = vshll.u32 %v2751_v4, %v1684_v27 }
 0x1ea   :  { %v1700_v48 = vshrl.u32 %v2753_v10, %v3938_v63  ;;  %vm1510_vm9 = vcmp.eq.s32.totalorder %v3940_v25, 2  ;;  %v1689_v36 = vor.u32 %v1688_v1, %v1687_v12  ;;  %vm1507_vm11 = vcmp.eq.s32.totalorder %v3940_v25, 0 }
 0x1eb   :  { %v1491_v23 = vmul.f32 %v1490_v16, %v1488_v49  ;;  %v1498_v6 = vmul.f32 %v1497_v46, %v1488_v49  ;;  %v1616_v45 = vshll.u32 %v3951_v32, 30  ;;  %v3974_v13 = vor.u32 %v1691_v37, %v1690_v38 }
 0x1ec   :  { %v3976_v44 = vor.u32 %v1694_v57, %v1693_v2  ;;  %v1698_v24 = vor.u32 %v1697_v8, %v1696_v41  ;;  %v1699_v43 = vshll.u32 %v2752_v7, %v1684_v27  ;;  %vm1506_vm10 = vcmp.lt.s32.totalorder %v3940_v25, 2 }
 0x1ed   :  { %v1492_v40 = vadd.f32 -0.4999988, %v1491_v23  ;;  %v1499_v22 = vadd.f32 -0.16666654, %v1498_v6  ;;  %v3971_v15 = vsub.s32 %v1613_v50, %v1616_v45  ;;  %vm1503_vm0 = vweird.f32 %v3678_v14 }
 0x1ee   :  { %vm1517_vm13 = vcmp.lt.s32.totalorder %v3697_v61, 0  ;;  %v1701_v33 = vor.u32 %v1700_v48, %v1699_v43  ;;  %vm1702_vm14 = vcmp.lt.s32.totalorder %v3955_v54, 1  ;;  %v1719_v51 = vand.u32 65535, %v3944_v42 }
 0x1ef   :  { %v1493_v56 = vmul.f32 %v1492_v40, %v1488_v49  ;;  %v1500_v20 = vmul.f32 %v1499_v22, %v1488_v49  ;;  %vm1618_vm12 = vcmp.lt.s32.totalorder %v3971_v15, 0  ;;  %v1619_v11 = vsub.s32 0, %v3971_v15 }
 0x1f0   :  { %v1829_v28 = vshrl.u32 %v1828_v59, 23  ;;  %vm1705_vm15 = vcmp.lt.s32.totalorder %v3955_v54, 4  ;;  %vm1704_vm2 = vcmp.lt.s32.totalorder %v3955_v54, 3  ;;  %v1710_v39 = vsel %vm1702_vm14, %v1689_v36, %v3974_v13 }
 0x1f1   :  { %v1494_v50 = vadd.f32 1.0, %v1493_v56  ;;  %v1501_v27 = vadd.f32 1.0, %v1500_v20  ;;  %v1620_v49 = vsel %vm1618_vm12, %v1619_v11, %v3971_v15  ;;  %v1711_v5 = vsel %vm1705_vm15, %v1698_v24, 920167782 }
 0x1f2   :  { %v1621_v21 = vclz %v1620_v49  ;;  %v1712_v59 = vsel %vm1704_vm2, %v3976_v44, %v1711_v5  ;;  %v1720_v1 = vshrl.u32 %v3944_v42, 16  ;;  %vm1703_vm1 = vcmp.lt.s32.totalorder %v3955_v54, 2 }
 0x1f3   :  { %v1502_v16 = vmul.f32 %v1501_v27, %v1486_v31  ;;  %v1511_v46 = vxor.u32 2147483648, %v1494_v50  ;;  %v1714_v57 = vsel %vm1702_vm14, %v3974_v13, %v3976_v44  ;;  %v2683_v8 = vadd.s32 4294967169, %v1829_v28 }
 0x1f4   :  { %v2678_v37 = vadd.s32 4294967294, %v1621_v21  ;;  %v1639_v6 = vsub.s32 4, %v3951_v32  ;;  %v1713_v31 = vsel %vm1703_vm1, %v1710_v39, %v1712_v59  ;;  %v1715_v45 = vsel %vm1705_vm15, %v1701_v33, 1326507024 }
 0x1f5   :  { %v1508_v23 = vxor.u32 2147483648, %v1502_v16  ;;  %v1512_v12 = vsel %vm1510_vm9, %v1511_v46, %v1502_v16  ;;  %v1716_v38 = vsel %vm1704_vm2, %v1698_v24, %v1715_v45  ;;  %v1744_v2 = vshrl.u32 %v1713_v31, 16 }
 0x1f6   :  { %vm2679_vm3 = vcmp.lt.s32.totalorder %v2678_v37, 0  ;;  %v1717_v40 = vsel %vm1703_vm1, %v1714_v57, %v1716_v38  ;;  %v1743_v22 = vand.u32 65535, %v1713_v31  ;;  %v1686_v11 = vshrl.u32 %v2748_v58, %v3938_v63 }
 0x1f7   :  { %v1509_v41 = vsel %vm1507_vm11, %v1494_v50, %v1508_v23  ;;  %v1624_v48 = vsel %vm2679_vm3, 0, %v2678_v37  ;;  %v4025_v33 = vsel %vm1517_vm13, %v1639_v6, %v3951_v32  ;;  %v1721_v28 = vand.u32 65535, %v1717_v40 }
 0x1f8   :  { %v1513_v43 = vsel %vm1506_vm10, %v1509_v41, %v1512_v12  ;;  %v1625_v56 = vsub.s32 32, %v1624_v48  ;;  %v1629_v20 = vsub.s32 4294967266, %v1624_v48  ;;  %v1722_v50 = vshrl.u32 %v1717_v40, 16 }
 0x1f9   :  { %v1514_v24 = vsel %vm1503_vm0, nan, %v1513_v43  ;;  %v1626_v27 = vshll.u32 %v3971_v15, %v1624_v48  ;;  %v1746_v21 = vmul.u32 %v1744_v2, %v1719_v51  ;;  %v1706_v63 = vsel %vm1702_vm14, %v1686_v11, %v1689_v36 }
 0x1fa   :  { %v1627_v25 = vshrl.u32 %v3942_v53, %v1625_v56  ;;  %v1630_v49 = vadd.s32 127, %v1629_v20  ;;  %2616 = vst [vmem:[#allocation2 + $0x40] sm:$0xff] %v1514_v24  ;;  %v1724_v39 = vmul.u32 %v1722_v50, %v1719_v51  ;;  %v1725_v14 = vmul.u32 %v1721_v28, %v1720_v1 }
 0x1fb   :  { %v1747_v5 = vmul.u32 %v1743_v22, %v1720_v1  ;;  %2624 = vst [vmem:[#allocation2 + $0xc0] sm:$0xff] %v1514_v24  ;;  %vm4033_vm4 = vcmp.le.f32.partialorder %v1515_v47, 0.7853982  ;;  %v1707_v53 = vsel %vm1705_vm15, %v3976_v44, 2102212464  ;;  %v1749_v46 = vshll.u32 %v1746_v21, 16 }
 0x1fc   :  { %v1628_v16 = vor.u32 %v1627_v25, %v1626_v27  ;;  %v1631_v15 = vshll.u32 %v1630_v49, 23  ;;  %v1723_v59 = vmul.u32 %v1721_v28, %v1719_v51  ;;  %v1726_v37 = vmul.u32 %v1722_v50, %v1720_v1 }
 0x1fd   :  { %v1727_v36 = vshll.u32 %v1724_v39, 16  ;;  %v1745_v57 = vmul.u32 %v1743_v22, %v1719_v51  ;;  %v1729_v31 = vshll.u32 %v1725_v14, 16  ;;  %v1748_v45 = vmul.u32 %v1744_v2, %v1720_v1 }
 0x1fe   :  { %v1632_v23 = vor.u32 4788187, %v1631_v15  ;;  %v1635_v6 = vcvt.s32.f32 %v1628_v16  ;;  %v1751_v12 = vshll.u32 %v1747_v5, 16  ;;  %v1835_v56 = vadd.s32 1, %v2683_v8 }
 0x1ff   :  { %vm1731_vm7 = vc.u32 %v1723_v59, %v1727_v36  ;;  %v1733_v47 = vadd.s32 %v1727_v36, %v1723_v59  ;;  %vm1753_vm5 = vc.u32 %v1745_v57, %v1749_v46  ;;  %v1755_v40 = vadd.s32 %v1749_v46, %v1745_v57 }
 0x200   :  { %v1633_v38 = vand.u32 2147483647, %v1632_v23  ;;  %v1732_v41 = vsel %vm1731_vm7, 1, %v2746_v3  ;;  %v1754_v48 = vsel %vm1753_vm5, 1, %v2746_v3  ;;  %v1708_v51 = vsel %vm1704_vm2, %v3974_v13, %v1707_v53 }
 0x201   :  { %v1734_v44 = vadd.s32 %v1732_v41, %v1726_v37  ;;  %vm1735_vm6 = vc.u32 %v1733_v47, %v1729_v31  ;;  %v1756_v43 = vadd.s32 %v1754_v48, %v1748_v45  ;;  %vm1757_vm8 = vc.u32 %v1755_v40, %v1751_v12 }
 0x202   :  { %v1636_v20 = vmul.f32 %v1635_v6, %v1633_v38  ;;  %v1736_v1 = vsel %vm1735_vm6, 1, %v2746_v3  ;;  %v1728_v2 = vshrl.u32 %v1724_v39, 16  ;;  %v1758_v11 = vsel %vm1757_vm8, 1, %v2746_v3 }
 0x203   :  { %v1738_v22 = vadd.s32 %v1736_v1, %v1734_v44  ;;  %vm1836_vm9 = vcmp.gt.s32.totalorder %v1835_v56, 0  ;;  %v1750_v28 = vshrl.u32 %v1746_v21, 16  ;;  %v1760_v50 = vadd.s32 %v1758_v11, %v1756_v43 }
 0x204   :  { %v1637_v24 = vxor.u32 2147483648, %v1636_v20  ;;  %v1837_v27 = vsel %vm1836_vm9, %v1835_v56, 0  ;;  %v1642_v8 = vsel %vm4033_vm4, 0, %v4025_v33  ;;  %v1730_v25 = vshrl.u32 %v1725_v14, 16 }
 0x205   :  { %v1739_v49 = vadd.s32 %v1738_v22, %v1728_v2  ;;  %v1839_v16 = vand.u32 31, %v1837_v27  ;;  %v1709_v39 = vsel %vm1703_vm1, %v1706_v63, %v1708_v51  ;;  %v1752_v15 = vshrl.u32 %v1747_v5, 16 }
 0x206   :  { %v1638_v13 = vsel %vm1517_vm13, %v1637_v24, %v1636_v20  ;;  %v1761_v53 = vadd.s32 %v1760_v50, %v1750_v28  ;;  %v4059_v59 = vadd.s32 %v1755_v40, %v1751_v12  ;;  %v4065_v14 = vmul.f32 %v3328_v55, %v3576_v17 }
 0x207   :  { %v1641_v21 = vsel %vm4033_vm4, %v3697_v61, %v1638_v13  ;;  %v4057_v46 = vadd.s32 %v1739_v49, %v1730_v25  ;;  %v4061_v33 = vsub.s32 32, %v1839_v16  ;;  %v1833_v54 = vor.u32 8388608, %v3949_v29 }
 0x208   :  { %v1643_v37 = vmul.f32 %v1641_v21, %v1641_v21  ;;  %v1762_v36 = vadd.s32 %v1761_v53, %v1752_v15  ;;  %v1659_v63 = vadd.s32 3, %v1642_v8  ;;  %v1763_v5 = vmul.u32 %v3944_v42, %v1709_v39 }
 0x209   :  { %vm1765_vm11 = vc.u32 %v4057_v46, %v4059_v59  ;;  %v4071_v32 = vshrl.u32 %v1837_v27, 5  ;;  %v1843_v31 = vshrl.u32 %v2749_v60, %v4061_v33  ;;  %v1846_v55 = vshrl.u32 %v2750_v0, %v4061_v33 }
 0x20a   :  { %v1644_v57 = vmul.f32 -0.001358992, %v1643_v37  ;;  %v1651_v23 = vmul.f32 -0.00019511016, %v1643_v37  ;;  %v1766_v6 = vadd.s32 1, %v1762_v36  ;;  %v1849_v29 = vshrl.u32 %v2751_v4, %v4061_v33 }
 0x20b   :  { %v1851_v45 = vshll.u32 %v2751_v4, %v1839_v16  ;;  %v1852_v42 = vshrl.u32 %v2752_v7, %v4061_v33  ;;  %v1842_v41 = vshll.u32 %v2748_v58, %v1839_v16  ;;  %v1845_v40 = vshll.u32 %v2749_v60, %v1839_v16 }
 0x20c   :  { %v1645_v47 = vadd.f32 0.041655596, %v1644_v57  ;;  %v1652_v12 = vadd.f32 0.008332121, %v1651_v23  ;;  %v1767_v38 = vsel %vm1765_vm11, %v1766_v6, %v1762_v36  ;;  %v1848_v44 = vshll.u32 %v2750_v0, %v1839_v16 }
 0x20d   :  { %v1768_v48 = vadd.s32 %v1767_v38, %v1763_v5  ;;  %v1853_v43 = vor.u32 %v1852_v42, %v1851_v45  ;;  %v1854_v51 = vshll.u32 %v2752_v7, %v1839_v16  ;;  %v1855_v1 = vshrl.u32 %v2753_v10, %v4061_v33 }
 0x20e   :  { %v1646_v56 = vmul.f32 %v1645_v47, %v1643_v37  ;;  %v1653_v20 = vmul.f32 %v1652_v12, %v1643_v37  ;;  %v4088_v22 = vor.u32 %v1843_v31, %v1842_v41  ;;  %v4090_v11 = vor.u32 %v1846_v55, %v1845_v40 }
 0x20f   :  { %v1769_v2 = vadd.s32 536870912, %v1768_v48  ;;  %v4092_v24 = vor.u32 %v1849_v29, %v1848_v44  ;;  %v1856_v27 = vor.u32 %v1855_v1, %v1854_v51  ;;  %vm1860_vm10 = vcmp.lt.s32.totalorder %v4071_v32, 4 }
 0x210   :  { %v1647_v28 = vadd.f32 -0.4999988, %v1646_v56  ;;  %v1654_v50 = vadd.f32 -0.16666654, %v1653_v20  ;;  %v4097_v8 = vadd.f32 %v3936_v9, %v3095_v30  ;;  %v1660_v25 = vand.u32 3, %v1659_v63 }
 0x211   :  { %v4099_v49 = vshrl.u32 %v1769_v2, 30  ;;  %v1866_v16 = vsel %vm1860_vm10, %v1853_v43, 920167782  ;;  %vm1857_vm12 = vcmp.lt.s32.totalorder %v4071_v32, 1  ;;  %vm1859_vm0 = vcmp.lt.s32.totalorder %v4071_v32, 3 }
 0x212   :  { %v1648_v13 = vmul.f32 %v1647_v28, %v1643_v37  ;;  %v1655_v39 = vmul.f32 %v1654_v50, %v1643_v37  ;;  %v1865_v9 = vsel %vm1857_vm12, %v4088_v22, %v4090_v11  ;;  %v1867_v53 = vsel %vm1859_vm0, %v4092_v24, %v1866_v16 }
 0x213   :  { %v1771_v15 = vshll.u32 %v4099_v49, 30  ;;  %v4113_v36 = vshll.u32 %v1833_v54, 8  ;;  %v1869_v37 = vsel %vm1857_vm12, %v4090_v11, %v4092_v24  ;;  %v1870_v57 = vsel %vm1860_vm10, %v1856_v27, 1326507024 }
 0x214   :  { %v1649_v63 = vadd.f32 1.0, %v1648_v13  ;;  %v1656_v5 = vadd.f32 1.0, %v1655_v39  ;;  %vm1661_vm13 = vcmp.lt.s32.totalorder %v1660_v25, 2  ;;  %vm1858_vm14 = vcmp.lt.s32.totalorder %v4071_v32, 2 }
 0x215   :  { %v4121_v23 = vsub.s32 %v1768_v48, %v1771_v15  ;;  %v1871_v6 = vsel %vm1859_vm0, %v1853_v43, %v1870_v57  ;;  %v1868_v55 = vsel %vm1858_vm14, %v1865_v9, %v1867_v53  ;;  %vm1665_vm15 = vcmp.eq.s32.totalorder %v1660_v25, 2 }
 0x216   :  { %v1657_v54 = vmul.f32 %v1656_v5, %v1641_v21  ;;  %v1666_v31 = vxor.u32 2147483648, %v1649_v63  ;;  %v1872_v29 = vsel %vm1858_vm14, %v1869_v37, %v1871_v6  ;;  %v1874_v12 = vand.u32 65535, %v4113_v36 }
 0x217   :  { %vm1773_vm2 = vcmp.lt.s32.totalorder %v4121_v23, 0  ;;  %v1774_v45 = vsub.s32 0, %v4121_v23  ;;  %v1876_v42 = vand.u32 65535, %v1872_v29  ;;  %v1875_v38 = vshrl.u32 %v4113_v36, 16 }
 0x218   :  { %v1663_v47 = vxor.u32 2147483648, %v1657_v54  ;;  %v1877_v41 = vshrl.u32 %v1872_v29, 16  ;;  %vm1662_vm1 = vcmp.eq.s32.totalorder %v1660_v25, 0  ;;  %v1667_v21 = vsel %vm1665_vm15, %v1666_v31, %v1657_v54 }
 0x219   :  { %v1775_v48 = vsel %vm1773_vm2, %v1774_v45, %v4121_v23  ;;  %v1899_v40 = vshrl.u32 %v1868_v55, 16  ;;  %v1880_v20 = vmul.u32 %v1876_v42, %v1875_v38  ;;  %v4137_v51 = vadd.f32 %v4065_v14, %v3095_v30 }
 0x21a   :  { %v1664_v44 = vsel %vm1662_vm1, %v1649_v63, %v1663_v47  ;;  %v1776_v43 = vclz %v1775_v48  ;;  %v1879_v56 = vmul.u32 %v1877_v41, %v1874_v12  ;;  %vm1658_vm3 = vweird.f32 %v3697_v61 }
 0x21b   :  { %v1668_v1 = vsel %vm1661_vm13, %v1664_v44, %v1667_v21  ;;  %v1898_v2 = vand.u32 65535, %v1868_v55  ;;  %v1878_v27 = vmul.u32 %v1876_v42, %v1874_v12  ;;  %v1764_v13 = vadd.s32 %v4059_v59, %v4057_v46 }
 0x21c   :  { %v1669_v28 = vsel %vm1658_vm3, nan, %v1668_v1  ;;  %v2681_v50 = vadd.s32 4294967294, %v1776_v43  ;;  %v1882_v16 = vshll.u32 %v1879_v56, 16  ;;  %v1881_v39 = vmul.u32 %v1877_v41, %v1875_v38 }
 0x21d   :  { %v1901_v15 = vmul.u32 %v1899_v40, %v1874_v12  ;;  %v1980_v9 = vand.u32 2147483647, %v4097_v8  ;;  %2617 = vst [vmem:[#allocation2 + $0x48] sm:$0xff] %v1669_v28  ;;  %v1884_v30 = vshll.u32 %v1880_v20, 16  ;;  %v1902_v53 = vmul.u32 %v1898_v2, %v1875_v38 }
 0x21e   :  { %vm2682_vm4 = vcmp.lt.s32.totalorder %v2681_v50, 0  ;;  %vm1886_vm7 = vc.u32 %v1878_v27, %v1882_v16  ;;  %v1888_v14 = vadd.s32 %v1882_v16, %v1878_v27  ;;  %2625 = vst [vmem:[#allocation2 + $0xc8] sm:$0xff] %v1669_v28  ;;  %vm1672_vm5 = vcmp.lt.s32.totalorder %v3887_v35, 0 }
 0x21f   :  { %v1779_v61 = vsel %vm2682_vm4, 0, %v2681_v50  ;;  %v1887_v25 = vsel %vm1886_vm7, 1, %v2746_v3  ;;  %v1904_v63 = vshll.u32 %v1901_v15, 16  ;;  %v1900_v59 = vmul.u32 %v1898_v2, %v1874_v12 }
 0x220   :  { %v1780_v5 = vsub.s32 32, %v1779_v61  ;;  %v1784_v37 = vsub.s32 4294967266, %v1779_v61  ;;  %v1889_v46 = vadd.s32 %v1887_v25, %v1881_v39  ;;  %v1781_v57 = vshll.u32 %v4121_v23, %v1779_v61 }
 0x221   :  { %v1883_v6 = vshrl.u32 %v1879_v56, 16  ;;  %vm1890_vm6 = vc.u32 %v1888_v14, %v1884_v30  ;;  %v1903_v54 = vmul.u32 %v1899_v40, %v1875_v38  ;;  %vm1908_vm8 = vc.u32 %v1900_v59, %v1904_v63 }
 0x222   :  { %v1782_v31 = vshrl.u32 %v1764_v13, %v1780_v5  ;;  %v1785_v55 = vadd.s32 127, %v1784_v37  ;;  %v1891_v29 = vsel %vm1890_vm6, 1, %v2746_v3  ;;  %v1906_v42 = vshll.u32 %v1902_v53, 16 }
 0x223   :  { %v1893_v45 = vadd.s32 %v1891_v29, %v1889_v46  ;;  %v1909_v47 = vsel %vm1908_vm8, 1, %v2746_v3  ;;  %v1910_v41 = vadd.s32 %v1904_v63, %v1900_v59  ;;  %v1862_v12 = vsel %vm1860_vm10, %v4092_v24, 2102212464 }
 0x224   :  { %v1783_v21 = vor.u32 %v1782_v31, %v1781_v57  ;;  %v1786_v48 = vshll.u32 %v1785_v55, 23  ;;  %v1911_v23 = vadd.s32 %v1909_v47, %v1903_v54  ;;  %v1794_v44 = vsub.s32 4, %v4099_v49 }
 0x225   :  { %v1841_v38 = vshrl.u32 %v2748_v58, %v4061_v33  ;;  %v1894_v40 = vadd.s32 %v1893_v45, %v1883_v6  ;;  %vm1912_vm9 = vc.u32 %v1910_v41, %v1906_v42  ;;  %v1885_v56 = vshrl.u32 %v1880_v20, 16 }
 0x226   :  { %v1787_v43 = vor.u32 4788187, %v1786_v48  ;;  %v1913_v1 = vsel %vm1912_vm9, 1, %v2746_v3  ;;  %v1983_v2 = vand.u32 2139095040, %v4097_v8  ;;  %v1863_v24 = vsel %vm1859_vm0, %v4090_v11, %v1862_v12 }
 0x227   :  { %v1861_v28 = vsel %vm1857_vm12, %v1841_v38, %v4088_v22  ;;  %v1905_v50 = vshrl.u32 %v1901_v15, 16  ;;  %v1915_v27 = vadd.s32 %v1913_v1, %v1911_v23  ;;  %v1790_v33 = vcvt.s32.f32 %v1783_v21 }
 0x228   :  { %v1788_v16 = vand.u32 2147483647, %v1787_v43  ;;  %v1895_v13 = vadd.s32 %v1894_v40, %v1885_v56  ;;  %v1984_v39 = vshrl.u32 %v1983_v2, 23  ;;  %v1795_v20 = vsel %vm1672_vm5, %v1794_v44, %v4099_v49 }
 0x229   :  { %v1907_v30 = vshrl.u32 %v1902_v53, 16  ;;  %v1916_v14 = vadd.s32 %v1915_v27, %v1905_v50  ;;  %v1987_v61 = vand.u32 8388607, %v1980_v9  ;;  %v1914_v25 = vadd.s32 %v1910_v41, %v1906_v42 }
 0x22a   :  { %v1791_v22 = vmul.f32 %v1790_v33, %v1788_v16  ;;  %v2686_v63 = vadd.s32 4294967169, %v1984_v39  ;;  %vm1671_vm11 = vcmp.le.f32.partialorder %v1670_v18, 0.7853982  ;;  %v1864_v11 = vsel %vm1858_vm14, %v1861_v28, %v1863_v24 }
 0x22b   :  { %v1917_v15 = vadd.s32 %v1916_v14, %v1907_v30  ;;  %v1797_v37 = vsel %vm1671_vm11, 0, %v1795_v20  ;;  %vm1920_vm10 = vc.u32 %v1895_v13, %v1914_v25  ;;  %v1988_v53 = vor.u32 8388608, %v1987_v61 }
 0x22c   :  { %v1792_v5 = vxor.u32 2147483648, %v1791_v22  ;;  %v1990_v46 = vadd.s32 1, %v2686_v63  ;;  %v2138_v59 = vand.u32 2139095040, %v4137_v51  ;;  %v1918_v6 = vmul.u32 %v4113_v36, %v1864_v11 }
 0x22d   :  { %v1921_v49 = vadd.s32 1, %v1917_v15  ;;  %v1814_v54 = vadd.s32 3, %v1797_v37  ;;  %v4177_v42 = vshll.u32 %v1988_v53, 8  ;;  %v4181_v23 = vmul.f32 %v2877_v19, %v3571_v34 }
 0x22e   :  { %v1793_v57 = vsel %vm1672_vm5, %v1792_v5, %v1791_v22  ;;  %vm1991_vm12 = vcmp.gt.s32.totalorder %v1990_v46, 0  ;;  %v2139_v47 = vshrl.u32 %v2138_v59, 23  ;;  %v2135_v44 = vand.u32 2147483647, %v4137_v51 }
 0x22f   :  { %v1796_v18 = vsel %vm1671_vm11, %v3887_v35, %v1793_v57  ;;  %v1922_v32 = vsel %vm1920_vm10, %v1921_v49, %v1917_v15  ;;  %v1992_v31 = vsel %vm1991_vm12, %v1990_v46, 0  ;;  %v4183_v36 = vand.u32 3, %v1814_v54 }
 0x230   :  { %v1798_v55 = vmul.f32 %v1796_v18, %v1796_v18  ;;  %v1923_v29 = vadd.s32 %v1922_v32, %v1918_v6  ;;  %v1994_v45 = vand.u32 31, %v1992_v31  ;;  %v4186_v43 = vadd.s32 %v1914_v25, %v1895_v13 }
 0x231   :  { %v4190_v1 = vshrl.u32 %v1992_v31, 5  ;;  %v4194_v28 = vand.u32 65535, %v4177_v42  ;;  %v4196_v24 = vadd.s32 4294967169, %v2139_v47  ;;  %vm1820_vm0 = vcmp.eq.s32.totalorder %v4183_v36, 2 }
 0x232   :  { %v1799_v41 = vmul.f32 -0.001358992, %v1798_v55  ;;  %v1806_v21 = vmul.f32 -0.00019511016, %v1798_v55  ;;  %v1924_v48 = vadd.s32 536870912, %v1923_v29  ;;  %v1995_v12 = vsub.s32 32, %v1994_v45 }
 0x233   :  { %v1997_v16 = vshll.u32 %v2748_v58, %v1994_v45  ;;  %v2003_v39 = vshll.u32 %v2750_v0, %v1994_v45  ;;  %v2000_v22 = vshll.u32 %v2749_v60, %v1994_v45  ;;  %vm1817_vm13 = vcmp.eq.s32.totalorder %v4183_v36, 0 }
 0x234   :  { %v1800_v38 = vadd.f32 0.041655596, %v1799_v41  ;;  %v1807_v40 = vadd.f32 0.008332121, %v1806_v21  ;;  %v4188_v56 = vshrl.u32 %v1924_v48, 30  ;;  %v2004_v2 = vshrl.u32 %v2751_v4, %v1995_v12 }
 0x235   :  { %v1998_v33 = vshrl.u32 %v2749_v60, %v1995_v12  ;;  %v2001_v13 = vshrl.u32 %v2750_v0, %v1995_v12  ;;  %v2007_v20 = vshrl.u32 %v2752_v7, %v1995_v12  ;;  %v1996_v25 = vshrl.u32 %v2748_v58, %v1995_v12 }
 0x236   :  { %v1801_v34 = vmul.f32 %v1800_v38, %v1798_v55  ;;  %v1808_v50 = vmul.f32 %v1807_v40, %v1798_v55  ;;  %v1926_v27 = vshll.u32 %v4188_v56, 30  ;;  %v2005_v63 = vor.u32 %v2004_v2, %v2003_v39 }
 0x237   :  { %v2006_v11 = vshll.u32 %v2751_v4, %v1994_v45  ;;  %v2010_v15 = vshrl.u32 %v2753_v10, %v1995_v12  ;;  %vm1816_vm14 = vcmp.lt.s32.totalorder %v4183_v36, 2  ;;  %vm1813_vm2 = vweird.f32 %v3887_v35 }
 0x238   :  { %v1802_v30 = vadd.f32 -0.4999988, %v1801_v34  ;;  %v1809_v14 = vadd.f32 -0.16666654, %v1808_v50  ;;  %v4205_v61 = vsub.s32 %v1923_v29, %v1926_v27  ;;  %v1999_v49 = vor.u32 %v1998_v33, %v1997_v16 }
 0x239   :  { %v2002_v53 = vor.u32 %v2001_v13, %v2000_v22  ;;  %v2008_v59 = vor.u32 %v2007_v20, %v2006_v11  ;;  %v2009_v57 = vshll.u32 %v2752_v7, %v1994_v45  ;;  %vm2015_vm1 = vcmp.lt.s32.totalorder %v4190_v1, 4 }
 0x23a   :  { %v1803_v5 = vmul.f32 %v1802_v30, %v1798_v55  ;;  %v1810_v37 = vmul.f32 %v1809_v14, %v1798_v55  ;;  %vm1928_vm15 = vcmp.lt.s32.totalorder %v4205_v61, 0  ;;  %v1929_v46 = vsub.s32 0, %v4205_v61 }
 0x23b   :  { %v1949_v55 = vsub.s32 4, %v4188_v56  ;;  %v2011_v29 = vor.u32 %v2010_v15, %v2009_v57  ;;  %v2017_v47 = vsel %vm2015_vm1, %v2005_v63, 2102212464  ;;  %vm1827_vm3 = vcmp.lt.s32.totalorder %v3913_v52, 0 }
 0x23c   :  { %v1804_v6 = vadd.f32 1.0, %v1803_v5  ;;  %v1811_v54 = vadd.f32 1.0, %v1810_v37  ;;  %v1930_v32 = vsel %vm1928_vm15, %v1929_v46, %v4205_v61  ;;  %vm2012_vm4 = vcmp.lt.s32.totalorder %v4190_v1, 1 }
 0x23d   :  { %v1931_v31 = vclz %v1930_v32  ;;  %vm2013_vm7 = vcmp.lt.s32.totalorder %v4190_v1, 2  ;;  %vm2014_vm5 = vcmp.lt.s32.totalorder %v4190_v1, 3  ;;  %v2016_v48 = vsel %vm2012_vm4, %v1996_v25, %v1999_v49 }
 0x23e   :  { %v1812_v41 = vmul.f32 %v1811_v54, %v1796_v18  ;;  %v1821_v21 = vxor.u32 2147483648, %v1804_v6  ;;  %v2020_v12 = vsel %vm2012_vm4, %v1999_v49, %v2002_v53  ;;  %v2018_v2 = vsel %vm2014_vm5, %v2002_v53, %v2017_v47 }
 0x23f   :  { %v2684_v45 = vadd.s32 4294967294, %v1931_v31  ;;  %v2021_v18 = vsel %vm2015_vm1, %v2008_v59, 920167782  ;;  %v2024_v50 = vsel %vm2012_vm4, %v2002_v53, %v2005_v63  ;;  %v2025_v27 = vsel %vm2015_vm1, %v2011_v29, 1326507024 }
 0x240   :  { %v1818_v38 = vxor.u32 2147483648, %v1812_v41  ;;  %v1822_v40 = vsel %vm1820_vm0, %v1821_v21, %v1812_v41  ;;  %v2022_v34 = vsel %vm2014_vm5, %v2005_v63, %v2021_v18  ;;  %v2026_v39 = vsel %vm2014_vm5, %v2008_v59, %v2025_v27 }
 0x241   :  { %vm2685_vm6 = vcmp.lt.s32.totalorder %v2684_v45, 0  ;;  %v2023_v13 = vsel %vm2013_vm7, %v2020_v12, %v2022_v34  ;;  %v2027_v63 = vsel %vm2013_vm7, %v2024_v50, %v2026_v39  ;;  %v2030_v36 = vshrl.u32 %v4177_v42, 16 }
 0x242   :  { %v1819_v16 = vsel %vm1817_vm13, %v1804_v6, %v1818_v38  ;;  %v1934_v33 = vsel %vm2685_vm6, 0, %v2684_v45  ;;  %v2053_v11 = vand.u32 65535, %v2023_v13  ;;  %v2054_v15 = vshrl.u32 %v2023_v13, 16 }
 0x243   :  { %v1823_v20 = vsel %vm1816_vm14, %v1819_v16, %v1822_v40  ;;  %v1935_v30 = vsub.s32 32, %v1934_v33  ;;  %v1936_v14 = vshll.u32 %v4205_v61, %v1934_v33  ;;  %v1939_v22 = vsub.s32 4294967266, %v1934_v33 }
 0x244   :  { %v1824_v25 = vsel %vm1813_vm2, nan, %v1823_v20  ;;  %v2031_v46 = vand.u32 65535, %v2027_v63  ;;  %v2032_v49 = vshrl.u32 %v2027_v63, 16  ;;  %v2056_v53 = vmul.u32 %v2054_v15, %v4194_v28 }
 0x245   :  { %v1937_v5 = vshrl.u32 %v4186_v43, %v1935_v30  ;;  %v1940_v37 = vadd.s32 127, %v1939_v22  ;;  %2618 = vst [vmem:[#allocation2 + $0x50] sm:$0xff] %v1824_v25  ;;  %v4248_v61 = vand.u32 8388607, %v2135_v44  ;;  %v2145_v35 = vadd.s32 1, %v4196_v24 }
 0x246   :  { %2626 = vst [vmem:[#allocation2 + $0xd0] sm:$0xff] %v1824_v25  ;;  %vm4253_vm8 = vcmp.le.f32.partialorder %v1825_v62, 0.7853982  ;;  %v4260_v6 = vsel %vm1827_vm3, %v1949_v55, %v4188_v56  ;;  %v2034_v54 = vmul.u32 %v2032_v49, %v4194_v28  ;;  %v4265_v32 = vsel %vm2013_vm7, %v2016_v48, %v2018_v2 }
 0x247   :  { %v1938_v43 = vor.u32 %v1937_v5, %v1936_v14  ;;  %v1941_v57 = vshll.u32 %v1940_v37, 23  ;;  %v2035_v24 = vmul.u32 %v2031_v46, %v2030_v36  ;;  %v2057_v31 = vmul.u32 %v2053_v11, %v2030_v36 }
 0x248   :  { %v2059_v29 = vshll.u32 %v2056_v53, 16  ;;  %v2033_v47 = vmul.u32 %v2031_v46, %v4194_v28  ;;  %v2037_v41 = vshll.u32 %v2034_v54, 16  ;;  %v2055_v21 = vmul.u32 %v2053_v11, %v4194_v28 }
 0x249   :  { %v1942_v62 = vor.u32 4788187, %v1941_v57  ;;  %v1945_v45 = vcvt.s32.f32 %v1938_v43  ;;  %v2036_v12 = vmul.u32 %v2032_v49, %v2030_v36  ;;  %v2039_v38 = vshll.u32 %v2035_v24, 16 }
 0x24a   :  { %v2058_v56 = vmul.u32 %v2054_v15, %v2030_v36  ;;  %vm2041_vm9 = vc.u32 %v2033_v47, %v2037_v41  ;;  %v2043_v40 = vadd.s32 %v2037_v41, %v2033_v47  ;;  %vm2063_vm11 = vc.u32 %v2055_v21, %v2059_v29 }
 0x24b   :  { %v1943_v55 = vand.u32 2147483647, %v1942_v62  ;;  %v2042_v1 = vsel %vm2041_vm9, 1, %v2746_v3  ;;  %v2061_v48 = vshll.u32 %v2057_v31, 16  ;;  %v2064_v2 = vsel %vm2063_vm11, 1, %v2746_v3 }
 0x24c   :  { %v2065_v18 = vadd.s32 %v2059_v29, %v2055_v21  ;;  %v2044_v50 = vadd.s32 %v2042_v1, %v2036_v12  ;;  %vm2045_vm10 = vc.u32 %v2043_v40, %v2039_v38  ;;  %v2066_v27 = vadd.s32 %v2064_v2, %v2058_v56 }
 0x24d   :  { %v1946_v34 = vmul.f32 %v1945_v45, %v1943_v55  ;;  %v2038_v16 = vshrl.u32 %v2034_v54, 16  ;;  %v2046_v28 = vsel %vm2045_vm10, 1, %v2746_v3  ;;  %vm2146_vm0 = vcmp.gt.s32.totalorder %v2145_v35, 0 }
 0x24e   :  { %vm2067_vm12 = vc.u32 %v2065_v18, %v2061_v48  ;;  %v2048_v13 = vadd.s32 %v2046_v28, %v2044_v50  ;;  %v2147_v20 = vsel %vm2146_vm0, %v2145_v35, 0  ;;  %v1952_v30 = vsel %vm4253_vm8, 0, %v4260_v6 }
 0x24f   :  { %v1947_v33 = vxor.u32 2147483648, %v1946_v34  ;;  %v2068_v39 = vsel %vm2067_vm12, 1, %v2746_v3  ;;  %v2060_v14 = vshrl.u32 %v2056_v53, 16  ;;  %v2149_v25 = vand.u32 31, %v2147_v20 }
 0x250   :  { %v2070_v22 = vadd.s32 %v2068_v39, %v2066_v27  ;;  %v2040_v11 = vshrl.u32 %v2035_v24, 16  ;;  %v2049_v15 = vadd.s32 %v2048_v13, %v2038_v16  ;;  %v2062_v5 = vshrl.u32 %v2057_v31, 16 }
 0x251   :  { %v1948_v63 = vsel %vm1827_vm3, %v1947_v33, %v1946_v34  ;;  %v2073_v49 = vmul.u32 %v4177_v42, %v4265_v32  ;;  %v4283_v36 = vsub.s32 32, %v2149_v25  ;;  %v4287_v43 = vadd.s32 %v2065_v18, %v2061_v48 }
 0x252   :  { %v1951_v37 = vsel %vm4253_vm8, %v3913_v52, %v1948_v63  ;;  %v2071_v46 = vadd.s32 %v2070_v22, %v2060_v14  ;;  %v4285_v53 = vadd.s32 %v2049_v15, %v2040_v11  ;;  %v4289_v57 = vshrl.u32 %v2147_v20, 5 }
 0x253   :  { %v1953_v35 = vmul.f32 %v1951_v37, %v1951_v37  ;;  %v2152_v54 = vshll.u32 %v2748_v58, %v2149_v25  ;;  %v2153_v59 = vshrl.u32 %v2749_v60, %v4283_v36  ;;  %v2156_v24 = vshrl.u32 %v2750_v0, %v4283_v36 }
 0x254   :  { %v2072_v6 = vadd.s32 %v2071_v46, %v2062_v5  ;;  %vm2075_vm13 = vc.u32 %v4285_v53, %v4287_v43  ;;  %v2155_v32 = vshll.u32 %v2749_v60, %v2149_v25  ;;  %v2158_v47 = vshll.u32 %v2750_v0, %v2149_v25 }
 0x255   :  { %v1954_v31 = vmul.f32 -0.001358992, %v1953_v35  ;;  %v1961_v42 = vmul.f32 -0.00019511016, %v1953_v35  ;;  %v4299_v62 = vor.u32 %v2153_v59, %v2152_v54  ;;  %v2159_v41 = vshrl.u32 %v2751_v4, %v4283_v36 }
 0x256   :  { %v2076_v29 = vadd.s32 1, %v2072_v6  ;;  %v2161_v12 = vshll.u32 %v2751_v4, %v2149_v25  ;;  %v2162_v38 = vshrl.u32 %v2752_v7, %v4283_v36  ;;  %v4307_v55 = vor.u32 %v2156_v24, %v2155_v32 }
 0x257   :  { %v1955_v21 = vadd.f32 0.041655596, %v1954_v31  ;;  %v1962_v45 = vadd.f32 0.008332121, %v1961_v42  ;;  %v2164_v40 = vshll.u32 %v2752_v7, %v2149_v25  ;;  %v2165_v1 = vshrl.u32 %v2753_v10, %v4283_v36 }
 0x258   :  { %v2077_v56 = vsel %vm2075_vm13, %v2076_v29, %v2072_v6  ;;  %v2163_v34 = vor.u32 %v2162_v38, %v2161_v12  ;;  %v1351_v50 = vmul.f32 %v2877_v19, %v3576_v17  ;;  %v1969_v27 = vadd.s32 3, %v1952_v30 }
 0x259   :  { %v1956_v48 = vmul.f32 %v1955_v21, %v1953_v35  ;;  %v1963_v2 = vmul.f32 %v1962_v45, %v1953_v35  ;;  %v2078_v18 = vadd.s32 %v2077_v56, %v2073_v49  ;;  %v2160_v16 = vor.u32 %v2159_v41, %v2158_v47 }
 0x25a   :  { %v2166_v28 = vor.u32 %v2165_v1, %v2164_v40  ;;  %vm2170_vm14 = vcmp.lt.s32.totalorder %v4289_v57, 4  ;;  %v2143_v20 = vor.u32 8388608, %v4248_v61  ;;  %vm2167_vm15 = vcmp.lt.s32.totalorder %v4289_v57, 1 }
 0x25b   :  { %v1957_v33 = vadd.f32 -0.4999988, %v1956_v48  ;;  %v1964_v13 = vadd.f32 -0.16666654, %v1963_v2  ;;  %v2079_v39 = vadd.s32 536870912, %v2078_v18  ;;  %vm2169_vm2 = vcmp.lt.s32.totalorder %v4289_v57, 3 }
 0x25c   :  { %v2176_v14 = vsel %vm2170_vm14, %v2163_v34, 920167782  ;;  %v2175_v17 = vsel %vm2167_vm15, %v4299_v62, %v4307_v55  ;;  %v1970_v30 = vand.u32 3, %v1969_v27  ;;  %vm2168_vm1 = vcmp.lt.s32.totalorder %v4289_v57, 2 }
 0x25d   :  { %v1958_v22 = vmul.f32 %v1957_v33, %v1953_v35  ;;  %v1965_v25 = vmul.f32 %v1964_v13, %v1953_v35  ;;  %v4320_v19 = vshrl.u32 %v2079_v39, 30  ;;  %v2177_v61 = vsel %vm2169_vm2, %v2160_v16, %v2176_v14 }
 0x25e   :  { %v2180_v63 = vsel %vm2170_vm14, %v2166_v28, 1326507024  ;;  %v2179_v46 = vsel %vm2167_vm15, %v4307_v55, %v2160_v16  ;;  %v4337_v49 = vadd.f32 %v4181_v23, %v3373_v26  ;;  %v2178_v35 = vsel %vm2168_vm1, %v2175_v17, %v2177_v61 }
 0x25f   :  { %v1959_v11 = vadd.f32 1.0, %v1958_v22  ;;  %v1966_v15 = vadd.f32 1.0, %v1965_v25  ;;  %v2081_v5 = vshll.u32 %v4320_v19, 30  ;;  %v2181_v6 = vsel %vm2169_vm2, %v2163_v34, %v2180_v63 }
 0x260   :  { %v4343_v54 = vshll.u32 %v2143_v20, 8  ;;  %v4346_v59 = vadd.f32 %v1351_v50, %v3373_v26  ;;  %vm1971_vm3 = vcmp.lt.s32.totalorder %v1970_v30, 2  ;;  %vm1972_vm4 = vcmp.eq.s32.totalorder %v1970_v30, 0 }
 0x261   :  { %v1967_v24 = vmul.f32 %v1966_v15, %v1951_v37  ;;  %v1976_v31 = vxor.u32 2147483648, %v1959_v11  ;;  %v2082_v42 = vsub.s32 %v2078_v18, %v2081_v5  ;;  %v2182_v23 = vsel %vm2168_vm1, %v2179_v46, %v2181_v6 }
 0x262   :  { %v2209_v32 = vshrl.u32 %v2178_v35, 16  ;;  %vm1975_vm7 = vcmp.eq.s32.totalorder %v1970_v30, 2  ;;  %v2184_v41 = vand.u32 65535, %v4343_v54  ;;  %v2185_v21 = vshrl.u32 %v4343_v54, 16 }
 0x263   :  { %v1973_v29 = vxor.u32 2147483648, %v1967_v24  ;;  %vm2083_vm5 = vcmp.lt.s32.totalorder %v2082_v42, 0  ;;  %v2084_v47 = vsub.s32 0, %v2082_v42  ;;  %v2186_v45 = vand.u32 65535, %v2182_v23 }
 0x264   :  { %v2187_v26 = vshrl.u32 %v2182_v23, 16  ;;  %v1977_v37 = vsel %vm1975_vm7, %v1976_v31, %v1967_v24  ;;  %v2208_v56 = vand.u32 65535, %v2178_v35  ;;  %vm1968_vm6 = vweird.f32 %v3913_v52 }
 0x265   :  { %v1974_v12 = vsel %vm1972_vm4, %v1959_v11, %v1973_v29  ;;  %v2085_v38 = vsel %vm2083_vm5, %v2084_v47, %v2082_v42  ;;  %v2211_v48 = vmul.u32 %v2209_v32, %v2184_v41  ;;  %v2151_v18 = vshrl.u32 %v2748_v58, %v4283_v36 }
 0x266   :  { %v1978_v40 = vsel %vm1971_vm3, %v1974_v12, %v1977_v37  ;;  %v2086_v1 = vclz %v2085_v38  ;;  %v2189_v34 = vmul.u32 %v2187_v26, %v2184_v41  ;;  %v2190_v50 = vmul.u32 %v2186_v45, %v2185_v21 }
 0x267   :  { %v1979_v2 = vsel %vm1968_vm6, nan, %v1978_v40  ;;  %v2074_v27 = vadd.s32 %v4287_v43, %v4285_v53  ;;  %v2104_v33 = vsub.s32 4, %v4320_v19  ;;  %v2172_v13 = vsel %vm2170_vm14, %v2160_v16, 2102212464 }
 0x268   :  { %v2687_v28 = vadd.s32 4294967294, %v2086_v1  ;;  %2619 = vst [vmem:[#allocation2 + $0x58] sm:$0xff] %v1979_v2  ;;  %v2188_v52 = vmul.u32 %v2186_v45, %v2184_v41  ;;  %v2192_v39 = vshll.u32 %v2189_v34, 16  ;;  %v2210_v20 = vmul.u32 %v2208_v56, %v2184_v41 }
 0x269   :  { %v2212_v14 = vmul.u32 %v2208_v56, %v2185_v21  ;;  %2627 = vst [vmem:[#allocation2 + $0xd8] sm:$0xff] %v1979_v2  ;;  %v2191_v22 = vmul.u32 %v2187_v26, %v2185_v21  ;;  %v2193_v36 = vshrl.u32 %v2189_v34, 16  ;;  %v2214_v25 = vshll.u32 %v2211_v48, 16 }
 0x26a   :  { %vm2688_vm8 = vcmp.lt.s32.totalorder %v2687_v28, 0  ;;  %v2194_v30 = vshll.u32 %v2190_v50, 16  ;;  %vm2196_vm9 = vc.u32 %v2188_v52, %v2192_v39  ;;  %v2198_v53 = vadd.s32 %v2192_v39, %v2188_v52 }
 0x26b   :  { %v2089_v17 = vsel %vm2688_vm8, 0, %v2687_v28  ;;  %v2197_v63 = vsel %vm2196_vm9, 1, %v2746_v3  ;;  %v2213_v11 = vmul.u32 %v2209_v32, %v2185_v21  ;;  %vm2218_vm10 = vc.u32 %v2210_v20, %v2214_v25 }
 0x26c   :  { %v2090_v43 = vsub.s32 32, %v2089_v17  ;;  %v2094_v61 = vsub.s32 4294967266, %v2089_v17  ;;  %v2091_v16 = vshll.u32 %v2082_v42, %v2089_v17  ;;  %v2199_v15 = vadd.s32 %v2197_v63, %v2191_v22 }
 0x26d   :  { %vm2200_vm11 = vc.u32 %v2198_v53, %v2194_v30  ;;  %v2219_v6 = vsel %vm2218_vm10, 1, %v2746_v3  ;;  %v2216_v31 = vshll.u32 %v2212_v14, 16  ;;  %v2220_v23 = vadd.s32 %v2214_v25, %v2210_v20 }
 0x26e   :  { %v2092_v5 = vshrl.u32 %v2074_v27, %v2090_v43  ;;  %v2095_v46 = vadd.s32 127, %v2094_v61  ;;  %v2201_v35 = vsel %vm2200_vm11, 1, %v2746_v3  ;;  %v2221_v29 = vadd.s32 %v2219_v6, %v2213_v11 }
 0x26f   :  { %v2203_v24 = vadd.s32 %v2201_v35, %v2199_v15  ;;  %vm1982_vm12 = vcmp.lt.s32.totalorder %v4097_v8, 0  ;;  %v2290_v32 = vand.u32 2147483647, %v4337_v49  ;;  %v2171_v42 = vsel %vm2167_vm15, %v2151_v18, %v4299_v62 }
 0x270   :  { %v2093_v47 = vor.u32 %v2092_v5, %v2091_v16  ;;  %v2096_v41 = vshll.u32 %v2095_v46, 23  ;;  %vm2222_vm0 = vc.u32 %v2220_v23, %v2216_v31  ;;  %v2293_v45 = vand.u32 2139095040, %v4337_v49 }
 0x271   :  { %v2204_v21 = vadd.s32 %v2203_v24, %v2193_v36  ;;  %v2173_v12 = vsel %vm2169_vm2, %v4307_v55, %v2172_v13  ;;  %v2195_v37 = vshrl.u32 %v2190_v50, 16  ;;  %v2223_v38 = vsel %vm2222_vm0, 1, %v2746_v3 }
 0x272   :  { %v2097_v26 = vor.u32 4788187, %v2096_v41  ;;  %v2105_v56 = vsel %vm1982_vm12, %v2104_v33, %v4320_v19  ;;  %v2215_v40 = vshrl.u32 %v2211_v48, 16  ;;  %v2225_v1 = vadd.s32 %v2223_v38, %v2221_v29 }
 0x273   :  { %v2294_v2 = vshrl.u32 %v2293_v45, 23  ;;  %vm4379_vm13 = vcmp.le.f32.partialorder %v1980_v9, 0.7853982  ;;  %v2100_v34 = vcvt.s32.f32 %v2093_v47  ;;  %v2205_v27 = vadd.s32 %v2204_v21, %v2195_v37 }
 0x274   :  { %v2098_v18 = vand.u32 2147483647, %v2097_v26  ;;  %v2174_v55 = vsel %vm2168_vm1, %v2171_v42, %v2173_v12  ;;  %v2217_v50 = vshrl.u32 %v2212_v14, 16  ;;  %v2226_v28 = vadd.s32 %v2225_v1, %v2215_v40 }
 0x275   :  { %v2692_v13 = vadd.s32 4294967169, %v2294_v2  ;;  %v2107_v19 = vsel %vm4379_vm13, 0, %v2105_v56  ;;  %v2224_v48 = vadd.s32 %v2220_v23, %v2216_v31  ;;  %v2297_v9 = vand.u32 8388607, %v2290_v32 }
 0x276   :  { %v2101_v52 = vmul.f32 %v2100_v34, %v2098_v18  ;;  %v2227_v33 = vadd.s32 %v2226_v28, %v2217_v50  ;;  %v2124_v22 = vadd.s32 3, %v2107_v19  ;;  %v2228_v36 = vmul.u32 %v4343_v54, %v2174_v55 }
 0x277   :  { %v2300_v39 = vadd.s32 1, %v2692_v13  ;;  %vm2230_vm14 = vc.u32 %v2205_v27, %v2224_v48  ;;  %v2298_v25 = vor.u32 8388608, %v2297_v9  ;;  %v2445_v30 = vand.u32 2147483647, %v4346_v59 }
 0x278   :  { %v2102_v20 = vxor.u32 2147483648, %v2101_v52  ;;  %v2231_v57 = vadd.s32 1, %v2227_v33  ;;  %v2448_v63 = vand.u32 2139095040, %v4346_v59  ;;  %v4399_v46 = vand.u32 3, %v2124_v22 }
 0x279   :  { %vm2301_vm15 = vcmp.gt.s32.totalorder %v2300_v39, 0  ;;  %v4401_v6 = vadd.s32 %v2224_v48, %v2205_v27  ;;  %v4403_v24 = vshll.u32 %v2298_v25, 8  ;;  %v4407_v23 = vand.u32 8388607, %v2445_v30 }
 0x27a   :  { %v2103_v14 = vsel %vm1982_vm12, %v2102_v20, %v2101_v52  ;;  %v2302_v17 = vsel %vm2301_vm15, %v2300_v39, 0  ;;  %v2232_v43 = vsel %vm2230_vm14, %v2231_v57, %v2227_v33  ;;  %v2449_v31 = vshrl.u32 %v2448_v63, 23 }
 0x27b   :  { %v2106_v53 = vsel %vm4379_vm13, %v4097_v8, %v2103_v14  ;;  %v2304_v61 = vand.u32 31, %v2302_v17  ;;  %v2233_v16 = vadd.s32 %v2232_v43, %v2228_v36  ;;  %v4413_v21 = vshrl.u32 %v2302_v17, 5 }
 0x27c   :  { %v2108_v11 = vmul.f32 %v2106_v53, %v2106_v53  ;;  %vm2130_vm2 = vcmp.eq.s32.totalorder %v4399_v46, 2  ;;  %vm2127_vm1 = vcmp.eq.s32.totalorder %v4399_v46, 0  ;;  %vm2126_vm3 = vcmp.lt.s32.totalorder %v4399_v46, 2 }
 0x27d   :  { %v4397_v54 = vsub.s32 32, %v2304_v61  ;;  %v2234_v35 = vadd.s32 536870912, %v2233_v16  ;;  %v2307_v40 = vshll.u32 %v2748_v58, %v2304_v61  ;;  %v2310_v1 = vshll.u32 %v2749_v60, %v2304_v61 }
 0x27e   :  { %v2109_v15 = vmul.f32 -0.001358992, %v2108_v11  ;;  %v2116_v5 = vmul.f32 -0.00019511016, %v2108_v11  ;;  %v2313_v2 = vshll.u32 %v2750_v0, %v2304_v61  ;;  %v2316_v62 = vshll.u32 %v2751_v4, %v2304_v61 }
 0x27f   :  { %v4409_v41 = vshrl.u32 %v2234_v35, 30  ;;  %v2308_v42 = vshrl.u32 %v2749_v60, %v4397_v54  ;;  %v2311_v45 = vshrl.u32 %v2750_v0, %v4397_v54  ;;  %v2314_v26 = vshrl.u32 %v2751_v4, %v4397_v54 }
 0x280   :  { %v2110_v29 = vadd.f32 0.041655596, %v2109_v15  ;;  %v2117_v47 = vadd.f32 0.008332121, %v2116_v5  ;;  %v2317_v12 = vshrl.u32 %v2752_v7, %v4397_v54  ;;  %v2320_v18 = vshrl.u32 %v2753_v10, %v4397_v54 }
 0x281   :  { %v2236_v56 = vshll.u32 %v4409_v41, 30  ;;  %v2309_v50 = vor.u32 %v2308_v42, %v2307_v40  ;;  %v4432_v28 = vor.u32 %v2311_v45, %v2310_v1  ;;  %v4434_v13 = vor.u32 %v2314_v26, %v2313_v2 }
 0x282   :  { %v2111_v37 = vmul.f32 %v2110_v29, %v2108_v11  ;;  %v2118_v38 = vmul.f32 %v2117_v47, %v2108_v11  ;;  %v2318_v52 = vor.u32 %v2317_v12, %v2316_v62  ;;  %v2319_v19 = vshll.u32 %v2752_v7, %v2304_v61 }
 0x283   :  { %v4429_v55 = vsub.s32 %v2233_v16, %v2236_v56  ;;  %vm2123_vm7 = vweird.f32 %v4097_v8  ;;  %vm2137_vm5 = vcmp.lt.s32.totalorder %v4137_v51, 0  ;;  %vm2322_vm6 = vcmp.lt.s32.totalorder %v4413_v21, 1 }
 0x284   :  { %v2112_v34 = vadd.f32 -0.4999988, %v2111_v37  ;;  %v2119_v27 = vadd.f32 -0.16666654, %v2118_v38  ;;  %v2321_v39 = vor.u32 %v2320_v18, %v2319_v19  ;;  %v2339_v20 = vand.u32 65535, %v4403_v24 }
 0x285   :  { %vm2238_vm4 = vcmp.lt.s32.totalorder %v4429_v55, 0  ;;  %v2239_v33 = vsub.s32 0, %v4429_v55  ;;  %v2695_v22 = vadd.s32 4294967169, %v2449_v31  ;;  %vm2325_vm8 = vcmp.lt.s32.totalorder %v4413_v21, 4 }
 0x286   :  { %v2113_v48 = vmul.f32 %v2112_v34, %v2108_v11  ;;  %v2120_v9 = vmul.f32 %v2119_v27, %v2108_v11  ;;  %vm2324_vm9 = vcmp.lt.s32.totalorder %v4413_v21, 3  ;;  %v2330_v17 = vsel %vm2322_vm6, %v2309_v50, %v4432_v28 }
 0x287   :  { %v2240_v14 = vsel %vm2238_vm4, %v2239_v33, %v4429_v55  ;;  %v2331_v43 = vsel %vm2325_vm8, %v2318_v52, 920167782  ;;  %v2340_v16 = vshrl.u32 %v4403_v24, 16  ;;  %vm2323_vm11 = vcmp.lt.s32.totalorder %v4413_v21, 2 }
 0x288   :  { %v2114_v36 = vadd.f32 1.0, %v2113_v48  ;;  %v2121_v57 = vadd.f32 1.0, %v2120_v9  ;;  %v2241_v25 = vclz %v2240_v14  ;;  %v2332_v11 = vsel %vm2324_vm9, %v4434_v13, %v2331_v43 }
 0x289   :  { %v2334_v5 = vsel %vm2322_vm6, %v4432_v28, %v4434_v13  ;;  %v4461_v35 = vadd.s32 1, %v2695_v22  ;;  %v2333_v29 = vsel %vm2323_vm11, %v2330_v17, %v2332_v11  ;;  %v2335_v47 = vsel %vm2325_vm8, %v2321_v39, 1326507024 }
 0x28a   :  { %v2122_v61 = vmul.f32 %v2121_v57, %v2106_v53  ;;  %v2131_v63 = vxor.u32 2147483648, %v2114_v36  ;;  %v2690_v15 = vadd.s32 4294967294, %v2241_v25  ;;  %v2259_v53 = vsub.s32 4, %v4409_v41 }
 0x28b   :  { %v2336_v45 = vsel %vm2324_vm9, %v2318_v52, %v2335_v47  ;;  %v2364_v26 = vshrl.u32 %v2333_v29, 16  ;;  %v2363_v56 = vand.u32 65535, %v2333_v29  ;;  %v2306_v62 = vshrl.u32 %v2748_v58, %v4397_v54 }
 0x28c   :  { %v2128_v31 = vxor.u32 2147483648, %v2122_v61  ;;  %v2132_v42 = vsel %vm2130_vm2, %v2131_v63, %v2122_v61  ;;  %vm2691_vm10 = vcmp.lt.s32.totalorder %v2690_v15, 0  ;;  %v2337_v38 = vsel %vm2323_vm11, %v2334_v5, %v2336_v45 }
 0x28d   :  { %v2244_v37 = vsel %vm2691_vm10, 0, %v2690_v15  ;;  %v4485_v34 = vsel %vm2137_vm5, %v2259_v53, %v4409_v41  ;;  %v2341_v27 = vand.u32 65535, %v2337_v38  ;;  %v2342_v52 = vshrl.u32 %v2337_v38, 16 }
 0x28e   :  { %v2129_v12 = vsel %vm2127_vm1, %v2114_v36, %v2128_v31  ;;  %v2245_v1 = vsub.s32 32, %v2244_v37  ;;  %v2249_v2 = vsub.s32 4294967266, %v2244_v37  ;;  %v2246_v19 = vshll.u32 %v4429_v55, %v2244_v37 }
 0x28f   :  { %v2133_v40 = vsel %vm2126_vm3, %v2129_v12, %v2132_v42  ;;  %v2366_v9 = vmul.u32 %v2364_v26, %v2339_v20  ;;  %v2326_v54 = vsel %vm2322_vm6, %v2306_v62, %v2309_v50  ;;  %v2344_v33 = vmul.u32 %v2342_v52, %v2339_v20 }
 0x290   :  { %v2134_v18 = vsel %vm2123_vm7, nan, %v2133_v40  ;;  %v2247_v46 = vshrl.u32 %v4401_v6, %v2245_v1  ;;  %v2250_v48 = vadd.s32 127, %v2249_v2  ;;  %v2345_v8 = vmul.u32 %v2341_v27, %v2340_v16 }
 0x291   :  { %2620 = vst [vmem:[#allocation2 + $0x60] sm:$0xff] %v2134_v18  ;;  %v2367_v39 = vmul.u32 %v2363_v56, %v2340_v16  ;;  %vm4493_vm12 = vcmp.le.f32.partialorder %v2135_v44, 0.7853982  ;;  %v2327_v6 = vsel %vm2325_vm8, %v4434_v13, 2102212464  ;;  %v2369_v36 = vshll.u32 %v2366_v9, 16 }
 0x292   :  { %2628 = vst [vmem:[#allocation2 + $0xe0] sm:$0xff] %v2134_v18  ;;  %v2248_v22 = vor.u32 %v2247_v46, %v2246_v19  ;;  %v2251_v55 = vshll.u32 %v2250_v48, 23  ;;  %v2343_v57 = vmul.u32 %v2341_v27, %v2339_v20  ;;  %v2346_v14 = vmul.u32 %v2342_v52, %v2340_v16 }
 0x293   :  { %v2347_v50 = vshll.u32 %v2344_v33, 16  ;;  %v2365_v25 = vmul.u32 %v2363_v56, %v2339_v20  ;;  %v2349_v61 = vshll.u32 %v2345_v8, 16  ;;  %v2368_v63 = vmul.u32 %v2364_v26, %v2340_v16 }
 0x294   :  { %v2252_v17 = vor.u32 4788187, %v2251_v55  ;;  %v2255_v43 = vcvt.s32.f32 %v2248_v22  ;;  %v2371_v11 = vshll.u32 %v2367_v39, 16  ;;  %vm2456_vm15 = vcmp.gt.s32.totalorder %v4461_v35, 0 }
 0x295   :  { %vm2351_vm0 = vc.u32 %v2343_v57, %v2347_v50  ;;  %v2353_v44 = vadd.s32 %v2347_v50, %v2343_v57  ;;  %vm2373_vm13 = vc.u32 %v2365_v25, %v2369_v36  ;;  %v2375_v53 = vadd.s32 %v2369_v36, %v2365_v25 }
 0x296   :  { %v2253_v15 = vand.u32 2147483647, %v2252_v17  ;;  %v2352_v5 = vsel %vm2351_vm0, 1, %v2746_v3  ;;  %v2374_v31 = vsel %vm2373_vm13, 1, %v2746_v3  ;;  %v2328_v16 = vsel %vm2324_vm9, %v4432_v28, %v2327_v6 }
 0x297   :  { %v2354_v13 = vadd.s32 %v2352_v5, %v2346_v14  ;;  %vm2355_vm14 = vc.u32 %v2353_v44, %v2349_v61  ;;  %v2376_v29 = vadd.s32 %v2374_v31, %v2368_v63  ;;  %vm2377_vm2 = vc.u32 %v2375_v53, %v2371_v11 }
 0x298   :  { %v2256_v20 = vmul.f32 %v2255_v43, %v2253_v15  ;;  %v2356_v47 = vsel %vm2355_vm14, 1, %v2746_v3  ;;  %v2348_v42 = vshrl.u32 %v2344_v33, 16  ;;  %v2378_v26 = vsel %vm2377_vm2, 1, %v2746_v3 }
 0x299   :  { %v2358_v45 = vadd.s32 %v2356_v47, %v2354_v13  ;;  %v2457_v12 = vsel %vm2456_vm15, %v4461_v35, 0  ;;  %v2370_v38 = vshrl.u32 %v2366_v9, 16  ;;  %v2380_v56 = vadd.s32 %v2378_v26, %v2376_v29 }
 0x29a   :  { %v2257_v37 = vxor.u32 2147483648, %v2256_v20  ;;  %v2459_v40 = vand.u32 31, %v2457_v12  ;;  %v2262_v1 = vsel %vm4493_vm12, 0, %v4485_v34  ;;  %v2329_v28 = vsel %vm2323_vm11, %v2326_v54, %v2328_v16 }
 0x29b   :  { %v2350_v2 = vshrl.u32 %v2345_v8, 16  ;;  %v2359_v62 = vadd.s32 %v2358_v45, %v2348_v42  ;;  %v2372_v27 = vshrl.u32 %v2367_v39, 16  ;;  %v2381_v52 = vadd.s32 %v2380_v56, %v2370_v38 }
 0x29c   :  { %v2258_v18 = vsel %vm2137_vm5, %v2257_v37, %v2256_v20  ;;  %v4516_v19 = vsub.s32 32, %v2459_v40  ;;  %v4523_v48 = vadd.s32 %v2375_v53, %v2371_v11  ;;  %v2453_v21 = vor.u32 8388608, %v4407_v23 }
 0x29d   :  { %v2261_v35 = vsel %vm4493_vm12, %v4137_v51, %v2258_v18  ;;  %v4521_v46 = vadd.s32 %v2359_v62, %v2350_v2  ;;  %v2279_v9 = vadd.s32 3, %v2262_v1  ;;  %v2382_v54 = vadd.s32 %v2381_v52, %v2372_v27 }
 0x29e   :  { %v2263_v34 = vmul.f32 %v2261_v35, %v2261_v35  ;;  %v2383_v33 = vmul.u32 %v4403_v24, %v2329_v28  ;;  %v4529_v8 = vshrl.u32 %v2457_v12, 5  ;;  %v2462_v39 = vshll.u32 %v2748_v58, %v2459_v40 }
 0x29f   :  { %vm2385_vm1 = vc.u32 %v4521_v46, %v4523_v48  ;;  %v2466_v41 = vshrl.u32 %v2750_v0, %v4516_v19  ;;  %v2386_v6 = vadd.s32 1, %v2382_v54  ;;  %v2469_v23 = vshrl.u32 %v2751_v4, %v4516_v19 }
 0x2a0   :  { %v2264_v22 = vmul.f32 -0.001358992, %v2263_v34  ;;  %v2271_v55 = vmul.f32 -0.00019511016, %v2263_v34  ;;  %v2463_v36 = vshrl.u32 %v2749_v60, %v4516_v19  ;;  %v2465_v24 = vshll.u32 %v2749_v60, %v2459_v40 }
 0x2a1   :  { %v2471_v57 = vshll.u32 %v2751_v4, %v2459_v40  ;;  %v2472_v14 = vshrl.u32 %v2752_v7, %v4516_v19  ;;  %v2387_v17 = vsel %vm2385_vm1, %v2386_v6, %v2382_v54  ;;  %v2468_v43 = vshll.u32 %v2750_v0, %v2459_v40 }
 0x2a2   :  { %v2265_v50 = vadd.f32 0.041655596, %v2264_v22  ;;  %v2272_v25 = vadd.f32 0.008332121, %v2271_v55  ;;  %v2388_v61 = vadd.s32 %v2387_v17, %v2383_v33  ;;  %v2474_v44 = vshll.u32 %v2752_v7, %v2459_v40 }
 0x2a3   :  { %v2473_v63 = vor.u32 %v2472_v14, %v2471_v57  ;;  %v2475_v11 = vshrl.u32 %v2753_v10, %v4516_v19  ;;  %v4546_v60 = vor.u32 %v2466_v41, %v2465_v24  ;;  %v4548_v4 = vor.u32 %v2469_v23, %v2468_v43 }
 0x2a4   :  { %v2266_v15 = vmul.f32 %v2265_v50, %v2263_v34  ;;  %v2273_v5 = vmul.f32 %v2272_v25, %v2263_v34  ;;  %v2389_v31 = vadd.s32 536870912, %v2388_v61  ;;  %v4550_v53 = vor.u32 %v2463_v36, %v2462_v39 }
 0x2a5   :  { %v2476_v13 = vor.u32 %v2475_v11, %v2474_v44  ;;  %v2280_v0 = vand.u32 3, %v2279_v9  ;;  %vm2480_vm3 = vcmp.lt.s32.totalorder %v4529_v8, 4  ;;  %vm2477_vm4 = vcmp.lt.s32.totalorder %v4529_v8, 1 }
 0x2a6   :  { %v2267_v29 = vadd.f32 -0.4999988, %v2266_v15  ;;  %v2274_v20 = vadd.f32 -0.16666654, %v2273_v5  ;;  %v4553_v16 = vshrl.u32 %v2389_v31, 30  ;;  %v4558_v10 = vshll.u32 %v2453_v21, 8 }
 0x2a7   :  { %v2486_v7 = vsel %vm2480_vm3, %v2473_v63, 920167782  ;;  %vm2479_vm7 = vcmp.lt.s32.totalorder %v4529_v8, 3  ;;  %v2489_v45 = vsel %vm2477_vm4, %v4546_v60, %v4548_v4  ;;  %v2485_v12 = vsel %vm2477_vm4, %v4550_v53, %v4546_v60 }
 0x2a8   :  { %v2268_v47 = vmul.f32 %v2267_v29, %v2263_v34  ;;  %v2275_v42 = vmul.f32 %v2274_v20, %v2263_v34  ;;  %v2391_v26 = vshll.u32 %v4553_v16, 30  ;;  %v2487_v37 = vsel %vm2479_vm7, %v4548_v4, %v2486_v7 }
 0x2a9   :  { %v2490_v38 = vsel %vm2480_vm3, %v2476_v13, 1326507024  ;;  %vm2478_vm5 = vcmp.lt.s32.totalorder %v4529_v8, 2  ;;  %v2494_v62 = vand.u32 65535, %v4558_v10  ;;  %v2495_v9 = vshrl.u32 %v4558_v10, 16 }
 0x2aa   :  { %v2269_v56 = vadd.f32 1.0, %v2268_v47  ;;  %v2276_v40 = vadd.f32 1.0, %v2275_v42  ;;  %v2491_v1 = vsel %vm2479_vm7, %v2473_v63, %v2490_v38  ;;  %v2392_v28 = vsub.s32 %v2388_v61, %v2391_v26 }
 0x2ab   :  { %v2492_v2 = vsel %vm2478_vm5, %v2489_v45, %v2491_v1  ;;  %v2488_v52 = vsel %vm2478_vm5, %v2485_v12, %v2487_v37  ;;  %vm2281_vm8 = vcmp.lt.s32.totalorder %v2280_v0, 2  ;;  %vm2282_vm9 = vcmp.eq.s32.totalorder %v2280_v0, 0 }
 0x2ac   :  { %v2277_v18 = vmul.f32 %v2276_v40, %v2261_v35  ;;  %v2286_v27 = vxor.u32 2147483648, %v2269_v56  ;;  %v2496_v21 = vand.u32 65535, %v2492_v2  ;;  %vm2393_vm6 = vcmp.lt.s32.totalorder %v2392_v28, 0 }
 0x2ad   :  { %v2394_v34 = vsub.s32 0, %v2392_v28  ;;  %v2497_v54 = vshrl.u32 %v2492_v2, 16  ;;  %vm2285_vm11 = vcmp.eq.s32.totalorder %v2280_v0, 2  ;;  %v2519_v55 = vshrl.u32 %v2488_v52, 16 }
 0x2ae   :  { %v2283_v33 = vxor.u32 2147483648, %v2277_v18  ;;  %v2500_v22 = vmul.u32 %v2496_v21, %v2495_v9  ;;  %v2287_v35 = vsel %vm2285_vm11, %v2286_v27, %v2277_v18  ;;  %v2518_v36 = vand.u32 65535, %v2488_v52 }
 0x2af   :  { %v2395_v39 = vsel %vm2393_vm6, %v2394_v34, %v2392_v28  ;;  %v2499_v41 = vmul.u32 %v2497_v54, %v2494_v62  ;;  %vm2278_vm10 = vweird.f32 %v4137_v51  ;;  %v2498_v50 = vmul.u32 %v2496_v21, %v2494_v62 }
 0x2b0   :  { %v2284_v6 = vsel %vm2282_vm9, %v2269_v56, %v2283_v33  ;;  %v2396_v23 = vclz %v2395_v39  ;;  %v2384_v17 = vadd.s32 %v4523_v48, %v4521_v46  ;;  %v2501_v43 = vmul.u32 %v2497_v54, %v2495_v9 }
 0x2b1   :  { %v2288_v24 = vsel %vm2281_vm8, %v2284_v6, %v2287_v35  ;;  %v2502_v25 = vshll.u32 %v2499_v41, 16  ;;  %v2504_v61 = vshll.u32 %v2500_v22, 16  ;;  %v2521_v63 = vmul.u32 %v2519_v55, %v2494_v62 }
 0x2b2   :  { %v2289_v57 = vsel %vm2278_vm10, nan, %v2288_v24  ;;  %v2693_v14 = vadd.s32 4294967294, %v2396_v23  ;;  %v2520_v11 = vmul.u32 %v2518_v36, %v2494_v62  ;;  %v2522_v5 = vmul.u32 %v2518_v36, %v2495_v9 }
 0x2b3   :  { %2621 = vst [vmem:[#allocation2 + $0x68] sm:$0xff] %v2289_v57  ;;  %vm2506_vm0 = vc.u32 %v2498_v50, %v2502_v25  ;;  %v2508_v44 = vadd.s32 %v2502_v25, %v2498_v50  ;;  %v2524_v31 = vshll.u32 %v2521_v63, 16  ;;  %v2503_v20 = vshrl.u32 %v2499_v41, 16 }
 0x2b4   :  { %vm2694_vm12 = vcmp.lt.s32.totalorder %v2693_v14, 0  ;;  %2629 = vst [vmem:[#allocation2 + $0xe8] sm:$0xff] %v2289_v57  ;;  %v2507_v51 = vsel %vm2506_vm0, 1, %v2746_v3  ;;  %v2523_v46 = vmul.u32 %v2519_v55, %v2495_v9  ;;  %v2526_v12 = vshll.u32 %v2522_v5, 16 }
 0x2b5   :  { %v2399_v15 = vsel %vm2694_vm12, 0, %v2693_v14  ;;  %v2509_v0 = vadd.s32 %v2507_v51, %v2501_v43  ;;  %vm2510_vm13 = vc.u32 %v2508_v44, %v2504_v61  ;;  %vm2528_vm14 = vc.u32 %v2520_v11, %v2524_v31 }
 0x2b6   :  { %v2400_v13 = vsub.s32 32, %v2399_v15  ;;  %v2404_v29 = vsub.s32 4294967266, %v2399_v15  ;;  %v2401_v7 = vshll.u32 %v2392_v28, %v2399_v15  ;;  %v2511_v42 = vsel %vm2510_vm13, 1, %v2746_v3 }
 0x2b7   :  { %v2529_v45 = vsel %vm2528_vm14, 1, %v2746_v3  ;;  %v2513_v26 = vadd.s32 %v2511_v42, %v2509_v0  ;;  %v2530_v37 = vadd.s32 %v2524_v31, %v2520_v11  ;;  %v2461_v1 = vshrl.u32 %v2748_v58, %v4516_v19 }
 0x2b8   :  { %v2402_v48 = vshrl.u32 %v2384_v17, %v2400_v13  ;;  %v2405_v47 = vadd.s32 127, %v2404_v29  ;;  %v2531_v38 = vadd.s32 %v2529_v45, %v2523_v46  ;;  %v2482_v28 = vsel %vm2480_vm3, %v4548_v4, 2102212464 }
 0x2b9   :  { %v2514_v2 = vadd.s32 %v2513_v26, %v2503_v20  ;;  %vm2532_vm15 = vc.u32 %v2530_v37, %v2526_v12  ;;  %v2505_v18 = vshrl.u32 %v2500_v22, 16  ;;  %v2481_v52 = vsel %vm2477_vm4, %v2461_v1, %v4550_v53 }
 0x2ba   :  { %v2403_v56 = vor.u32 %v2402_v48, %v2401_v7  ;;  %v2406_v40 = vshll.u32 %v2405_v47, 23  ;;  %v2533_v27 = vsel %vm2532_vm15, 1, %v2746_v3  ;;  %v2525_v21 = vshrl.u32 %v2521_v63, 16 }
 0x2bb   :  { %v2535_v34 = vadd.s32 %v2533_v27, %v2531_v38  ;;  %v2483_v58 = vsel %vm2479_vm7, %v4546_v60, %v2482_v28  ;;  %v2515_v19 = vadd.s32 %v2514_v2, %v2505_v18  ;;  %v2527_v4 = vshrl.u32 %v2522_v5, 16 }
 0x2bc   :  { %v2407_v62 = vor.u32 4788187, %v2406_v40  ;;  %v2410_v54 = vcvt.s32.f32 %v2403_v56  ;;  %v2534_v41 = vadd.s32 %v2530_v37, %v2526_v12  ;;  %v2484_v3 = vsel %vm2478_vm5, %v2481_v52, %v2483_v58 }
 0x2bd   :  { %v2536_v33 = vadd.s32 %v2535_v34, %v2525_v21  ;;  %vm2292_vm1 = vcmp.lt.s32.totalorder %v4337_v49, 0  ;;  %vm4607_vm3 = vcmp.le.f32.partialorder %v2290_v32, 0.7853982  ;;  %v2538_v35 = vmul.u32 %v4558_v10, %v2484_v3 }
 0x2be   :  { %v2408_v9 = vand.u32 2147483647, %v2407_v62  ;;  %vm2540_vm2 = vc.u32 %v2515_v19, %v2534_v41  ;;  %v2414_v23 = vsub.s32 4, %v4553_v16  ;;  %vm2433_vm7 = vweird.f32 %v4337_v49 }
 0x2bf   :  { %v2537_v22 = vadd.s32 %v2536_v33, %v2527_v4  ;;  %v2539_v40 = vadd.s32 %v2534_v41, %v2515_v19  ;;  %vm2447_vm11 = vcmp.lt.s32.totalorder %v4346_v59, 0  ;;  %vm2446_vm10 = vcmp.le.f32.partialorder %v2445_v30, 0.7853982 }
 0x2c0   :  { %v2411_v39 = vmul.f32 %v2410_v54, %v2408_v9  ;;  %v2415_v32 = vsel %vm2292_vm1, %v2414_v23, %v4553_v16  ;;  %vm2588_vm14 = vweird.f32 %v4346_v59 }
 0x2c1   :  { %v2541_v53 = vadd.s32 1, %v2537_v22  ;;  %v2417_v10 = vsel %vm4607_vm3, 0, %v2415_v32 }
 0x2c2   :  { %v2412_v55 = vxor.u32 2147483648, %v2411_v39  ;;  %v2434_v31 = vadd.s32 3, %v2417_v10 }
 0x2c3   :  { %v2542_v36 = vsel %vm2540_vm2, %v2541_v53, %v2537_v22 }
 0x2c4   :  { %v2413_v60 = vsel %vm2292_vm1, %v2412_v55, %v2411_v39  ;;  %v2543_v57 = vadd.s32 %v2542_v36, %v2538_v35  ;;  %v2435_v46 = vand.u32 3, %v2434_v31 }
 0x2c5   :  { %v2416_v8 = vsel %vm4607_vm3, %v4337_v49, %v2413_v60 }
 0x2c6   :  { %v2418_v24 = vmul.f32 %v2416_v8, %v2416_v8  ;;  %v2544_v25 = vadd.s32 536870912, %v2543_v57  ;;  %vm2437_vm5 = vcmp.eq.s32.totalorder %v2435_v46, 0  ;;  %vm2440_vm6 = vcmp.eq.s32.totalorder %v2435_v46, 2 }
 0x2c7   :  { %vm2436_vm9 = vcmp.lt.s32.totalorder %v2435_v46, 2 }
 0x2c8   :  { %v2419_v14 = vmul.f32 -0.001358992, %v2418_v24  ;;  %v2426_v50 = vmul.f32 -0.00019511016, %v2418_v24  ;;  %v2545_v61 = vshrl.u32 %v2544_v25, 30 }
 0x2ca   :  { %v2420_v17 = vadd.f32 0.041655596, %v2419_v14  ;;  %v2427_v43 = vadd.f32 0.008332121, %v2426_v50  ;;  %v2546_v11 = vshll.u32 %v2545_v61, 30  ;;  %v2569_v4 = vsub.s32 4, %v2545_v61 }
 0x2cc   :  { %v2421_v63 = vmul.f32 %v2420_v17, %v2418_v24  ;;  %v2428_v44 = vmul.f32 %v2427_v43, %v2418_v24  ;;  %v2547_v5 = vsub.s32 %v2543_v57, %v2546_v11  ;;  %v2570_v22 = vsel %vm2447_vm11, %v2569_v4, %v2545_v61 }
 0x2cd   :  { %v2572_v6 = vsel %vm2446_vm10, 0, %v2570_v22 }
 0x2ce   :  { %v2422_v15 = vadd.f32 -0.4999988, %v2421_v63  ;;  %v2429_v51 = vadd.f32 -0.16666654, %v2428_v44  ;;  %vm2548_vm4 = vcmp.lt.s32.totalorder %v2547_v5, 0  ;;  %v2549_v20 = vsub.s32 0, %v2547_v5 }
 0x2cf   :  { %v2589_v36 = vadd.s32 3, %v2572_v6 }
 0x2d0   :  { %v2423_v13 = vmul.f32 %v2422_v15, %v2418_v24  ;;  %v2430_v29 = vmul.f32 %v2429_v51, %v2418_v24  ;;  %v2550_v16 = vsel %vm2548_vm4, %v2549_v20, %v2547_v5 }
 0x2d1   :  { %v2551_v48 = vclz %v2550_v16  ;;  %v2590_v50 = vand.u32 3, %v2589_v36 }
 0x2d2   :  { %v2424_v0 = vadd.f32 1.0, %v2423_v13  ;;  %v2431_v7 = vadd.f32 1.0, %v2430_v29 }
 0x2d3   :  { %v2696_v45 = vadd.s32 4294967294, %v2551_v48  ;;  %vm2592_vm12 = vcmp.eq.s32.totalorder %v2590_v50, 0  ;;  %vm2595_vm0 = vcmp.eq.s32.totalorder %v2590_v50, 2  ;;  %vm2591_vm13 = vcmp.lt.s32.totalorder %v2590_v50, 2 }
 0x2d4   :  { %v2432_v47 = vmul.f32 %v2431_v7, %v2416_v8  ;;  %v2441_v42 = vxor.u32 2147483648, %v2424_v0 }
 0x2d5   :  { %vm2697_vm8 = vcmp.lt.s32.totalorder %v2696_v45, 0 }
 0x2d6   :  { %v2438_v26 = vxor.u32 2147483648, %v2432_v47  ;;  %v2442_v37 = vsel %vm2440_vm6, %v2441_v42, %v2432_v47  ;;  %v2554_v38 = vsel %vm2697_vm8, 0, %v2696_v45 }
 0x2d7   :  { %v2555_v1 = vsub.s32 32, %v2554_v38  ;;  %v2559_v28 = vsub.s32 4294967266, %v2554_v38  ;;  %v2556_v62 = vshll.u32 %v2547_v5, %v2554_v38 }
 0x2d8   :  { %v2439_v12 = vsel %vm2437_vm5, %v2424_v0, %v2438_v26 }
 0x2d9   :  { %v2443_v56 = vsel %vm2436_vm9, %v2439_v12, %v2442_v37  ;;  %v2557_v18 = vshrl.u32 %v2539_v40, %v2555_v1  ;;  %v2560_v27 = vadd.s32 127, %v2559_v28 }
 0x2da   :  { %v2444_v2 = vsel %vm2433_vm7, nan, %v2443_v56 }
 0x2db   :  { %2622 = vst [vmem:[#allocation2 + $0x70] sm:$0xff] %v2444_v2  ;;  %v2558_v52 = vor.u32 %v2557_v18, %v2556_v62  ;;  %v2561_v21 = vshll.u32 %v2560_v27, 23 }
 0x2dc   :  { %2630 = vst [vmem:[#allocation2 + $0xf0] sm:$0xff] %v2444_v2 }
 0x2dd   :  { %v2562_v49 = vor.u32 4788187, %v2561_v21  ;;  %v2565_v9 = vcvt.s32.f32 %v2558_v52 }
 0x2df   :  { %v2563_v34 = vand.u32 2147483647, %v2562_v49 }
 0x2e1   :  { %v2566_v54 = vmul.f32 %v2565_v9, %v2563_v34 }
 0x2e3   :  { %v2567_v58 = vxor.u32 2147483648, %v2566_v54 }
 0x2e5   :  { %v2568_v19 = vsel %vm2447_vm11, %v2567_v58, %v2566_v54 }
 0x2e6   :  { %v2571_v33 = vsel %vm2446_vm10, %v4346_v59, %v2568_v19 }
 0x2e7   :  { %v2573_v39 = vmul.f32 %v2571_v33, %v2571_v33 }
 0x2e9   :  { %v2574_v41 = vmul.f32 -0.001358992, %v2573_v39  ;;  %v2581_v3 = vmul.f32 -0.00019511016, %v2573_v39 }
 0x2eb   :  { %v2575_v55 = vadd.f32 0.041655596, %v2574_v41  ;;  %v2582_v53 = vadd.f32 0.008332121, %v2581_v3 }
 0x2ed   :  { %v2576_v60 = vmul.f32 %v2575_v55, %v2573_v39  ;;  %v2583_v35 = vmul.f32 %v2582_v53, %v2573_v39 }
 0x2ef   :  { %v2577_v23 = vadd.f32 -0.4999988, %v2576_v60  ;;  %v2584_v8 = vadd.f32 -0.16666654, %v2583_v35 }
 0x2f1   :  { %v2578_v24 = vmul.f32 %v2577_v23, %v2573_v39  ;;  %v2585_v57 = vmul.f32 %v2584_v8, %v2573_v39 }
 0x2f3   :  { %v2579_v14 = vadd.f32 1.0, %v2578_v24  ;;  %v2586_v30 = vadd.f32 1.0, %v2585_v57 }
 0x2f5   :  { %v2587_v25 = vmul.f32 %v2586_v30, %v2571_v33  ;;  %v2596_v32 = vxor.u32 2147483648, %v2579_v14 }
 0x2f7   :  { %v2593_v17 = vxor.u32 2147483648, %v2587_v25  ;;  %v2597_v61 = vsel %vm2595_vm0, %v2596_v32, %v2587_v25 }
 0x2f9   :  { %v2594_v43 = vsel %vm2592_vm12, %v2579_v14, %v2593_v17 }
 0x2fa   :  { %v2598_v10 = vsel %vm2591_vm13, %v2594_v43, %v2597_v61 }
 0x2fb   :  { %v2599_v63 = vsel %vm2588_vm14, nan, %v2598_v10 }
 0x2fc   :  { %2623 = vst [vmem:[#allocation2 + $0x78] sm:$0xff] %v2599_v63 }
 0x2fd   :  { %2631 = vst [vmem:[#allocation2 + $0xf8] sm:$0xff] %v2599_v63 }
 0x2fe   :  { %2644 = dma.vmem_to_hbm [thread:$0]  %s2637_s14, 4096, %s2639_s17, [#allocation3], %s2755_s18, %s2755_s18, %s2756_s19  }
 0x2ff   :  { %2743 = dma.done.wait [#allocation3], 4096  }
 0x300   :  { %2744 = vsyncadd [#allocation3], 4294963200 }
 0x301   :  { %2649 = vsyncpa [#allocation3], 1 }

</bundles_post_ra>
